<compile_context>
chip_gen: v5e
topology: v5e:2x2
jax: 0.10.0
libtpu: 0.0.40
codegen_flags: <defaults>
</compile_context>

<pallas_src>
import functools

import jax
import jax.numpy as jnp
from jax.experimental import pallas as pl
from jax.experimental.pallas import tpu as pltpu


# ---------------------------------------------------------------------------
# Pallas kernels
# ---------------------------------------------------------------------------
def enc0_kernel(xp_ref, w_ref, b_ref, out_ref, *, H, W, c1):
    """3x3 stride-1 conv (Cin=1, VPU broadcast-MAC) + bias + ReLU.

    xp_ref : (1, H+2, W+2, 1)  bf16  zero-padded input image
    w_ref  : (9, 1, c1)        bf16  taps in (kh, kw) order
    b_ref  : (1, c1)           f32
    out_ref: (1, H+2, W+2, c1) bf16  ReLU activations with a zero border
             (pre-padded so both consumers need no extra jnp.pad round trip).
    """
    acc = jnp.zeros((H, W, c1), jnp.float32)
    k = 0
    for kh in range(3):
        for kw in range(3):
            tap = xp_ref[0, kh:kh + H, kw:kw + W, :].astype(jnp.float32)   # (H,W,1)
            acc = acc + tap * w_ref[k].astype(jnp.float32)                 # bcast (1,c1)
            k += 1
    act = jnp.maximum(acc + b_ref[...], 0.0)
    out_ref[...] = jnp.zeros_like(out_ref)
    out_ref[0, 1:H + 1, 1:W + 1, :] = act.astype(out_ref.dtype)


def enc1_kernel(p00_ref, p01_ref, p10_ref, p11_ref, w_ref, b_ref, out_ref,
                *, Hh, Wh, c2):
    """3x3 stride-2 conv + bias + ReLU, fed from the 4 parity planes of the
    padded input so the kernel only needs static window loads (no strided loads).

    pXY_ref: (1, Hh+1, Wh+1, c1) bf16 where pXY[i,j] = a0p[2i+X, 2j+Y]
    w_ref  : (9, c1, c2) bf16, b_ref: (1, c2) f32, out_ref: (1, Hh, Wh, c2) bf16
    """
    planes = ((p00_ref, p01_ref), (p10_ref, p11_ref))
    acc = jnp.zeros((Hh * Wh, c2), jnp.float32)
    k = 0
    for kh in range(3):
        for kw in range(3):
            src = planes[kh % 2][kw % 2]
            qh, qw = kh // 2, kw // 2
            tap = src[0, qh:qh + Hh, qw:qw + Wh, :]
            tap = tap.reshape(Hh * Wh, tap.shape[-1])
            acc = acc + jnp.dot(tap, w_ref[k], preferred_element_type=jnp.float32)
            k += 1
    act = jnp.maximum(acc + b_ref[...], 0.0)
    out_ref[0] = act.reshape(Hh, Wh, c2).astype(out_ref.dtype)


def dec_head_kernel(a0p_ref, upp_ref, wa_ref, wb_ref, b_ref, wh_ref, bh_ref,
                    out_ref, *, H, W, cmid):
    """Fused decoder block + 1x1 segmentation head.

    The [skip || upsampled] channel concat is expressed as two matmuls per tap
    (never materialized), bias+ReLU in f32, and the 1x1 head is folded in as a
    channel reduction producing a lane-dense (H, W) logits map.

    a0p_ref: (1, H+2, W+2, c1) bf16  padded skip activations
    upp_ref: (1, H+2, W+2, c2) bf16  padded upsampled deep activations
    wa_ref : (9, c1, cmid) bf16      wb_ref: (9, c2, cmid) bf16
    b_ref  : (1, cmid) f32, wh_ref: (1, 1, cmid) f32, bh_ref: (1, 1) f32
    out_ref: (1, H, W) f32
    """
    acc = jnp.zeros((H * W, cmid), jnp.float32)
    k = 0
    for kh in range(3):
        for kw in range(3):
            ta = a0p_ref[0, kh:kh + H, kw:kw + W, :]
            ta = ta.reshape(H * W, ta.shape[-1])
            tb = upp_ref[0, kh:kh + H, kw:kw + W, :]
            tb = tb.reshape(H * W, tb.shape[-1])
            acc = acc + jnp.dot(ta, wa_ref[k], preferred_element_type=jnp.float32)
            acc = acc + jnp.dot(tb, wb_ref[k], preferred_element_type=jnp.float32)
            k += 1
    act = jnp.maximum(acc + b_ref[...], 0.0).reshape(H, W, cmid)
    logits = jnp.sum(act * wh_ref[...], axis=-1) + bh_ref[...]        # (H, W)
    out_ref[0] = logits.astype(out_ref.dtype)


def dice_bce_loss_kernel(x_ref, t_ref, o_ref, bce_acc, inter_acc, p_acc, t_acc,
                         *, inv_total):
    """binary DiceLoss(from_logits, smooth=0, eps=1e-7) + BCEWithLogitsLoss(mean).

    Tiled over the spatial axis; per-lane partial sums are carried in VMEM
    scratch (init at step 0, finalize at the last step). exp(-|x|) is computed
    once and reused for both the BCE softplus term and sigmoid(x).
    """
    i = pl.program_id(0)

    @pl.when(i == 0)
    def _init():
        bce_acc[...] = jnp.zeros_like(bce_acc)
        inter_acc[...] = jnp.zeros_like(inter_acc)
        p_acc[...] = jnp.zeros_like(p_acc)
        t_acc[...] = jnp.zeros_like(t_acc)

    x = x_ref[...].astype(jnp.float32)
    t = t_ref[...].astype(jnp.float32)

    e = jnp.exp(-jnp.abs(x))                       # one exp per element (EUP)
    softplus = jnp.log(1.0 + e)
    bce = jnp.maximum(x, 0.0) - x * t + softplus   # stable BCE-with-logits
    r = pl.reciprocal(1.0 + e, approx=True)
    p = jnp.where(x >= 0.0, r, e * r)              # sigmoid(x) from same exp

    bce_acc[...] += jnp.sum(bce, axis=0, keepdims=True)
    inter_acc[...] += jnp.sum(p * t, axis=0, keepdims=True)
    p_acc[...] += jnp.sum(p, axis=0, keepdims=True)
    t_acc[...] += jnp.sum(t, axis=0, keepdims=True)

    @pl.when(i == pl.num_programs(0) - 1)
    def _finalize():
        bce_mean = jnp.sum(bce_acc[...], keepdims=True) * inv_total      # (1,1)
        inter = jnp.sum(inter_acc[...], keepdims=True)
        tsum = jnp.sum(t_acc[...], keepdims=True)
        card = jnp.sum(p_acc[...], keepdims=True) + tsum
        score = (2.0 * inter) / jnp.maximum(card, 1e-7)
        dice = (1.0 - score) * (tsum > 0.0).astype(jnp.float32)
        o_ref[...] = dice + bce_mean


# ---------------------------------------------------------------------------
# pallas_call wrappers
# ---------------------------------------------------------------------------
_PARALLEL = pltpu.CompilerParams(dimension_semantics=("parallel",))


def enc0_pallas(xp, w0, b0):
    N, Hp, Wp, _ = xp.shape
    H, W = Hp - 2, Wp - 2
    c1 = w0.shape[-1]
    return pl.pallas_call(
        functools.partial(enc0_kernel, H=H, W=W, c1=c1),
        out_shape=jax.ShapeDtypeStruct((N, Hp, Wp, c1), jnp.bfloat16),
        grid=(N,),
        in_specs=[
            pl.BlockSpec((1, Hp, Wp, 1), lambda n: (n, 0, 0, 0)),
            pl.BlockSpec((9, 1, c1), lambda n: (0, 0, 0)),
            pl.BlockSpec((1, c1), lambda n: (0, 0)),
        ],
        out_specs=pl.BlockSpec((1, Hp, Wp, c1), lambda n: (n, 0, 0, 0)),
        compiler_params=_PARALLEL,
    )(xp, w0, b0)


def enc1_pallas(p00, p01, p10, p11, w1, b1):
    N, Hp1, Wp1, c1 = p00.shape
    Hh, Wh = Hp1 - 1, Wp1 - 1
    c2 = w1.shape[-1]
    plane_spec = pl.BlockSpec((1, Hp1, Wp1, c1), lambda n: (n, 0, 0, 0))
    return pl.pallas_call(
        functools.partial(enc1_kernel, Hh=Hh, Wh=Wh, c2=c2),
        out_shape=jax.ShapeDtypeStruct((N, Hh, Wh, c2), jnp.bfloat16),
        grid=(N,),
        in_specs=[
            plane_spec, plane_spec, plane_spec, plane_spec,
            pl.BlockSpec((9, c1, c2), lambda n: (0, 0, 0)),
            pl.BlockSpec((1, c2), lambda n: (0, 0)),
        ],
        out_specs=pl.BlockSpec((1, Hh, Wh, c2), lambda n: (n, 0, 0, 0)),
        compiler_params=_PARALLEL,
    )(p00, p01, p10, p11, w1, b1)


def dec_head_pallas(a0p, upp, wa, wb, bd, wh, bh):
    N, Hp, Wp, c1 = a0p.shape
    H, W = Hp - 2, Wp - 2
    c2 = upp.shape[-1]
    cmid = wa.shape[-1]
    return pl.pallas_call(
        functools.partial(dec_head_kernel, H=H, W=W, cmid=cmid),
        out_shape=jax.ShapeDtypeStruct((N, H, W), jnp.float32),
        grid=(N,),
        in_specs=[
            pl.BlockSpec((1, Hp, Wp, c1), lambda n: (n, 0, 0, 0)),
            pl.BlockSpec((1, Hp, Wp, c2), lambda n: (n, 0, 0, 0)),
            pl.BlockSpec((9, c1, cmid), lambda n: (0, 0, 0)),
            pl.BlockSpec((9, c2, cmid), lambda n: (0, 0, 0)),
            pl.BlockSpec((1, cmid), lambda n: (0, 0)),
            pl.BlockSpec((1, 1, cmid), lambda n: (0, 0, 0)),
            pl.BlockSpec((1, 1), lambda n: (0, 0)),
        ],
        out_specs=pl.BlockSpec((1, H, W), lambda n: (n, 0, 0)),
        compiler_params=_PARALLEL,
    )(a0p, upp, wa, wb, bd, wh, bh)


def _pick_chunk(total, target=2048):
    """Largest multiple of 128 that divides `total` and is <= target; else `total`."""
    if total <= target or total % 128 != 0:
        return total
    t = (target // 128) * 128
    while t >= 128:
        if total % t == 0:
            return t
        t -= 128
    return total


def dice_bce_loss_pallas(logits_2d, masks_2d):
    N, HW = logits_2d.shape
    tile = _pick_chunk(HW)
    grid = (HW // tile,)
    inv_total = 1.0 / float(N * HW)
    loss = pl.pallas_call(
        functools.partial(dice_bce_loss_kernel, inv_total=inv_total),
        out_shape=jax.ShapeDtypeStruct((1, 1), jnp.float32),
        grid=grid,
        in_specs=[
            pl.BlockSpec((N, tile), lambda i: (0, i)),
            pl.BlockSpec((N, tile), lambda i: (0, i)),
        ],
        out_specs=pl.BlockSpec((1, 1), lambda i: (0, 0)),
        scratch_shapes=[pltpu.VMEM((1, tile), jnp.float32) for _ in range(4)],
        compiler_params=pltpu.CompilerParams(dimension_semantics=("arbitrary",)),
    )(logits_2d, masks_2d)
    return loss[0, 0]


# ---------------------------------------------------------------------------
# Model: parameters + forward
# ---------------------------------------------------------------------------
def init_params(key, c1=8, c2=16):
    def conv_init(k, KH, KW, cin, cout):
        kw_, kb_ = jax.random.split(k)
        scale = 1.0 / jnp.sqrt(jnp.float32(KH * KW * cin))
        w = jax.random.normal(kw_, (KH, KW, cin, cout), jnp.float32) * scale
        b = jax.random.normal(kb_, (cout,), jnp.float32) * 0.01
        return {"w": w, "b": b}

    k0, k1, k2, k3 = jax.random.split(key, 4)
    return {
        "enc0": conv_init(k0, 3, 3, 1, c1),          # full-res encoder block
        "enc1": conv_init(k1, 3, 3, c1, c2),         # stride-2 encoder block
        "dec0": conv_init(k2, 3, 3, c1 + c2, c1),    # decoder block (skip concat)
        "head": conv_init(k3, 1, 1, c1, 1),          # 1x1 segmentation head
    }


def segmentation_model_forward(params, images_nchw, masks_nchw=None):
    """Mirrors SegmentationModel.forward: returns logits, or (logits, loss)."""
    N, _, H, W = images_nchw.shape
    assert H % 2 == 0 and W % 2 == 0, "spatial dims must be even for the stride-2 path"
    c1 = params["enc0"]["w"].shape[-1]
    c2 = params["enc1"]["w"].shape[-1]

    # NCHW -> NHWC (channels-last for the kernels; in_channels == 1)
    x = jnp.transpose(images_nchw.astype(jnp.float32), (0, 2, 3, 1))
    xp = jnp.pad(x, ((0, 0), (1, 1), (1, 1), (0, 0))).astype(jnp.bfloat16)

    # kernel-layout weights: bf16 MXU operands, f32 bias / head
    w0 = params["enc0"]["w"].reshape(9, 1, c1).astype(jnp.bfloat16)
    b0 = params["enc0"]["b"].reshape(1, c1).astype(jnp.float32)
    w1 = params["enc1"]["w"].reshape(9, c1, c2).astype(jnp.bfloat16)
    b1 = params["enc1"]["b"].reshape(1, c2).astype(jnp.float32)
    wd = params["dec0"]["w"]
    wa = wd[:, :, :c1, :].reshape(9, c1, c1).astype(jnp.bfloat16)
    wb = wd[:, :, c1:, :].reshape(9, c2, c1).astype(jnp.bfloat16)
    bd = params["dec0"]["b"].reshape(1, c1).astype(jnp.float32)
    wh = params["head"]["w"].reshape(1, 1, c1).astype(jnp.float32)
    bh = params["head"]["b"].reshape(1, 1).astype(jnp.float32)

    # encoder level 0 (full res); output comes back pre-padded with a zero border
    a0p = enc0_pallas(xp, w0, b0)                              # (N, H+2, W+2, c1)

    # stride-2 encoder conv fed from the 4 parity planes of a0p (cheap XLA
    # strided slices, no 9x patch inflation, no strided loads in-kernel)
    p00 = a0p[:, 0::2, 0::2, :]
    p01 = a0p[:, 0::2, 1::2, :]
    p10 = a0p[:, 1::2, 0::2, :]
    p11 = a0p[:, 1::2, 1::2, :]
    x1 = enc1_pallas(p00, p01, p10, p11, w1, b1)               # (N, H/2, W/2, c2)

    # TODO(synk): 2x nearest upsample + pad remain XLA layout glue; folding them
    # into the decoder kernel would remove one more feature-map round trip.
    up = jnp.repeat(jnp.repeat(x1, 2, axis=1), 2, axis=2)
    upp = jnp.pad(up, ((0, 0), (1, 1), (1, 1), (0, 0)))        # (N, H+2, W+2, c2)

    # TODO(synk): very large spatial sizes would need row-tiling (with halos)
    # inside the fused conv kernels instead of whole-image blocks per grid step.
    logits_hw = dec_head_pallas(a0p, upp, wa, wb, bd, wh, bh)  # (N, H, W) f32
    logits = logits_hw[:, None, :, :]                          # (N, 1, H, W)

    if masks_nchw is not None:
        loss = dice_bce_loss_pallas(
            logits_hw.reshape(N, H * W),
            masks_nchw.astype(jnp.float32).reshape(N, H * W))
        return logits, loss
    return logits


# ---------------------------------------------------------------------------
if __name__ == "__main__":
    key = jax.random.PRNGKey(0)
    k_param, k_img, k_msk = jax.random.split(key, 3)

    params = init_params(k_param)

    N, C, H, W = 2, 1, 16, 16
    images = jax.random.normal(k_img, (N, C, H, W), jnp.float32)
    masks = (jax.random.uniform(k_msk, (N, C, H, W)) > 0.5).astype(jnp.float32)

    # inference path (masks=None)
    logits = segmentation_model_forward(params, images)
    logits = jax.block_until_ready(logits)
    assert logits.shape == (N, 1, H, W), logits.shape

    # training path (masks given) -> (logits, dice + bce loss)
    logits2, loss = segmentation_model_forward(params, images, masks)
    jax.block_until_ready((logits2, loss))
    assert logits2.shape == (N, 1, H, W)
    assert loss.shape == ()

    print("KERNEL_OK")
</pallas_src>

<mosaic_0001>
module attributes {stable_mosaic.version = 11 : i64} {
  func.func @enc0_kernel(%arg0: i32, %arg1: memref<1x18x18x1xbf16, #tpu.memory_space<vmem>>, %arg2: memref<9x1x8xbf16, #tpu.memory_space<vmem>>, %arg3: memref<1x8xf32, #tpu.memory_space<vmem>>, %arg4: memref<1x18x18x8xbf16, #tpu.memory_space<vmem>>) attributes {dimension_semantics = [#tpu.dimension_semantics<parallel>], iteration_bounds = array<i64: 2>, scalar_prefetch = 0 : i64, scratch_operands = 0 : i64, tpu.core_type = #tpu.core_type<tc>, window_params = [{transform_indices = @transform_0, window_bounds = array<i64: 1, 18, 18, 1>}, {pipeline_mode = #tpu.pipeline_mode<synchronous>, transform_indices = @transform_1, window_bounds = array<i64: 9, 1, 8>}, {pipeline_mode = #tpu.pipeline_mode<synchronous>, transform_indices = @transform_2, window_bounds = array<i64: 1, 8>}, {transform_indices = @transform_3, window_bounds = array<i64: 1, 18, 18, 8>}]} {
    %cst = arith.constant 0.000000e+00 : f32
    %0 = vector.broadcast %cst : f32 to vector<16x16x8xf32>
    %c0 = arith.constant 0 : index
    %c0_0 = arith.constant 0 : index
    %c0_1 = arith.constant 0 : index
    %c0_2 = arith.constant 0 : index
    %1 = vector.load %arg1[%c0, %c0_0, %c0_1, %c0_2] : memref<1x18x18x1xbf16, #tpu.memory_space<vmem>>, vector<1x16x16x1xbf16>
    %2 = vector.shape_cast %1 : vector<1x16x16x1xbf16> to vector<16x16x1xbf16>
    %3 = arith.extf %2 : vector<16x16x1xbf16> to vector<16x16x1xf32>
    %c0_3 = arith.constant 0 : index
    %c0_4 = arith.constant 0 : index
    %c0_5 = arith.constant 0 : index
    %4 = vector.load %arg2[%c0_3, %c0_4, %c0_5] : memref<9x1x8xbf16, #tpu.memory_space<vmem>>, vector<1x1x8xbf16>
    %5 = vector.shape_cast %4 : vector<1x1x8xbf16> to vector<1x8xbf16>
    %6 = arith.extf %5 : vector<1x8xbf16> to vector<1x8xf32>
    %7 = vector.shape_cast %6 : vector<1x8xf32> to vector<1x1x8xf32>
    %8 = vector.broadcast %3 : vector<16x16x1xf32> to vector<16x16x8xf32>
    %9 = vector.broadcast %7 : vector<1x1x8xf32> to vector<16x16x8xf32>
    %10 = arith.mulf %8, %9 : vector<16x16x8xf32>
    %11 = arith.addf %0, %10 : vector<16x16x8xf32>
    %c0_6 = arith.constant 0 : index
    %c0_7 = arith.constant 0 : index
    %c1 = arith.constant 1 : index
    %c0_8 = arith.constant 0 : index
    %12 = vector.load %arg1[%c0_6, %c0_7, %c1, %c0_8] : memref<1x18x18x1xbf16, #tpu.memory_space<vmem>>, vector<1x16x16x1xbf16>
    %13 = vector.shape_cast %12 : vector<1x16x16x1xbf16> to vector<16x16x1xbf16>
    %14 = arith.extf %13 : vector<16x16x1xbf16> to vector<16x16x1xf32>
    %c1_9 = arith.constant 1 : index
    %c0_10 = arith.constant 0 : index
    %c0_11 = arith.constant 0 : index
    %15 = vector.load %arg2[%c1_9, %c0_10, %c0_11] : memref<9x1x8xbf16, #tpu.memory_space<vmem>>, vector<1x1x8xbf16>
    %16 = vector.shape_cast %15 : vector<1x1x8xbf16> to vector<1x8xbf16>
    %17 = arith.extf %16 : vector<1x8xbf16> to vector<1x8xf32>
    %18 = vector.shape_cast %17 : vector<1x8xf32> to vector<1x1x8xf32>
    %19 = vector.broadcast %14 : vector<16x16x1xf32> to vector<16x16x8xf32>
    %20 = vector.broadcast %18 : vector<1x1x8xf32> to vector<16x16x8xf32>
    %21 = arith.mulf %19, %20 : vector<16x16x8xf32>
    %22 = arith.addf %11, %21 : vector<16x16x8xf32>
    %c0_12 = arith.constant 0 : index
    %c0_13 = arith.constant 0 : index
    %c2 = arith.constant 2 : index
    %c0_14 = arith.constant 0 : index
    %23 = vector.load %arg1[%c0_12, %c0_13, %c2, %c0_14] : memref<1x18x18x1xbf16, #tpu.memory_space<vmem>>, vector<1x16x16x1xbf16>
    %24 = vector.shape_cast %23 : vector<1x16x16x1xbf16> to vector<16x16x1xbf16>
    %25 = arith.extf %24 : vector<16x16x1xbf16> to vector<16x16x1xf32>
    %c2_15 = arith.constant 2 : index
    %c0_16 = arith.constant 0 : index
    %c0_17 = arith.constant 0 : index
    %26 = vector.load %arg2[%c2_15, %c0_16, %c0_17] : memref<9x1x8xbf16, #tpu.memory_space<vmem>>, vector<1x1x8xbf16>
    %27 = vector.shape_cast %26 : vector<1x1x8xbf16> to vector<1x8xbf16>
    %28 = arith.extf %27 : vector<1x8xbf16> to vector<1x8xf32>
    %29 = vector.shape_cast %28 : vector<1x8xf32> to vector<1x1x8xf32>
    %30 = vector.broadcast %25 : vector<16x16x1xf32> to vector<16x16x8xf32>
    %31 = vector.broadcast %29 : vector<1x1x8xf32> to vector<16x16x8xf32>
    %32 = arith.mulf %30, %31 : vector<16x16x8xf32>
    %33 = arith.addf %22, %32 : vector<16x16x8xf32>
    %c0_18 = arith.constant 0 : index
    %c1_19 = arith.constant 1 : index
    %c0_20 = arith.constant 0 : index
    %c0_21 = arith.constant 0 : index
    %34 = vector.load %arg1[%c0_18, %c1_19, %c0_20, %c0_21] : memref<1x18x18x1xbf16, #tpu.memory_space<vmem>>, vector<1x16x16x1xbf16>
    %35 = vector.shape_cast %34 : vector<1x16x16x1xbf16> to vector<16x16x1xbf16>
    %36 = arith.extf %35 : vector<16x16x1xbf16> to vector<16x16x1xf32>
    %c3 = arith.constant 3 : index
    %c0_22 = arith.constant 0 : index
    %c0_23 = arith.constant 0 : index
    %37 = vector.load %arg2[%c3, %c0_22, %c0_23] : memref<9x1x8xbf16, #tpu.memory_space<vmem>>, vector<1x1x8xbf16>
    %38 = vector.shape_cast %37 : vector<1x1x8xbf16> to vector<1x8xbf16>
    %39 = arith.extf %38 : vector<1x8xbf16> to vector<1x8xf32>
    %40 = vector.shape_cast %39 : vector<1x8xf32> to vector<1x1x8xf32>
    %41 = vector.broadcast %36 : vector<16x16x1xf32> to vector<16x16x8xf32>
    %42 = vector.broadcast %40 : vector<1x1x8xf32> to vector<16x16x8xf32>
    %43 = arith.mulf %41, %42 : vector<16x16x8xf32>
    %44 = arith.addf %33, %43 : vector<16x16x8xf32>
    %c0_24 = arith.constant 0 : index
    %c1_25 = arith.constant 1 : index
    %c1_26 = arith.constant 1 : index
    %c0_27 = arith.constant 0 : index
    %45 = vector.load %arg1[%c0_24, %c1_25, %c1_26, %c0_27] : memref<1x18x18x1xbf16, #tpu.memory_space<vmem>>, vector<1x16x16x1xbf16>
    %46 = vector.shape_cast %45 : vector<1x16x16x1xbf16> to vector<16x16x1xbf16>
    %47 = arith.extf %46 : vector<16x16x1xbf16> to vector<16x16x1xf32>
    %c4 = arith.constant 4 : index
    %c0_28 = arith.constant 0 : index
    %c0_29 = arith.constant 0 : index
    %48 = vector.load %arg2[%c4, %c0_28, %c0_29] : memref<9x1x8xbf16, #tpu.memory_space<vmem>>, vector<1x1x8xbf16>
    %49 = vector.shape_cast %48 : vector<1x1x8xbf16> to vector<1x8xbf16>
    %50 = arith.extf %49 : vector<1x8xbf16> to vector<1x8xf32>
    %51 = vector.shape_cast %50 : vector<1x8xf32> to vector<1x1x8xf32>
    %52 = vector.broadcast %47 : vector<16x16x1xf32> to vector<16x16x8xf32>
    %53 = vector.broadcast %51 : vector<1x1x8xf32> to vector<16x16x8xf32>
    %54 = arith.mulf %52, %53 : vector<16x16x8xf32>
    %55 = arith.addf %44, %54 : vector<16x16x8xf32>
    %c0_30 = arith.constant 0 : index
    %c1_31 = arith.constant 1 : index
    %c2_32 = arith.constant 2 : index
    %c0_33 = arith.constant 0 : index
    %56 = vector.load %arg1[%c0_30, %c1_31, %c2_32, %c0_33] : memref<1x18x18x1xbf16, #tpu.memory_space<vmem>>, vector<1x16x16x1xbf16>
    %57 = vector.shape_cast %56 : vector<1x16x16x1xbf16> to vector<16x16x1xbf16>
    %58 = arith.extf %57 : vector<16x16x1xbf16> to vector<16x16x1xf32>
    %c5 = arith.constant 5 : index
    %c0_34 = arith.constant 0 : index
    %c0_35 = arith.constant 0 : index
    %59 = vector.load %arg2[%c5, %c0_34, %c0_35] : memref<9x1x8xbf16, #tpu.memory_space<vmem>>, vector<1x1x8xbf16>
    %60 = vector.shape_cast %59 : vector<1x1x8xbf16> to vector<1x8xbf16>
    %61 = arith.extf %60 : vector<1x8xbf16> to vector<1x8xf32>
    %62 = vector.shape_cast %61 : vector<1x8xf32> to vector<1x1x8xf32>
    %63 = vector.broadcast %58 : vector<16x16x1xf32> to vector<16x16x8xf32>
    %64 = vector.broadcast %62 : vector<1x1x8xf32> to vector<16x16x8xf32>
    %65 = arith.mulf %63, %64 : vector<16x16x8xf32>
    %66 = arith.addf %55, %65 : vector<16x16x8xf32>
    %c0_36 = arith.constant 0 : index
    %c2_37 = arith.constant 2 : index
    %c0_38 = arith.constant 0 : index
    %c0_39 = arith.constant 0 : index
    %67 = vector.load %arg1[%c0_36, %c2_37, %c0_38, %c0_39] : memref<1x18x18x1xbf16, #tpu.memory_space<vmem>>, vector<1x16x16x1xbf16>
    %68 = vector.shape_cast %67 : vector<1x16x16x1xbf16> to vector<16x16x1xbf16>
    %69 = arith.extf %68 : vector<16x16x1xbf16> to vector<16x16x1xf32>
    %c6 = arith.constant 6 : index
    %c0_40 = arith.constant 0 : index
    %c0_41 = arith.constant 0 : index
    %70 = vector.load %arg2[%c6, %c0_40, %c0_41] : memref<9x1x8xbf16, #tpu.memory_space<vmem>>, vector<1x1x8xbf16>
    %71 = vector.shape_cast %70 : vector<1x1x8xbf16> to vector<1x8xbf16>
    %72 = arith.extf %71 : vector<1x8xbf16> to vector<1x8xf32>
    %73 = vector.shape_cast %72 : vector<1x8xf32> to vector<1x1x8xf32>
    %74 = vector.broadcast %69 : vector<16x16x1xf32> to vector<16x16x8xf32>
    %75 = vector.broadcast %73 : vector<1x1x8xf32> to vector<16x16x8xf32>
    %76 = arith.mulf %74, %75 : vector<16x16x8xf32>
    %77 = arith.addf %66, %76 : vector<16x16x8xf32>
    %c0_42 = arith.constant 0 : index
    %c2_43 = arith.constant 2 : index
    %c1_44 = arith.constant 1 : index
    %c0_45 = arith.constant 0 : index
    %78 = vector.load %arg1[%c0_42, %c2_43, %c1_44, %c0_45] : memref<1x18x18x1xbf16, #tpu.memory_space<vmem>>, vector<1x16x16x1xbf16>
    %79 = vector.shape_cast %78 : vector<1x16x16x1xbf16> to vector<16x16x1xbf16>
    %80 = arith.extf %79 : vector<16x16x1xbf16> to vector<16x16x1xf32>
    %c7 = arith.constant 7 : index
    %c0_46 = arith.constant 0 : index
    %c0_47 = arith.constant 0 : index
    %81 = vector.load %arg2[%c7, %c0_46, %c0_47] : memref<9x1x8xbf16, #tpu.memory_space<vmem>>, vector<1x1x8xbf16>
    %82 = vector.shape_cast %81 : vector<1x1x8xbf16> to vector<1x8xbf16>
    %83 = arith.extf %82 : vector<1x8xbf16> to vector<1x8xf32>
    %84 = vector.shape_cast %83 : vector<1x8xf32> to vector<1x1x8xf32>
    %85 = vector.broadcast %80 : vector<16x16x1xf32> to vector<16x16x8xf32>
    %86 = vector.broadcast %84 : vector<1x1x8xf32> to vector<16x16x8xf32>
    %87 = arith.mulf %85, %86 : vector<16x16x8xf32>
    %88 = arith.addf %77, %87 : vector<16x16x8xf32>
    %c0_48 = arith.constant 0 : index
    %c2_49 = arith.constant 2 : index
    %c2_50 = arith.constant 2 : index
    %c0_51 = arith.constant 0 : index
    %89 = vector.load %arg1[%c0_48, %c2_49, %c2_50, %c0_51] : memref<1x18x18x1xbf16, #tpu.memory_space<vmem>>, vector<1x16x16x1xbf16>
    %90 = vector.shape_cast %89 : vector<1x16x16x1xbf16> to vector<16x16x1xbf16>
    %91 = arith.extf %90 : vector<16x16x1xbf16> to vector<16x16x1xf32>
    %c8 = arith.constant 8 : index
    %c0_52 = arith.constant 0 : index
    %c0_53 = arith.constant 0 : index
    %92 = vector.load %arg2[%c8, %c0_52, %c0_53] : memref<9x1x8xbf16, #tpu.memory_space<vmem>>, vector<1x1x8xbf16>
    %93 = vector.shape_cast %92 : vector<1x1x8xbf16> to vector<1x8xbf16>
    %94 = arith.extf %93 : vector<1x8xbf16> to vector<1x8xf32>
    %95 = vector.shape_cast %94 : vector<1x8xf32> to vector<1x1x8xf32>
    %96 = vector.broadcast %91 : vector<16x16x1xf32> to vector<16x16x8xf32>
    %97 = vector.broadcast %95 : vector<1x1x8xf32> to vector<16x16x8xf32>
    %98 = arith.mulf %96, %97 : vector<16x16x8xf32>
    %99 = arith.addf %88, %98 : vector<16x16x8xf32>
    %c0_54 = arith.constant 0 : index
    %c0_55 = arith.constant 0 : index
    %100 = vector.load %arg3[%c0_54, %c0_55] : memref<1x8xf32, #tpu.memory_space<vmem>>, vector<1x8xf32>
    %101 = vector.shape_cast %100 : vector<1x8xf32> to vector<1x1x8xf32>
    %102 = vector.broadcast %101 : vector<1x1x8xf32> to vector<16x16x8xf32>
    %103 = arith.addf %99, %102 : vector<16x16x8xf32>
    %cst_56 = arith.constant 0.000000e+00 : f32
    %104 = vector.broadcast %cst_56 : f32 to vector<16x16x8xf32>
    %105 = arith.maximumf %103, %104 : vector<16x16x8xf32>
    %cst_57 = arith.constant 0.000000e+00 : bf16
    %106 = vector.broadcast %cst_57 : bf16 to vector<1x18x18x8xbf16>
    %c0_58 = arith.constant 0 : index
    %c0_59 = arith.constant 0 : index
    %c0_60 = arith.constant 0 : index
    %c0_61 = arith.constant 0 : index
    %107 = vector.load %arg4[%c0_58, %c0_59, %c0_60, %c0_61] : memref<1x18x18x8xbf16, #tpu.memory_space<vmem>>, vector<1x18x18x8xbf16>
    tpu.vector_store %arg4[%c0_58, %c0_59, %c0_60, %c0_61], %106 {strides = array<i32>} : memref<1x18x18x8xbf16, #tpu.memory_space<vmem>>, vector<1x18x18x8xbf16>,
    %108 = arith.truncf %105 : vector<16x16x8xf32> to vector<16x16x8xbf16>
    %c0_62 = arith.constant 0 : index
    %c1_63 = arith.constant 1 : index
    %c1_64 = arith.constant 1 : index
    %c0_65 = arith.constant 0 : index
    %109 = vector.load %arg4[%c0_62, %c1_63, %c1_64, %c0_65] : memref<1x18x18x8xbf16, #tpu.memory_space<vmem>>, vector<1x16x16x8xbf16>
    %110 = vector.shape_cast %109 : vector<1x16x16x8xbf16> to vector<16x16x8xbf16>
    %111 = vector.shape_cast %108 : vector<16x16x8xbf16> to vector<1x16x16x8xbf16>
    tpu.vector_store %arg4[%c0_62, %c1_63, %c1_64, %c0_65], %111 {strides = array<i32>} : memref<1x18x18x8xbf16, #tpu.memory_space<vmem>>, vector<1x16x16x8xbf16>,
    return
  }
  func.func @transform_0(%arg0: i32) -> (i32, i32, i32, i32) {
    %c0_i32 = arith.constant 0 : i32
    %c0_i32_0 = arith.constant 0 : i32
    %c0_i32_1 = arith.constant 0 : i32
    %c0_i32_2 = arith.constant 0 : i32
    return %arg0, %c0_i32, %c0_i32_0, %c0_i32_1 : i32, i32, i32, i32
  }
  func.func @transform_1(%arg0: i32) -> (i32, i32, i32) {
    %c0_i32 = arith.constant 0 : i32
    %c0_i32_0 = arith.constant 0 : i32
    %c0_i32_1 = arith.constant 0 : i32
    %c0_i32_2 = arith.constant 0 : i32
    return %c0_i32, %c0_i32_0, %c0_i32_1 : i32, i32, i32
  }
  func.func @transform_2(%arg0: i32) -> (i32, i32) {
    %c0_i32 = arith.constant 0 : i32
    %c0_i32_0 = arith.constant 0 : i32
    %c0_i32_1 = arith.constant 0 : i32
    return %c0_i32, %c0_i32_0 : i32, i32
  }
  func.func @transform_3(%arg0: i32) -> (i32, i32, i32, i32) {
    %c0_i32 = arith.constant 0 : i32
    %c0_i32_0 = arith.constant 0 : i32
    %c0_i32_1 = arith.constant 0 : i32
    %c0_i32_2 = arith.constant 0 : i32
    return %arg0, %c0_i32, %c0_i32_0, %c0_i32_1 : i32, i32, i32, i32
  }
}

</mosaic_0001>

<bundles_post_ra>
// kernel: tpu_custom_call.1
= control target key start
LH: loop header
LB: loop body
LE: loop exit
PB: predicated region body
PF: predicated region fallthrough
CT: control target
= control target key end

     0   :  { %s5802_s12 = smov 0   ;;  %s9312_s0 = inlined_call_operand.vmem [shape: bf16[2,18,18,1], index: 0, kind: input, shape index: {}]   ;;  %s9313_s1 = inlined_call_operand.vmem [shape: bf16[9,1,8], index: 1, kind: input, shape index: {}]   ;;  %s9314_s2 = inlined_call_operand.vmem [shape: f32[1,8], index: 2, kind: input, shape index: {}]   ;;  %s9315_s3 = inlined_call_operand.vmem [shape: bf16[2,18,18,8], index: 3, kind: output, shape index: {}]  }
   0x1 LB: > { %s4511_s13 = sadd.s32 4294967295, %s5779_s12   ;;  %p4515_p0 = scmp.ge.s32.totalorder %s5779_s12, 1  ;;  %s5779_s12 = sphi %s5802_s12, %s13_s12  }
   0x2   : > { %p137_p1 = scmp.lt.s32.totalorder %s5779_s12, 3 }
   0x4   : > { %p138_p2 = pnand %p4515_p0, %p137_p1 }
   0x6   : > { %141 = sbr.rel (%p138_p2) target bundleno = 679 (0x2a7), region = 32 }
   0xb   : > { %p161_p3 = scmp.lt.s32.totalorder %s4511_s13, 1  ;;  %v9316_v0 = vmov 0   ;;  %vm899_vm0 = vcmask 1046528   ;;  %vm1256_vm1 = vcmask 1045504   ;;  %vm3930_vm2 = vcmask 57344  }
   0xc   : > { %5070 = vset.pattern.permute.xlu2 %v9316_v0  ;;  %5059 = vset.pattern.permute.xlu1 %v9316_v0  ;;  %vm4015_vm3 = vsmask.f32 256  ;;  %vm3927_vm5 = vcmask 60416   ;;  %vm4016_vm6 = vsmask.f32 4368 }
   0xd   : > { %5048 = vset.pattern.permute.xlu0 %v9316_v0  ;;  %s9946_s13 = smov (!%p161_p3, %s4511_s13), 1  ;;  %vm8465_vm4 = vmand %vm3930_vm2, %vm4015_vm3  ;;  %vm4340_vm7 = vsmask.f32 7938 }
   0xe   : > { %s5038_s14 = smul.u32 216, %s9946_s13  ;;  %vm8837_vm8 = vmor %vm4015_vm3, %vm4016_vm6 }
   0xf   : > { %vm8850_vm9 = vmand %vm3927_vm5, %vm4340_vm7 }
  0x10   : > { %s5821_s17 = scalar_lea.vmem %s9312_s0, %s5038_s14  ;;  %s8280_s11 = scalar_lea.vmem %s9315_s3, %s5038_s14 }
  0x11   : > { %v4993_v1 = vld [vmem:[%s5821_s17 + $0x30] sm:$0xff]   ;;  %v4992_v2 = vld [vmem:[%s5821_s17 + $0x18] sm:$0xff]   ;;  %v4801_v3 = vld [vmem:[%s5821_s17] sm:$0xff]  }
  0x12   : > { %v4810_v4 = vunpack.c.l.bf16 %v4993_v1  ;;  %v4811_v5 = vunpack.c.h.bf16 %v4993_v1  ;;  %v4806_v6 = vunpack.c.l.bf16 %v4992_v2  ;;  %v4807_v7 = vunpack.c.h.bf16 %v4992_v2  ;;  %v182_v10 = vld [vmem:[%s5821_s17 + $0x3c] sm:$0xff]   ;;  %v178_v11 = vld [vmem:[%s5821_s17 + $0x24] sm:$0xff]   ;;  %v174_v14 = vld [vmem:[%s5821_s17 + $0xc] sm:$0xff]  }
  0x13   : > { %v4802_v8 = vunpack.c.l.bf16 %v4801_v3  ;;  %v4803_v9 = vunpack.c.h.bf16 %v4801_v3  ;;  %v214_v16 = vunpack.c.l.bf16 %v182_v10  ;;  %v215_v17 = vunpack.c.h.bf16 %v182_v10  ;;  %v4995_v25 = vld [vmem:[%s5821_s17 + $0x60] sm:$0xff]   ;;  %v186_v26 = vld [vmem:[%s5821_s17 + $0x54] sm:$0xff]   ;;  %v4994_v27 = vld [vmem:[%s5821_s17 + $0x48] sm:$0xff]  }
  0x14   : > { %v5828_v12 = vpack.i.bf16 %v4811_v5, %v4810_v4  ;;  %v5830_v13 = vpack.i.bf16 %v4807_v7, %v4806_v6  ;;  %v210_v18 = vunpack.c.l.bf16 %v178_v11  ;;  %v211_v19 = vunpack.c.h.bf16 %v178_v11  ;;  %v194_v37 = vld [vmem:[%s5821_s17 + $0x84] sm:$0xff]   ;;  %v4996_v38 = vld [vmem:[%s5821_s17 + $0x78] sm:$0xff]   ;;  %v190_v39 = vld [vmem:[%s5821_s17 + $0x6c] sm:$0xff]  }
  0x15   : > { %v5833_v15 = vpack.i.bf16 %v4803_v9, %v4802_v8  ;;  %v206_v20 = vunpack.c.l.bf16 %v174_v14  ;;  %v207_v21 = vunpack.c.h.bf16 %v174_v14  ;;  %v5076_v22 = vpack.i.bf16 %v215_v17, %v214_v16  ;;  %v4998_v49 = vld [vmem:[%s5821_s17 + $0xa8] sm:$0xff]   ;;  %v198_v50 = vld [vmem:[%s5821_s17 + $0x9c] sm:$0xff]   ;;  %v4997_v51 = vld [vmem:[%s5821_s17 + $0x90] sm:$0xff]  }
  0x16   : > { %5072 = vperm.xlu2 %5070, %v5828_v12   ;;  %5061 = vperm.xlu1 %5059, %v5830_v13   ;;  %v5065_v23 = vpack.i.bf16 %v211_v19, %v210_v18  ;;  %v4818_v28 = vunpack.c.l.bf16 %v4995_v25  ;;  %v4819_v29 = vunpack.c.h.bf16 %v4995_v25  ;;  %v218_v30 = vunpack.c.l.bf16 %v186_v26  ;;  %v465_v61 = vld [vmem:[%s5821_s17 + $0x8] sm:$0x1]  ;;  %v466_v62 = vld [vmem:[%s5821_s17 + $0xc] sm:$0xff]   ;;  %v202_v63 = vld [vmem:[%s5821_s17 + $0xb4] sm:$0xff]  }
  0x17   : > { %5050 = vperm.xlu0 %5048, %v5833_v15   ;;  %v5054_v24 = vpack.i.bf16 %v207_v21, %v206_v20  ;;  %v219_v31 = vunpack.c.h.bf16 %v186_v26  ;;  %v4814_v32 = vunpack.c.l.bf16 %v4994_v27  ;;  %v4815_v33 = vunpack.c.h.bf16 %v4994_v27  ;;  %v471_v7 = vld [vmem:[%s5821_s17 + $0x20] sm:$0x1]  ;;  %v472_v8 = vld [vmem:[%s5821_s17 + $0x24] sm:$0xff]   ;;  %v468_v9 = vld [vmem:[%s5821_s17 + $0x14] sm:$0x1] }
  0x18   : > { %v5841_v34 = vpack.i.bf16 %v4819_v29, %v4818_v28  ;;  %v226_v40 = vunpack.c.l.bf16 %v194_v37  ;;  %v227_v41 = vunpack.c.h.bf16 %v194_v37  ;;  %v4822_v42 = vunpack.c.l.bf16 %v4996_v38  ;;  %v477_v19 = vld [vmem:[%s5821_s17 + $0x38] sm:$0x1]  ;;  %v478_v20 = vld [vmem:[%s5821_s17 + $0x3c] sm:$0xff]   ;;  %v474_v21 = vld [vmem:[%s5821_s17 + $0x2c] sm:$0x1] }
  0x19   : > { %v5086_v35 = vpack.i.bf16 %v219_v31, %v218_v30  ;;  %v5843_v36 = vpack.i.bf16 %v4815_v33, %v4814_v32  ;;  %v4823_v43 = vunpack.c.h.bf16 %v4996_v38  ;;  %v222_v44 = vunpack.c.l.bf16 %v190_v39  ;;  %v483_v27 = vld [vmem:[%s5821_s17 + $0x50] sm:$0x1]  ;;  %v484_v28 = vld [vmem:[%s5821_s17 + $0x54] sm:$0xff]   ;;  %v480_v29 = vld [vmem:[%s5821_s17 + $0x44] sm:$0x1] }
  0x1a   : > { %v223_v45 = vunpack.c.h.bf16 %v190_v39  ;;  %v5106_v46 = vpack.i.bf16 %v227_v41, %v226_v40  ;;  %v4830_v52 = vunpack.c.l.bf16 %v4998_v49  ;;  %v4831_v53 = vunpack.c.h.bf16 %v4998_v49  ;;  %v489_v38 = vld [vmem:[%s5821_s17 + $0x68] sm:$0x1]  ;;  %v490_v39 = vld [vmem:[%s5821_s17 + $0x6c] sm:$0xff]   ;;  %v486_v40 = vld [vmem:[%s5821_s17 + $0x5c] sm:$0x1] }
  0x1b   : > { %v5850_v47 = vpack.i.bf16 %v4823_v43, %v4822_v42  ;;  %v230_v54 = vunpack.c.l.bf16 %v198_v50  ;;  %v231_v55 = vunpack.c.h.bf16 %v198_v50  ;;  %v4826_v56 = vunpack.c.l.bf16 %v4997_v51  ;;  %v496_v49 = vld [vmem:[%s5821_s17 + $0x84] sm:$0xff]   ;;  %v492_v50 = vld [vmem:[%s5821_s17 + $0x74] sm:$0x1]  ;;  %v4558_v0 = vld [vmem:[%s5821_s17 + $0x20] sm:$0x1] }
  0x1c   : > { %v5096_v48 = vpack.i.bf16 %v223_v45, %v222_v44  ;;  %v4827_v57 = vunpack.c.h.bf16 %v4997_v51  ;;  %v5856_v58 = vpack.i.bf16 %v4831_v53, %v4830_v52  ;;  %v513_v1 = vunpack.c.l.bf16 %v465_v61  ;;  %v498_v61 = vld [vmem:[%s5821_s17 + $0x8c] sm:$0x1] }
  0x1d   : > { %v5116_v59 = vpack.i.bf16 %v231_v55, %v230_v54  ;;  %v514_v2 = vunpack.c.l.bf16 %v466_v62  ;;  %v234_v3 = vunpack.c.l.bf16 %v202_v63  ;;  %v235_v4 = vunpack.c.h.bf16 %v202_v63 }
  0x1e   : > { %5077 = vperm.xlu2 %5070, %v5076_v22   ;;  %5066 = vperm.xlu1 %5059, %v5065_v23   ;;  %v5858_v60 = vpack.i.bf16 %v4827_v57, %v4826_v56  ;;  %v519_v10 = vunpack.c.l.bf16 %v471_v7  ;;  %v520_v11 = vunpack.c.l.bf16 %v472_v8  ;;  %v515_v14 = vunpack.c.h.bf16 %v466_v62  ;;  %v501_v57 = vld [vmem:[%s5821_s17 + $0x98] sm:$0x1]  ;;  %v504_v7 = vld [vmem:[%s5821_s17 + $0xa4] sm:$0x1] }
  0x1f   : > { %5055 = vperm.xlu0 %5048, %v5054_v24   ;;  %v5136_v5 = vpack.i.bf16 %v514_v2, %v513_v1  ;;  %v5126_v6 = vpack.i.bf16 %v235_v4, %v234_v3  ;;  %v516_v16 = vunpack.c.l.bf16 %v468_v9  ;;  %v525_v22 = vunpack.c.l.bf16 %v477_v19  ;;  %v1047_v19 = vld [vmem:[%s5821_s17 + $0x24] sm:$0xe] }
  0x20   : > { %v5151_v17 = vpack.i.bf16 %v520_v11, %v519_v10  ;;  %v526_v23 = vunpack.c.l.bf16 %v478_v20  ;;  %v522_v24 = vunpack.c.l.bf16 %v474_v21  ;;  %v531_v30 = vunpack.c.l.bf16 %v483_v27  ;;  %v1045_v21 = vld [vmem:[%s5821_s17 + $0xc] sm:$0xe] }
  0x21   : > { %v5141_v18 = vpack.i.bf16 %v516_v16, %v515_v14  ;;  %v532_v31 = vunpack.c.l.bf16 %v484_v28  ;;  %v527_v32 = vunpack.c.h.bf16 %v478_v20  ;;  %v528_v33 = vunpack.c.l.bf16 %v480_v29  ;;  %v1044_v20 = vld [vmem:[%s5821_s17] sm:$0xe] }
  0x22   : > { %v5166_v25 = vpack.i.bf16 %v526_v23, %v525_v22  ;;  %v537_v41 = vunpack.c.l.bf16 %v489_v38  ;;  %v538_v42 = vunpack.c.l.bf16 %v490_v39  ;;  %v533_v43 = vunpack.c.h.bf16 %v484_v28  ;;  %v510_v22 = vld [vmem:[%s5821_s17 + $0xbc] sm:$0x1]  ;;  %v1048_v38 = vld [vmem:[%s5821_s17 + $0x30] sm:$0xe] }
  0x23   : > { %v5171_v37 = vpack.i.bf16 %v528_v33, %v527_v32  ;;  %v534_v44 = vunpack.c.l.bf16 %v486_v40  ;;  %v544_v52 = vunpack.c.l.bf16 %v496_v49  ;;  %v539_v53 = vunpack.c.h.bf16 %v490_v39  ;;  %v1053_v33 = vld [vmem:[%s5821_s17 + $0x6c] sm:$0xe]  ;;  %v1049_v39 = vld [vmem:[%s5821_s17 + $0x3c] sm:$0xe] }
  0x24   : > { %v5196_v45 = vpack.i.bf16 %v538_v42, %v537_v41  ;;  %v540_v54 = vunpack.c.l.bf16 %v492_v50  ;;  %v549_v62 = vunpack.c.l.bf16 %v501_v57  ;;  %v545_v1 = vunpack.c.h.bf16 %v496_v49  ;;  %v1058_v50 = vld [vmem:[%s5821_s17 + $0xa8] sm:$0xe] }
  0x25   : > { %v546_v2 = vunpack.c.l.bf16 %v498_v61  ;;  %v552_v11 = vunpack.c.l.bf16 %v504_v7  ;;  %v558_v27 = vunpack.c.l.bf16 %v510_v22  ;;  %v1069_v41 = vunpack.c.l.bf16 %v1053_v33 }
  0x26   : > { %5092 = vperm.xlu2 %5070, %v5841_v34   ;;  %5087 = vperm.xlu1 %5059, %v5086_v35   ;;  %v5181_v35 = vpack.i.bf16 %v532_v31, %v531_v30  ;;  %v5201_v56 = vpack.i.bf16 %v540_v54, %v539_v53  ;;  %v1052_v31 = vld [vmem:[%s5821_s17 + $0x60] sm:$0xe]  ;;  %v1056_v53 = vld [vmem:[%s5821_s17 + $0x90] sm:$0xe]  ;;  %v1057_v54 = vld [vmem:[%s5821_s17 + $0x9c] sm:$0xe]  ;;  %v1074_v57 = vunpack.c.l.bf16 %v1058_v50 }
  0x27   : > { %5082 = vperm.xlu0 %5048, %v5843_v36   ;;  %v5216_v4 = vpack.i.bf16 %v546_v2, %v545_v1  ;;  %v1068_v40 = vunpack.c.l.bf16 %v1052_v31  ;;  %v1072_v61 = vunpack.c.l.bf16 %v1056_v53  ;;  %v4536_v31 = vld [vmem:[%s5821_s17 + $0x6c] sm:$0xff]  }
  0x2e   : > { %5107 = vperm.xlu2 %5070, %v5106_v46   ;;  %5102 = vperm.xlu1 %5059, %v5850_v47   ;;  %v5186_v46 = vpack.i.bf16 %v534_v44, %v533_v43  ;;  %v1064_v44 = vunpack.c.l.bf16 %v1048_v38 }
  0x2f   : > { %5097 = vperm.xlu0 %5048, %v5096_v48   ;;  %v495_v48 = vld [vmem:[%s5821_s17 + $0x80] sm:$0x1] }
  0x30   : > { %v543_v51 = vunpack.c.l.bf16 %v495_v48  ;;  %v5271_v48 = vpack.i.bf16 %v1069_v41, %v1068_v40 }
  0x32   : > { %v5211_v55 = vpack.i.bf16 %v544_v52, %v543_v51  ;;  %v1059_v52 = vld [vmem:[%s5821_s17 + $0xb4] sm:$0xe] }
  0x36   : > { %5122 = vperm.xlu2 %5070, %v5856_v58   ;;  %5117 = vperm.xlu1 %5059, %v5116_v59   ;;  %v502_v59 = vld [vmem:[%s5821_s17 + $0x9c] sm:$0xff]  }
  0x37   : > { %5112 = vperm.xlu0 %5048, %v5858_v60   ;;  %v550_v63 = vunpack.c.l.bf16 %v502_v59  ;;  %v551_v10 = vunpack.c.h.bf16 %v502_v59  ;;  %v1075_v59 = vunpack.c.l.bf16 %v1059_v52 }
  0x39   : > { %v5226_v3 = vpack.i.bf16 %v550_v63, %v549_v62  ;;  %v1073_v62 = vunpack.c.l.bf16 %v1057_v54 }
  0x3e   : > { %5137 = vperm.xlu2 %5070, %v5136_v5   ;;  %5132 = vperm.xlu1 %5059, %v5833_v15   ;;  %v521_v15 = vunpack.c.h.bf16 %v472_v8  ;;  %v507_v5 = vld [vmem:[%s5821_s17 + $0xb0] sm:$0x1] }
  0x3f   : > { %5127 = vperm.xlu0 %5048, %v5126_v6   ;;  %v508_v6 = vld [vmem:[%s5821_s17 + $0xb4] sm:$0xff]   ;;  %v555_v8 = vunpack.c.l.bf16 %v507_v5  ;;  %v5286_v5 = vpack.i.bf16 %v1075_v59, %v1074_v57  ;;  %v4540_v57 = vld [vmem:[%s5821_s17 + $0x84] sm:$0xff]  }
  0x40   : > { %v5156_v26 = vpack.i.bf16 %v522_v24, %v521_v15  ;;  %v556_v9 = vunpack.c.l.bf16 %v508_v6  ;;  %v1063_v15 = vunpack.c.l.bf16 %v1047_v19  ;;  %v1060_v24 = vunpack.c.l.bf16 %v1044_v20 }
  0x42   : > { %v5241_v16 = vpack.i.bf16 %v556_v9, %v555_v8  ;;  %v4524_v8 = vld [vmem:[%s5821_s17 + $0x24] sm:$0xff]   ;;  %v4520_v9 = vld [vmem:[%s5821_s17 + $0xc] sm:$0xff]  }
  0x46   : > { %5152 = vperm.xlu2 %5070, %v5151_v17   ;;  %5147 = vperm.xlu1 %5059, %v5830_v13   ;;  %v1046_v17 = vld [vmem:[%s5821_s17 + $0x18] sm:$0xe] }
  0x47   : > { %5142 = vperm.xlu0 %5048, %v5141_v18   ;;  %v5231_v18 = vpack.i.bf16 %v552_v11, %v551_v10  ;;  %v1062_v23 = vunpack.c.l.bf16 %v1046_v17  ;;  %v236_v10 = vld [vmem:[%s9313_s1] sm:$0x1]  ;;  %v1438_v11 = vunpack.c.l.bf16 %v4524_v8  ;;  %v1434_v17 = vunpack.c.l.bf16 %v4520_v9 }
  0x48   : > { %v237_v19 = vunpack.c.l.bf16 %v236_v10  ;;  %v1454_v10 = vunpack.c.l.bf16 %v4540_v57 }
  0x49   : > { %v5256_v29 = vpack.i.bf16 %v1063_v15, %v1062_v23  ;;  %v4518_v15 = vld [vmem:[%s9313_s1 + $0x1] sm:$0x1] }
  0x4e   : > { %5167 = vperm.xlu2 %5070, %v5166_v25   ;;  %5162 = vperm.xlu1 %5059, %v5828_v12   ;;  %v1061_v25 = vunpack.c.l.bf16 %v1045_v21 }
  0x4f   : > { %5157 = vperm.xlu0 %5048, %v5156_v26   ;;  %v557_v26 = vunpack.c.h.bf16 %v508_v6  ;;  %v5281_v6 = vpack.i.bf16 %v1073_v62, %v1072_v61 }
  0x50   : > { %v5251_v30 = vpack.i.bf16 %v1061_v25, %v1060_v24  ;;  %v4519_v24 = vld [vmem:[%s9313_s1 + $0x2] sm:$0x1] }
  0x51   : > { %v5246_v32 = vpack.i.bf16 %v558_v27, %v557_v26  ;;  %v4528_v26 = vld [vmem:[%s5821_s17 + $0x3c] sm:$0xff]   ;;  %v5941_v27 = vperm.slane %v237_v19, 0  ;;  %v1078_v38 = vunpack.c.l.bf16 %v4519_v24 }
  0x52   : > { %v1442_v41 = vunpack.c.l.bf16 %v4528_v26 }
  0x56   : > { %5182 = vperm.xlu2 %5070, %v5181_v35   ;;  %5177 = vperm.xlu1 %5059, %v5843_v36   ;;  %v1050_v35 = vld [vmem:[%s5821_s17 + $0x48] sm:$0xe] }
  0x57   : > { %5172 = vperm.xlu0 %5048, %v5171_v37   ;;  %v1051_v37 = vld [vmem:[%s5821_s17 + $0x54] sm:$0xe]  ;;  %v1066_v42 = vunpack.c.l.bf16 %v1050_v35 }
  0x58   : > { %v1067_v43 = vunpack.c.l.bf16 %v1051_v37  ;;  %v561_v37 = vunpack.c.l.bf16 %v4518_v15 }
  0x5a   : > { %v5266_v49 = vpack.i.bf16 %v1067_v43, %v1066_v42  ;;  %v1443_v42 = vunpack.c.h.bf16 %v4528_v26  ;;  %v1450_v43 = vunpack.c.l.bf16 %v4536_v31 }
  0x5e   : > { %5197 = vperm.xlu2 %5070, %v5196_v45   ;;  %5192 = vperm.xlu1 %5059, %v5841_v34   ;;  %v1065_v45 = vunpack.c.l.bf16 %v1049_v39 }
  0x5f   : > { %5187 = vperm.xlu0 %5048, %v5186_v46  }
  0x60   : > { %v5261_v51 = vpack.i.bf16 %v1065_v45, %v1064_v44 }
  0x66   : > { %5212 = vperm.xlu2 %5070, %v5211_v55   ;;  %5207 = vperm.xlu1 %5059, %v5850_v47   ;;  %v1054_v55 = vld [vmem:[%s5821_s17 + $0x78] sm:$0xe] }
  0x67   : > { %5202 = vperm.xlu0 %5048, %v5201_v56   ;;  %v1055_v56 = vld [vmem:[%s5821_s17 + $0x84] sm:$0xe]  ;;  %v1070_v63 = vunpack.c.l.bf16 %v1054_v55  ;;  %v5974_v55 = vperm.slane %v1078_v38, 0 }
  0x68   : > { %v1071_v1 = vunpack.c.l.bf16 %v1055_v56  ;;  %v5311_v56 = vpack.i.bf16 %v1443_v42, %v1442_v41 }
  0x6a   : > { %v5276_v7 = vpack.i.bf16 %v1071_v1, %v1070_v63 }
  0x6e   : > { %5227 = vperm.xlu2 %5070, %v5226_v3   ;;  %5222 = vperm.xlu1 %5059, %v5858_v60  }
  0x6f   : > { %5217 = vperm.xlu0 %5048, %v5216_v4  }
  0x70   : > { %v5893_v14 = vpop.permute.xlu2 %5072 }
  0x76   : > { %5242 = vperm.xlu2 %5070, %v5241_v16   ;;  %5237 = vperm.xlu1 %5059, %v5856_v58   ;;  %v1439_v16 = vunpack.c.h.bf16 %v4524_v8 }
  0x77   : > { %5232 = vperm.xlu0 %5048, %v5231_v18   ;;  %v1435_v18 = vunpack.c.h.bf16 %v4520_v9 }
  0x78   : > { %v5901_v28 = vpop.permute.xlu2 %5077  ;;  %v5301_v23 = vpack.i.bf16 %v1439_v16, %v1438_v11  ;;  %v1455_v11 = vunpack.c.h.bf16 %v4540_v57  ;;  %v4544_v16 = vld [vmem:[%s5821_s17 + $0x9c] sm:$0xff]  }
  0x79   : > { %v5291_v25 = vpack.i.bf16 %v1435_v18, %v1434_v17  ;;  %v5080_v33 = vunpack.i.h.bf16 %v5901_v28  ;;  %v5079_v35 = vunpack.i.l.bf16 %v5901_v28 }
  0x7a   : > { %v5341_v38 = vpack.i.bf16 %v1455_v11, %v1454_v10 }
  0x7b   : > { %v5969_v53 = vmul.f32 %v5080_v33, %v5941_v27  ;;  %v5972_v54 = vmul.f32 %v5079_v35, %v5941_v27 }
  0x7e   : > { %5257 = vperm.xlu2 %5070, %v5256_v29   ;;  %5252 = vperm.xlu1 %5059, %v5251_v30   ;;  %v5075_v29 = vunpack.i.h.bf16 %v5893_v14  ;;  %v5074_v30 = vunpack.i.l.bf16 %v5893_v14  ;;  %v1451_v14 = vunpack.c.h.bf16 %v4536_v31 }
  0x7f   : > { %5247 = vperm.xlu0 %5048, %v5246_v32   ;;  %v4532_v32 = vld [vmem:[%s5821_s17 + $0x54] sm:$0xff]  }
  0x80   : > { %v5909_v46 = vpop.permute.xlu2 %5092  ;;  %v1446_v44 = vunpack.c.l.bf16 %v4532_v32  ;;  %v1447_v45 = vunpack.c.h.bf16 %v4532_v32  ;;  %v5331_v62 = vpack.i.bf16 %v1451_v14, %v1450_v43  ;;  %v4555_v43 = vld [vmem:[%s5821_s17 + $0x14] sm:$0x1]  ;;  %v6045_v14 = vld [vmem:[%s5821_s17 + $0x18] sm:$0xff]  }
  0x81   : > { %v5095_v39 = vunpack.i.h.bf16 %v5909_v46  ;;  %v5094_v40 = vunpack.i.l.bf16 %v5909_v46  ;;  %v5960_v46 = vmul.f32 %v5074_v30, %v5941_v27 }
  0x82   : > { %v5321_v63 = vpack.i.bf16 %v1447_v45, %v1446_v44  ;;  %v4553_v44 = vld [vmem:[%s5821_s17 + $0xc] sm:$0xff]  }
  0x83   : > { %9431 = vst [vmem:[#allocation3_spill] sm:$0xff] %v5960_v46  ;;  %v5978_v59 = vmul.f32 %v5095_v39, %v5941_v27  ;;  %v5981_v61 = vmul.f32 %v5094_v40, %v5941_v27  ;;  %v1743_v10 = vunpack.c.h.bf16 %v4553_v44 }
  0x86   : > { %5272 = vperm.xlu2 %5070, %v5271_v48   ;;  %5267 = vperm.xlu1 %5059, %v5266_v49   ;;  %v5953_v48 = vmul.f32 %v5075_v29, %v5941_v27  ;;  %v1459_v29 = vunpack.c.h.bf16 %v4544_v16 }
  0x87   : > { %5262 = vperm.xlu0 %5048, %v5261_v51   ;;  %v5964_v51 = vperm.slane %v561_v37, 0 }
  0x88   : > { %v5917_v2 = vpop.permute.xlu2 %5107  ;;  %v5919_v3 = vpop.permute.xlu1 %5061  ;;  %9430 = vst [vmem:[#allocation2_spill] sm:$0xff] %v5953_v48 }
  0x89   : > { %v5921_v4 = vpop.permute.xlu0 %5050  ;;  %v5109_v50 = vunpack.i.l.bf16 %v5917_v2  ;;  %v5064_v1 = vunpack.i.h.bf16 %v5919_v3 }
  0x8b   : > { %v5992_v9 = vmul.f32 %v5109_v50, %v5941_v27 }
  0x8e   : > { %5287 = vperm.xlu2 %5070, %v5286_v5   ;;  %5282 = vperm.xlu1 %5059, %v5281_v6   ;;  %v5053_v5 = vunpack.i.h.bf16 %v5921_v4  ;;  %v5052_v6 = vunpack.i.l.bf16 %v5921_v4 }
  0x8f   : > { %5277 = vperm.xlu0 %5048, %v5276_v7   ;;  %v4548_v7 = vld [vmem:[%s5821_s17 + $0xb4] sm:$0xff]  }
  0x90   : > { %v5928_v20 = vpop.permute.xlu2 %5122  ;;  %v5930_v21 = vpop.permute.xlu1 %5066  ;;  %v1462_v15 = vunpack.c.l.bf16 %v4548_v7  ;;  %v1463_v24 = vunpack.c.h.bf16 %v4548_v7  ;;  %v1742_v7 = vunpack.c.l.bf16 %v4553_v44 }
  0x91   : > { %v5932_v22 = vpop.permute.xlu0 %5055  ;;  %v5125_v17 = vunpack.i.h.bf16 %v5928_v20  ;;  %v5124_v18 = vunpack.i.l.bf16 %v5928_v20  ;;  %v5068_v19 = vunpack.i.l.bf16 %v5930_v21 }
  0x92   : > { %v5058_v4 = vunpack.i.h.bf16 %v5932_v22  ;;  %v6041_v42 = vpack.i.bf16 %v1463_v24, %v1462_v15 }
  0x93   : > { %v6024_v33 = vmul.f32 %v5125_v17, %v5941_v27  ;;  %v6027_v35 = vmul.f32 %v5124_v18, %v5941_v27  ;;  %v6033_v39 = vmul.f32 %v5068_v19, %v5941_v27 }
  0x94   : > { %v6036_v40 = vmul.f32 %v5058_v4, %v5941_v27 }
  0x95   : > { %9434 = vst [vmem:[#allocation6_spill] sm:$0xff] %v6024_v33 }
  0x96   : > { %5302 = vperm.xlu2 %5070, %v5301_v23   ;;  %5297 = vperm.xlu1 %5059, %v5830_v13   ;;  %v5110_v13 = vunpack.i.h.bf16 %v5917_v2  ;;  %v5063_v2 = vunpack.i.l.bf16 %v5919_v3  ;;  %v5069_v3 = vunpack.i.h.bf16 %v5930_v21  ;;  %v5057_v23 = vunpack.i.l.bf16 %v5932_v22  ;;  %9435 = vst [vmem:[#allocation7_spill] sm:$0xff] %v6027_v35  ;;  %v4579_v35 = vld [vmem:[%s5821_s17 + $0x74] sm:$0x1] }
  0x97   : > { %5292 = vperm.xlu0 %5048, %v5291_v25   ;;  %v6004_v25 = vmul.f32 %v5064_v1, %v5941_v27  ;;  %v6014_v22 = vmul.f32 %v5053_v5, %v5941_v27  ;;  %9437 = vst [vmem:[#allocation9_spill] sm:$0xff] %v6033_v39 }
  0x98   : > { %v5955_v28 = vpop.permute.xlu2 %5137  ;;  %v5957_v49 = vpop.permute.xlu1 %5087  ;;  %v5989_v8 = vmul.f32 %v5110_v13, %v5941_v27  ;;  %v6007_v20 = vmul.f32 %v5063_v2, %v5941_v27  ;;  %v6030_v37 = vmul.f32 %v5069_v3, %v5941_v27  ;;  %9438 = vst [vmem:[#allocation10_spill] sm:$0xff] %v6036_v40  ;;  %v6039_v41 = vmul.f32 %v5057_v23, %v5941_v27 }
  0x99   : > { %v5966_v52 = vpop.permute.xlu0 %5082  ;;  %9432 = vst [vmem:[#allocation4_spill] sm:$0xff] %v6014_v22  ;;  %v5140_v30 = vunpack.i.h.bf16 %v5955_v28  ;;  %v5139_v31 = vunpack.i.l.bf16 %v5955_v28  ;;  %v5090_v45 = vunpack.i.h.bf16 %v5957_v49  ;;  %v5089_v28 = vunpack.i.l.bf16 %v5957_v49 }
  0x9a   : > { %9436 = vst [vmem:[#allocation8_spill] sm:$0xff] %v6030_v37  ;;  %v5085_v13 = vunpack.i.h.bf16 %v5966_v52  ;;  %v5084_v5 = vunpack.i.l.bf16 %v5966_v52  ;;  %v4898_v49 = vunpack.c.l.bf16 %v6045_v14 }
  0x9b   : > { %v6057_v57 = vmul.f32 %v5140_v30, %v5964_v51  ;;  %v6060_v1 = vmul.f32 %v5139_v31, %v5964_v51  ;;  %v6063_v2 = vmul.f32 %v5139_v31, %v5974_v55  ;;  %v6073_v52 = vmul.f32 %v5090_v45, %v5941_v27  ;;  %v4559_v45 = vld [vmem:[%s5821_s17 + $0x24] sm:$0xff]  }
  0x9c   : > { %v6084_v23 = vmul.f32 %v5084_v5, %v5941_v27  ;;  %v1748_v31 = vunpack.c.l.bf16 %v4559_v45 }
  0x9d   : > { %9439 = vst [vmem:[#allocation11_spill] sm:$0xff] %v6063_v2 }
  0x9e   : > { %5317 = vperm.xlu2 %5070, %v5843_v36   ;;  %5312 = vperm.xlu1 %5059, %v5311_v56   ;;  %v1458_v36 = vunpack.c.l.bf16 %v4544_v16  ;;  %v6054_v56 = vld [vmem:[%s5821_s17 + $0xc0] sm:$0xff]   ;;  %9440 = vst [vmem:[#allocation12_spill] sm:$0xff] %v6073_v52 }
  0x9f   : > { %5307 = vperm.xlu0 %5048, %v5828_v12   ;;  %v6017_v12 = vmul.f32 %v5052_v6, %v5941_v27  ;;  %v1744_v6 = vunpack.c.l.bf16 %v4555_v43  ;;  %v9319_v17 = vunpack.c.l.bf16 %v6054_v56  ;;  %v9318_v18 = vunpack.c.h.bf16 %v6054_v56  ;;  %9443 = vst [vmem:[#allocation15_spill] sm:$0xff] %v6084_v23 }
  0xa0   : > { %v6009_v26 = vpop.permute.xlu2 %5152  ;;  %v6011_v21 = vpop.permute.xlu1 %5102  ;;  %v6051_v50 = vpack.i.bf16 %v1459_v29, %v1458_v36  ;;  %v4561_v36 = vld [vmem:[%s5821_s17 + $0x2c] sm:$0x1]  ;;  %v6092_v29 = vld [vmem:[%s5821_s17 + $0x30] sm:$0xff]  }
  0xa1   : > { %9433 = vst [vmem:[#allocation5_spill] sm:$0xff] %v6017_v12  ;;  %v6021_v32 = vpop.permute.xlu0 %5097  ;;  %v5155_v11 = vunpack.i.h.bf16 %v6009_v26  ;;  %v5154_v16 = vunpack.i.l.bf16 %v6009_v26  ;;  %v5105_v3 = vunpack.i.h.bf16 %v6011_v21  ;;  %v5104_v15 = vunpack.i.l.bf16 %v6011_v21 }
  0xa2   : > { %v5100_v24 = vunpack.i.h.bf16 %v6021_v32  ;;  %9444 = vst [vmem:[#allocation16_spill] sm:$0xff] %v6092_v29  ;;  %v5099_v43 = vunpack.i.l.bf16 %v6021_v32  ;;  %v6097_v44 = vpack.i.bf16 %v4898_v49, %v1744_v6  ;;  %v6112_v5 = vpack.i.bf16 %v9318_v18, %v9319_v17 }
  0xa3   : > { %v6104_v21 = vmul.f32 %v5154_v16, %v5964_v51  ;;  %v6116_v32 = vmul.f32 %v5154_v16, %v5974_v55  ;;  %v6119_v49 = vmul.f32 %v5105_v3, %v5941_v27  ;;  %v1749_v18 = vunpack.c.h.bf16 %v4559_v45 }
  0xa4   : > { %v4899_v16 = vunpack.c.h.bf16 %v6045_v14  ;;  %v1747_v3 = vunpack.c.l.bf16 %v4558_v0  ;;  %v6131_v30 = vmul.f32 %v5099_v43, %v5941_v27  ;;  %v9449_v14 = vunpack.c.l.bf16 %v6092_v29 }
  0xa5   : > { %9445 = vst [vmem:[#allocation17_spill] sm:$0xff] %v6119_v49 }
  0xa6   : > { %5332 = vperm.xlu2 %5070, %v5331_v62   ;;  %5327 = vperm.xlu1 %5059, %v5841_v34   ;;  %v6076_v34 = vmul.f32 %v5089_v28, %v5941_v27  ;;  %v6079_v62 = vmul.f32 %v5085_v13, %v5941_v27  ;;  %v6101_v28 = vmul.f32 %v5155_v11, %v5964_v51  ;;  %v1750_v11 = vunpack.c.l.bf16 %v4561_v36 }
  0xa7   : > { %5322 = vperm.xlu0 %5048, %v5321_v63   ;;  %v6106_v13 = vpack.i.bf16 %v1743_v10, %v1742_v7  ;;  %v6123_v7 = vmul.f32 %v5104_v15, %v5941_v27  ;;  %v6126_v10 = vmul.f32 %v5100_v24, %v5941_v27  ;;  %9448 = vst [vmem:[#allocation20_spill] sm:$0xff] %v6131_v30  ;;  %v6146_v24 = vld [vmem:[%s5821_s17 + $0x48] sm:$0xff]  }
  0xa8   : > { %9441 = vst [vmem:[#allocation13_spill] sm:$0xff] %v6076_v34  ;;  %v5168_v19 = vpop.permute.xlu2 %5167  ;;  %v5118_v4 = vpop.permute.xlu1 %5117  ;;  %v6140_v43 = vpack.i.bf16 %v9449_v14, %v1750_v11  ;;  %v6143_v30 = vpack.i.bf16 %v1749_v18, %v1748_v31  ;;  %v6157_v11 = vpack.i.bf16 %v1747_v3, %v4899_v16  ;;  %v4565_v14 = vld [vmem:[%s5821_s17 + $0x3c] sm:$0xff]   ;;  %v9320_v16 = vunpack.c.l.bf16 %v6146_v24 }
  0xa9   : > { %9442 = vst [vmem:[#allocation14_spill] sm:$0xff] %v6079_v62  ;;  %v6088_v26 = vpop.permute.xlu0 %5112  ;;  %v5170_v17 = vunpack.i.h.bf16 %v5168_v19  ;;  %v5169_v63 = vunpack.i.l.bf16 %v5168_v19  ;;  %v5120_v36 = vunpack.i.h.bf16 %v5118_v4  ;;  %v5119_v15 = vunpack.i.l.bf16 %v5118_v4 }
  0xaa   : > { %9446 = vst [vmem:[#allocation18_spill] sm:$0xff] %v6123_v7  ;;  %v5115_v6 = vunpack.i.h.bf16 %v6088_v26  ;;  %v5114_v4 = vunpack.i.l.bf16 %v6088_v26  ;;  %v4567_v26 = vld [vmem:[%s5821_s17 + $0x44] sm:$0x1]  ;;  %v4564_v7 = vld [vmem:[%s5821_s17 + $0x38] sm:$0x1]  ;;  %v1754_v34 = vunpack.c.l.bf16 %v4565_v14 }
  0xab   : > { %9447 = vst [vmem:[#allocation19_spill] sm:$0xff] %v6126_v10  ;;  %v6149_v19 = vmul.f32 %v5170_v17, %v5964_v51  ;;  %v6155_v49 = vmul.f32 %v5169_v63, %v5974_v55  ;;  %v6165_v18 = vmul.f32 %v5119_v15, %v5941_v27  ;;  %v1756_v52 = vunpack.c.l.bf16 %v4567_v26 }
  0xac   : > { %9450 = vst [vmem:[#allocation21_spill] sm:$0xff] %v6146_v24  ;;  %v6168_v31 = vmul.f32 %v5115_v6, %v5941_v27  ;;  %v9321_v6 = vunpack.c.h.bf16 %v6092_v29  ;;  %v1753_v15 = vunpack.c.l.bf16 %v4564_v7  ;;  %v9456_v26 = vrot.slane %v6060_v1, 1  ;;  %v4573_v1 = vld [vmem:[%s5821_s17 + $0x5c] sm:$0x1] }
  0xad   : > { %9451 = vst [vmem:[#allocation22_spill] sm:$0xff] %v6155_v49  ;;  %v1762_v39 = vunpack.c.l.bf16 %v4573_v1  ;;  %v4570_v49 = vld [vmem:[%s5821_s17 + $0x50] sm:$0x1] }
  0xae   : > { %5347 = vperm.xlu2 %5070, %v5858_v60   ;;  %5342 = vperm.xlu1 %5059, %v5341_v38   ;;  %v6152_v60 = vmul.f32 %v5169_v63, %v5964_v51  ;;  %9453 = vst [vmem:[#allocation24_spill] sm:$0xff] %v6165_v18 }
  0xaf   : > { %5337 = vperm.xlu0 %5048, %v5850_v47   ;;  %9454 = vst [vmem:[#allocation25_spill] sm:$0xff] %v6168_v31 }
  0xb0   : > { %v5183_v38 = vpop.permute.xlu2 %5182  ;;  %v5133_v0 = vpop.permute.xlu1 %5132 }
  0xb1   : > { %v5135_v45 = vunpack.i.h.bf16 %v5133_v0  ;;  %v5134_v10 = vunpack.i.l.bf16 %v5133_v0  ;;  %v5128_v47 = vpop.permute.xlu0 %5127  ;;  %v6162_v0 = vmul.f32 %v5120_v36, %v5941_v27  ;;  %v5185_v62 = vunpack.i.h.bf16 %v5183_v38 }
  0xb2   : > { %v5184_v23 = vunpack.i.l.bf16 %v5183_v38  ;;  %v1755_v36 = vunpack.c.h.bf16 %v4565_v14  ;;  %v5130_v37 = vunpack.i.h.bf16 %v5128_v47 }
  0xb3   : > { %9452 = vst [vmem:[#allocation23_spill] sm:$0xff] %v6162_v0  ;;  %v804_v17 = vmul.f32 %v5135_v45, %v5964_v51  ;;  %v803_v63 = vmul.f32 %v5134_v10, %v5964_v51  ;;  %v6180_v10 = vmul.f32 %v5114_v4, %v5941_v27  ;;  %v5129_v4 = vunpack.i.l.bf16 %v5128_v47 }
  0xb4   : > { %v6207_v38 = vmul.f32 %v5184_v23, %v5974_v55  ;;  %v6213_v47 = vmul.f32 %v5130_v37, %v5941_v27 }
  0xb5   : > { %v901_v3 = vrot.slane %v804_v17, 1  ;;  %v900_v0 = vrot.slane %v803_v63, 1  ;;  %9455 = vst [vmem:[#allocation26_spill] sm:$0xff] %v6180_v10  ;;  %v6221_v10 = vld [vmem:[%s5821_s17 + $0x60] sm:$0xff]  }
  0xb6   : > { %5362 = vperm.xlu2 %5070, %v6041_v42   ;;  %5357 = vperm.xlu1 %5059, %v5856_v58   ;;  %v6189_v58 = vmul.f32 %v5185_v62, %v5964_v51  ;;  %v6192_v42 = vmul.f32 %v5184_v23, %v5964_v51  ;;  %v6204_v62 = vpack.i.bf16 %v1755_v36, %v1754_v34  ;;  %v4910_v29 = vunpack.c.l.bf16 %v6221_v10 }
  0xb7   : > { %v6185_v14 = vsel %vm899_vm0, %v901_v3, %v9456_v26  ;;  %5352 = vperm.xlu0 %5048, %v6051_v50   ;;  %v6195_v7 = vsel %vm899_vm0, %v900_v0, %v901_v3  ;;  %v6202_v50 = vpack.i.bf16 %v9320_v16, %v1756_v52  ;;  %9459 = vst [vmem:[#allocation29_spill] sm:$0xff] %v6207_v38  ;;  %v4571_v16 = vld [vmem:[%s5821_s17 + $0x54] sm:$0xff]  }
  0xb8   : > { %9457 = vst [vmem:[#allocation27_spill] sm:$0xff] %v6185_v14  ;;  %v5198_v17 = vpop.permute.xlu2 %5197  ;;  %v5148_v63 = vpop.permute.xlu1 %5147  ;;  %v6210_v0 = vmul.f32 %v5135_v45, %v5974_v55  ;;  %v6217_v3 = vpack.i.bf16 %v1753_v15, %v9321_v6  ;;  %v1760_v45 = vunpack.c.l.bf16 %v4571_v16  ;;  %v1761_v37 = vunpack.c.h.bf16 %v4571_v16 }
  0xb9   : > { %9458 = vst [vmem:[#allocation28_spill] sm:$0xff] %v6195_v7  ;;  %v5150_v26 = vunpack.i.h.bf16 %v5148_v63  ;;  %v6198_v31 = vpop.permute.xlu0 %5142  ;;  %v5200_v52 = vunpack.i.h.bf16 %v5198_v17  ;;  %v5149_v36 = vunpack.i.l.bf16 %v5148_v63  ;;  %v5199_v15 = vunpack.i.l.bf16 %v5198_v17 }
  0xba   : > { %9460 = vst [vmem:[#allocation30_spill] sm:$0xff] %v6210_v0  ;;  %v5144_v23 = vunpack.i.l.bf16 %v6198_v31  ;;  %v5145_v18 = vunpack.i.h.bf16 %v6198_v31  ;;  %v6268_v46 = vpack.i.bf16 %v1761_v37, %v1760_v45 }
  0xbb   : > { %9461 = vst [vmem:[#allocation31_spill] sm:$0xff] %v6213_v47  ;;  %v810_v34 = vmul.f32 %v5150_v26, %v5964_v51  ;;  %v6229_v47 = vmul.f32 %v5129_v4, %v5941_v27  ;;  %v6239_v27 = vmul.f32 %v5200_v52, %v5964_v51  ;;  %v9463_v4 = vrot.slane %v6104_v21, 1 }
  0xbc   : > { %v809_v17 = vmul.f32 %v5149_v36, %v5964_v51  ;;  %v6248_v1 = vmul.f32 %v5144_v23, %v5964_v51  ;;  %v808_v36 = vmul.f32 %v5145_v18, %v5964_v51  ;;  %v9465_v21 = vrot.slane %v6057_v57, 1  ;;  %v6283_v57 = vld [vmem:[%s5821_s17 + $0x78] sm:$0xff]  }
  0xbd   : > { %9462 = vst [vmem:[#allocation32_spill] sm:$0xff] %v6229_v47  ;;  %v911_v6 = vrot.slane %v810_v34, 1  ;;  %v1759_v34 = vunpack.c.l.bf16 %v4570_v49  ;;  %v6266_v47 = vmul.f32 %v5145_v18, %v5974_v55  ;;  %v6287_v14 = vmul.f32 %v5144_v23, %v5974_v55 }
  0xbe   : > { %5377 = vperm.xlu2 %5070, %v6097_v44   ;;  %5372 = vperm.xlu1 %5059, %v6106_v13   ;;  %v6252_v44 = vmul.f32 %v5199_v15, %v5964_v51  ;;  %v6255_v13 = vmul.f32 %v5199_v15, %v5974_v55  ;;  %v906_v63 = vrot.slane %v6248_v1, 1  ;;  %v908_v37 = vrot.slane %v808_v36, 1  ;;  %9466 = vst [vmem:[#allocation34_spill] sm:$0xff] %v6283_v57 }
  0xbf   : > { %v6244_v31 = vsel %vm899_vm0, %v911_v6, %v9463_v4  ;;  %5367 = vperm.xlu0 %5048, %v6112_v5   ;;  %v6259_v4 = vmul.f32 %v5150_v26, %v5974_v55  ;;  %v6263_v5 = vpack.i.bf16 %v4910_v29, %v1762_v39  ;;  %9464 = vst [vmem:[#allocation33_spill] sm:$0xff] %v6266_v47  ;;  %v910_v26 = vrot.slane %v809_v17, 1 }
  0xc0   : > { %v5213_v16 = vpop.permute.xlu2 %5212  ;;  %v5163_v52 = vpop.permute.xlu1 %5162  ;;  %v6274_v33 = vsel %vm899_vm0, %v9465_v21, %v906_v63  ;;  %9467 = vst [vmem:[#allocation35_spill] sm:$0xff] %v6287_v14  ;;  %v9468_v21 = vunpack.c.h.bf16 %v6146_v24 }
  0xc1   : > { %v5158_v48 = vpop.permute.xlu0 %5157  ;;  %v5165_v15 = vunpack.i.h.bf16 %v5163_v52  ;;  %v5164_v38 = vunpack.i.l.bf16 %v5163_v52  ;;  %v5215_v49 = vunpack.i.h.bf16 %v5213_v16  ;;  %v5214_v17 = vunpack.i.l.bf16 %v5213_v16 }
  0xc2   : > { %v5159_v1 = vunpack.i.l.bf16 %v5158_v48  ;;  %v6295_v36 = vsel %vm899_vm0, %v910_v26, %v911_v6  ;;  %v5160_v16 = vunpack.i.h.bf16 %v5158_v48  ;;  %v6301_v23 = vpack.i.bf16 %v1759_v34, %v9468_v21 }
  0xc3   : > { %v816_v18 = vmul.f32 %v5165_v15, %v5964_v51  ;;  %v815_v52 = vmul.f32 %v5164_v38, %v5964_v51  ;;  %v6292_v38 = vld [vmem:[%s5821_s17 + $0x6c] sm:$0xff]   ;;  %v1768_v26 = vunpack.c.l.bf16 %v4579_v35  ;;  %v6313_v45 = vmul.f32 %v5215_v49, %v5964_v51 }
  0xc4   : > { %v813_v29 = vmul.f32 %v5159_v1, %v5964_v51  ;;  %v6324_v48 = vmul.f32 %v5165_v15, %v5974_v55  ;;  %v814_v35 = vmul.f32 %v5160_v16, %v5964_v51  ;;  %v9474_v49 = vrot.slane %v6101_v28, 1 }
  0xc5   : > { %v921_v39 = vrot.slane %v816_v18, 1  ;;  %v920_v22 = vrot.slane %v815_v52, 1  ;;  %v9469_v18 = vrot.slane %v6152_v60, 1  ;;  %v6333_v60 = vsel %vm899_vm0, %v906_v63, %v908_v37 }
  0xc6   : > { %5392 = vperm.xlu2 %5070, %v6140_v43   ;;  %5387 = vperm.xlu1 %5059, %v6143_v30   ;;  %v916_v34 = vrot.slane %v813_v29, 1  ;;  %9473 = vst [vmem:[#allocation39_spill] sm:$0xff] %v6324_v48 }
  0xc7   : > { %5382 = vperm.xlu0 %5048, %v6157_v11   ;;  %v6306_v43 = vsel %vm899_vm0, %v921_v39, %v9469_v18  ;;  %v6309_v30 = vsel %vm899_vm0, %v920_v22, %v921_v39  ;;  %v6316_v11 = vmul.f32 %v5214_v17, %v5964_v51  ;;  %v6321_v22 = vmul.f32 %v5214_v17, %v5974_v55 }
  0xc8   : > { %9470 = vst [vmem:[#allocation36_spill] sm:$0xff] %v6306_v43  ;;  %v5228_v52 = vpop.permute.xlu2 %5227  ;;  %v5178_v6 = vpop.permute.xlu1 %5177  ;;  %v6330_v43 = vsel %vm899_vm0, %v9474_v49, %v916_v34  ;;  %v6336_v18 = vmul.f32 %v5160_v16, %v5974_v55  ;;  %v6343_v49 = vmul.f32 %v5159_v1, %v5974_v55  ;;  %v918_v16 = vrot.slane %v814_v35, 1 }
  0xc9   : > { %9471 = vst [vmem:[#allocation37_spill] sm:$0xff] %v6309_v30  ;;  %v5173_v21 = vpop.permute.xlu0 %5172  ;;  %v5180_v39 = vunpack.i.h.bf16 %v5178_v6  ;;  %v5179_v24 = vunpack.i.l.bf16 %v5178_v6  ;;  %v5230_v7 = vunpack.i.h.bf16 %v5228_v52  ;;  %v9479_v1 = vrot.slane %v6192_v42, 1 }
  0xca   : > { %9472 = vst [vmem:[#allocation38_spill] sm:$0xff] %v6321_v22  ;;  %v5174_v29 = vunpack.i.l.bf16 %v5173_v21  ;;  %v5175_v28 = vunpack.i.h.bf16 %v5173_v21  ;;  %v1767_v42 = vunpack.c.h.bf16 %v6292_v38  ;;  %v9494_v47 = vrot.slane %v6316_v11, 1 }
  0xcb   : > { %9475 = vst [vmem:[#allocation40_spill] sm:$0xff] %v6330_v43  ;;  %v822_v17 = vmul.f32 %v5180_v39, %v5964_v51  ;;  %v821_v6 = vmul.f32 %v5179_v24, %v5964_v51  ;;  %v5229_v43 = vunpack.i.l.bf16 %v5228_v52  ;;  %v6365_v35 = vmul.f32 %v5230_v7, %v5964_v51 }
  0xcc   : > { %9476 = vst [vmem:[#allocation41_spill] sm:$0xff] %v6333_v60  ;;  %v819_v15 = vmul.f32 %v5174_v29, %v5964_v51  ;;  %v6380_v7 = vmul.f32 %v5175_v28, %v5974_v55 }
  0xcd   : > { %9477 = vst [vmem:[#allocation42_spill] sm:$0xff] %v6336_v18  ;;  %v931_v12 = vrot.slane %v822_v17, 1  ;;  %v930_v63 = vrot.slane %v821_v6, 1  ;;  %v9482_v6 = vunpack.c.l.bf16 %v6283_v57 }
  0xce   : > { %9478 = vst [vmem:[#allocation43_spill] sm:$0xff] %v6343_v49  ;;  %5407 = vperm.xlu2 %5070, %v6202_v50   ;;  %5402 = vperm.xlu1 %5059, %v6204_v62   ;;  %v926_v21 = vrot.slane %v819_v15, 1  ;;  %v9485_v15 = vrot.slane %v6149_v19, 1 }
  0xcf   : > { %5397 = vperm.xlu0 %5048, %v6217_v3   ;;  %v6355_v52 = vsel %vm899_vm0, %v931_v12, %v9479_v1  ;;  %v6358_v50 = vsel %vm899_vm0, %v930_v63, %v931_v12  ;;  %v6362_v37 = vpack.i.bf16 %v9482_v6, %v1768_v26  ;;  %v820_v3 = vmul.f32 %v5175_v28, %v5964_v51 }
  0xd0   : > { %9480 = vst [vmem:[#allocation44_spill] sm:$0xff] %v6355_v52  ;;  %v5243_v62 = vpop.permute.xlu2 %5242  ;;  %v5193_v17 = vpop.permute.xlu1 %5192  ;;  %v6371_v12 = vmul.f32 %v5229_v43, %v5964_v51  ;;  %v6374_v63 = vmul.f32 %v5229_v43, %v5974_v55  ;;  %v6377_v26 = vmul.f32 %v5180_v39, %v5974_v55  ;;  %v927_v6 = vsel %vm899_vm0, %v9485_v15, %v926_v21 }
  0xd1   : > { %9481 = vst [vmem:[#allocation45_spill] sm:$0xff] %v6358_v50  ;;  %v5188_v24 = vpop.permute.xlu0 %5187  ;;  %v5195_v30 = vunpack.i.h.bf16 %v5193_v17  ;;  %v6386_v1 = vsel %vm899_vm0, %v916_v34, %v918_v16  ;;  %v6389_v52 = vadd.f32 %v927_v6, %v5972_v54  ;;  %v5245_v43 = vunpack.i.h.bf16 %v5243_v62 }
  0xd2   : > { %9483 = vst [vmem:[#allocation46_spill] sm:$0xff] %v6374_v63  ;;  %v5189_v22 = vunpack.i.l.bf16 %v5188_v24  ;;  %v928_v18 = vrot.slane %v820_v3, 1  ;;  %v6396_v28 = vmul.f32 %v5174_v29, %v5974_v55  ;;  %v5194_v19 = vunpack.i.l.bf16 %v5193_v17 }
  0xd3   : > { %9484 = vst [vmem:[#allocation47_spill] sm:$0xff] %v6377_v26  ;;  %v6392_v50 = vmul.f32 %v5195_v30, %v5964_v51  ;;  %v5244_v49 = vunpack.i.l.bf16 %v5243_v62  ;;  %v5190_v16 = vunpack.i.h.bf16 %v5188_v24  ;;  %v6410_v62 = vmul.f32 %v5245_v43, %v5964_v51 }
  0xd4   : > { %9486 = vst [vmem:[#allocation48_spill] sm:$0xff] %v6386_v1  ;;  %v6406_v29 = vmul.f32 %v5189_v22, %v5964_v51  ;;  %v9487_v24 = vrot.slane %v6252_v44, 1  ;;  %v9488_v17 = vunpack.c.l.bf16 %v6292_v38  ;;  %v4911_v6 = vunpack.c.h.bf16 %v6221_v10  ;;  %v6449_v1 = vld [vmem:[%s5821_s17 + $0x90] sm:$0xff]  }
  0xd5   : > { %v941_v34 = vrot.slane %v6392_v50, 1  ;;  %v6421_v3 = vsel %vm899_vm0, %v926_v21, %v928_v18  ;;  %v827_v43 = vmul.f32 %v5194_v19, %v5964_v51  ;;  %v6430_v15 = vmul.f32 %v5244_v49, %v5964_v51 }
  0xd6   : > { %5422 = vperm.xlu2 %5070, %v6263_v5   ;;  %5417 = vperm.xlu1 %5059, %v6268_v46   ;;  %v5431_v54 = vpack.i.bf16 %v1767_v42, %v9488_v17  ;;  %v936_v44 = vrot.slane %v6406_v29, 1  ;;  %v826_v38 = vmul.f32 %v5190_v16, %v5964_v51  ;;  %v6434_v18 = vmul.f32 %v5244_v49, %v5974_v55 }
  0xd7   : > { %5412 = vperm.xlu0 %5048, %v6301_v23   ;;  %v6415_v5 = vsel %vm899_vm0, %v941_v34, %v9487_v24  ;;  %v4576_v24 = vld [vmem:[%s5821_s17 + $0x68] sm:$0x1]  ;;  %v6437_v21 = vmul.f32 %v5195_v30, %v5974_v55  ;;  %v9490_v19 = vrot.slane %v6189_v58, 1  ;;  %v940_v49 = vrot.slane %v827_v43, 1 }
  0xd8   : > { %v5258_v46 = vpop.permute.xlu2 %5257  ;;  %v5208_v50 = vpop.permute.xlu1 %5207  ;;  %9489 = vst [vmem:[#allocation49_spill] sm:$0xff] %v6434_v18  ;;  %v6452_v30 = vmul.f32 %v5190_v16, %v5974_v55  ;;  %v6459_v2 = vmul.f32 %v5189_v22, %v5974_v55  ;;  %v9365_v18 = vunpack.c.h.bf16 %v6449_v1 }
  0xd9   : > { %v6426_v39 = vpop.permute.xlu0 %5202  ;;  %v5210_v10 = vunpack.i.h.bf16 %v5208_v50  ;;  %v5209_v42 = vunpack.i.l.bf16 %v5208_v50  ;;  %v6442_v29 = vsel %vm899_vm0, %v9490_v19, %v936_v44  ;;  %v1765_v50 = vunpack.c.l.bf16 %v4576_v24  ;;  %v4585_v19 = vld [vmem:[%s5821_s17 + $0x8c] sm:$0x1] }
  0xda   : > { %9491 = vst [vmem:[#allocation50_spill] sm:$0xff] %v6442_v29  ;;  %v5204_v17 = vunpack.i.l.bf16 %v6426_v39  ;;  %v5260_v48 = vunpack.i.h.bf16 %v5258_v46  ;;  %v938_v29 = vrot.slane %v826_v38, 1  ;;  %v5259_v24 = vunpack.i.l.bf16 %v5258_v46 }
  0xdb   : > { %v834_v63 = vmul.f32 %v5210_v10, %v5964_v51  ;;  %v833_v26 = vmul.f32 %v5209_v42, %v5964_v51  ;;  %9492 = vst [vmem:[#allocation51_spill] sm:$0xff] %v6452_v30  ;;  %v5205_v43 = vunpack.i.h.bf16 %v6426_v39  ;;  %v9344_v42 = vunpack.c.l.bf16 %v6449_v1 }
  0xdc   : > { %v6455_v58 = vmul.f32 %v5204_v17, %v5964_v51  ;;  %9493 = vst [vmem:[#allocation52_spill] sm:$0xff] %v6459_v2  ;;  %v6476_v46 = vmul.f32 %v5260_v48, %v5974_v55  ;;  %v6493_v48 = vmul.f32 %v5259_v24, %v5974_v55  ;;  %v9504_v30 = vrot.slane %v6371_v12, 1 }
  0xdd   : > { %v951_v23 = vrot.slane %v834_v63, 1  ;;  %v950_v0 = vrot.slane %v833_v26, 1  ;;  %v5426_v63 = vpack.i.bf16 %v1765_v50, %v4911_v6  ;;  %v832_v39 = vmul.f32 %v5205_v43, %v5964_v51 }
  0xde   : > { %5437 = vperm.xlu2 %5070, %v6362_v37   ;;  %5432 = vperm.xlu1 %5059, %v5431_v54   ;;  %v9343_v16 = vrot.slane %v6455_v58, 1  ;;  %v1774_v37 = vunpack.c.l.bf16 %v4585_v19  ;;  %9497 = vst [vmem:[#allocation55_spill] sm:$0xff] %v6476_v46  ;;  %v4583_v54 = vld [vmem:[%s5821_s17 + $0x84] sm:$0xff]   ;;  %v6501_v6 = vsel %vm899_vm0, %v936_v44, %v938_v29  ;;  %v9507_v12 = vrot.slane %v6313_v45, 1 }
  0xdf   : > { %v6468_v14 = vsel %vm899_vm0, %v951_v23, %v9494_v47  ;;  %v6471_v22 = vsel %vm899_vm0, %v950_v0, %v951_v23  ;;  %v9498_v47 = vrot.slane %v6239_v27, 1  ;;  %v6489_v23 = vsel %vm899_vm0, %v940_v49, %v941_v34  ;;  %5427 = vperm.xlu0 %5048, %v5426_v63   ;;  %9500 = vst [vmem:[#allocation57_spill] sm:$0xff] %v6501_v6 }
  0xe0   : > { %9495 = vst [vmem:[#allocation53_spill] sm:$0xff] %v6468_v14  ;;  %v5273_v26 = vpop.permute.xlu2 %5272  ;;  %v5223_v38 = vpop.permute.xlu1 %5222  ;;  %v6505_v49 = vmul.f32 %v5210_v10, %v5974_v55  ;;  %v4582_v10 = vld [vmem:[%s5821_s17 + $0x80] sm:$0x1]  ;;  %v948_v14 = vrot.slane %v832_v39, 1 }
  0xe1   : > { %9496 = vst [vmem:[#allocation54_spill] sm:$0xff] %v6471_v22  ;;  %v6483_v11 = vsel %vm899_vm0, %v9498_v47, %v9343_v16  ;;  %v6485_v0 = vpop.permute.xlu0 %5217  ;;  %v5225_v19 = vunpack.i.h.bf16 %v5223_v38  ;;  %v5451_v47 = vpack.i.bf16 %v9344_v42, %v1774_v37  ;;  %v5275_v50 = vunpack.i.h.bf16 %v5273_v26 }
  0xe2   : > { %9499 = vst [vmem:[#allocation56_spill] sm:$0xff] %v6483_v11  ;;  %v5219_v27 = vunpack.i.l.bf16 %v6485_v0  ;;  %v5274_v16 = vunpack.i.l.bf16 %v5273_v26  ;;  %v6515_v37 = vmul.f32 %v5205_v43, %v5974_v55  ;;  %v5224_v29 = vunpack.i.l.bf16 %v5223_v38 }
  0xe3   : > { %9501 = vst [vmem:[#allocation58_spill] sm:$0xff] %v6505_v49  ;;  %v6508_v24 = vmul.f32 %v5225_v19, %v5964_v51  ;;  %v1772_v42 = vunpack.c.l.bf16 %v4583_v54  ;;  %v5220_v22 = vunpack.i.h.bf16 %v6485_v0  ;;  %v6523_v26 = vmul.f32 %v5204_v17, %v5974_v55 }
  0xe4   : > { %v6512_v11 = vmul.f32 %v5219_v27, %v5964_v51  ;;  %9502 = vst [vmem:[#allocation59_spill] sm:$0xff] %v6515_v37  ;;  %v1773_v38 = vunpack.c.h.bf16 %v4583_v54  ;;  %v6538_v0 = vmul.f32 %v5275_v50, %v5974_v55  ;;  %v6541_v17 = vmul.f32 %v5274_v16, %v5974_v55 }
  0xe5   : > { %v9348_v44 = vrot.slane %v6508_v24, 1  ;;  %9503 = vst [vmem:[#allocation60_spill] sm:$0xff] %v6523_v26  ;;  %v1771_v54 = vunpack.c.l.bf16 %v4582_v10  ;;  %v6553_v34 = vmul.f32 %v5225_v19, %v5974_v55  ;;  %v6563_v45 = vmul.f32 %v5220_v22, %v5974_v55 }
  0xe6   : > { %5452 = vperm.xlu2 %5070, %v5451_v47   ;;  %v9349_v63 = vrot.slane %v6512_v11, 1  ;;  %9506 = vst [vmem:[#allocation62_spill] sm:$0xff] %v6538_v0  ;;  %v6556_v47 = vmul.f32 %v5224_v29, %v5964_v51  ;;  %v5446_v50 = vpack.i.bf16 %v1773_v38, %v1772_v42  ;;  %v9509_v10 = vunpack.c.h.bf16 %v6283_v57  ;;  %v4589_v29 = vld [vmem:[%s5821_s17 + $0x9c] sm:$0xff]  }
  0xe7   : > { %v6530_v43 = vsel %vm899_vm0, %v9348_v44, %v9504_v30  ;;  %9508 = vst [vmem:[#allocation63_spill] sm:$0xff] %v6553_v34  ;;  %v9510_v38 = vrot.slane %v6455_v58, 1  ;;  %v4591_v58 = vld [vmem:[%s5821_s17 + $0xa4] sm:$0x1] }
  0xe8   : > { %9505 = vst [vmem:[#allocation61_spill] sm:$0xff] %v6530_v43  ;;  %v6533_v2 = vpop.permute.xlu2 %5287  ;;  %v6535_v39 = vpop.permute.xlu1 %5237  ;;  %v6548_v30 = vsel %vm899_vm0, %v9507_v12, %v9349_v63  ;;  %v6560_v43 = vmul.f32 %v5220_v22, %v5964_v51  ;;  %v5441_v12 = vpack.i.bf16 %v1771_v54, %v9509_v10  ;;  %5447 = vperm.xlu1 %5059, %v5446_v50   ;;  %v9512_v50 = vrot.slane %v6430_v15, 1 }
  0xe9   : > { %v6550_v44 = vpop.permute.xlu0 %5232  ;;  %v5240_v16 = vunpack.i.h.bf16 %v6535_v39  ;;  %v6573_v63 = vsel %vm899_vm0, %v9510_v38, %v948_v14  ;;  %v6588_v14 = vld [vmem:[%s5821_s17 + $0xa8] sm:$0xff]   ;;  %v960_v38 = vrot.slane %v6556_v47, 1  ;;  %v5290_v57 = vunpack.i.h.bf16 %v6533_v2 }
  0xea   : > { %v9352_v19 = vunpack.i.l.bf16 %v6550_v44  ;;  %9511 = vst [vmem:[#allocation64_spill] sm:$0xff] %v6573_v63  ;;  %5442 = vperm.xlu0 %5048, %v5441_v12   ;;  %v958_v12 = vrot.slane %v6560_v43, 1  ;;  %v5289_v0 = vunpack.i.l.bf16 %v6533_v2  ;;  %v1780_v26 = vunpack.c.l.bf16 %v4591_v58  ;;  %v4588_v43 = vld [vmem:[%s5821_s17 + $0x98] sm:$0x1] }
  0xeb   : > { %v6576_v22 = vmul.f32 %v5240_v16, %v5964_v51  ;;  %v5239_v2 = vunpack.i.l.bf16 %v6535_v39  ;;  %v5235_v15 = vunpack.i.h.bf16 %v6550_v44  ;;  %v1778_v58 = vunpack.c.l.bf16 %v4589_v29 }
  0xec   : > { %v6584_v42 = vmul.f32 %v9352_v19, %v5964_v51  ;;  %v6598_v19 = vmul.f32 %v5219_v27, %v5974_v55  ;;  %v4552_v27 = vld [vmem:[%s9313_s1 + $0x3] sm:$0x1]  ;;  %v6628_v49 = vmul.f32 %v5290_v57, %v5974_v55  ;;  %v9516_v6 = vunpack.c.l.bf16 %v6588_v14 }
  0xed   : > { %v9359_v54 = vrot.slane %v6576_v22, 1  ;;  %v1779_v39 = vunpack.c.h.bf16 %v4589_v29  ;;  %v1468_v60 = vunpack.c.l.bf16 %v4552_v27  ;;  %v1017_v57 = vadd.f32 %v6244_v31, %v6004_v25  ;;  %v4597_v31 = vld [vmem:[%s5821_s17 + $0xbc] sm:$0x1] }
  0xee   : > { %v9364_v37 = vrot.slane %v6584_v42, 1  ;;  %v5466_v46 = vpack.i.bf16 %v9516_v6, %v1780_v26  ;;  %v9518_v6 = vrot.slane %v6493_v48, 2  ;;  %v6643_v29 = vmul.f32 %v5289_v0, %v5974_v55 }
  0xef   : > { %v6607_v47 = vsel %vm899_vm0, %v9359_v54, %v9512_v50  ;;  %v9514_v50 = vrot.slane %v6365_v35, 1  ;;  %v845_v48 = vmul.f32 %v5239_v2, %v5964_v51 }
  0xf0   : > { %9513 = vst [vmem:[#allocation65_spill] sm:$0xff] %v6607_v47  ;;  %v5303_v10 = vpop.permute.xlu2 %5302  ;;  %v6614_v63 = vpop.permute.xlu1 %5252  ;;  %v1777_v47 = vunpack.c.l.bf16 %v4588_v43  ;;  %5467 = vperm.xlu2 %5070, %v5466_v46   ;;  %v6647_v46 = vperm.slane %v1468_v60, 0  ;;  %v9519_v43 = vrot.slane %v6116_v32, 2 }
  0xf1   : > { %v6623_v54 = vsel %vm899_vm0, %v9514_v50, %v9364_v37  ;;  %v6625_v34 = vpop.permute.xlu0 %5247  ;;  %v5305_v40 = vunpack.i.h.bf16 %v5303_v10  ;;  %v5304_v35 = vunpack.i.l.bf16 %v5303_v10  ;;  %v5461_v50 = vpack.i.bf16 %v1779_v39, %v1778_v58 }
  0xf2   : > { %9515 = vst [vmem:[#allocation66_spill] sm:$0xff] %v6623_v54  ;;  %v1016_v37 = vadd.f32 %v6295_v36, %v6007_v20  ;;  %v9517_v54 = vrot.slane %v6259_v4, 2  ;;  %v5456_v10 = vpack.i.bf16 %v1777_v47, %v9365_v18  ;;  %v6656_v36 = vmul.f32 %v5240_v16, %v5974_v55 }
  0xf3   : > { %5462 = vperm.xlu1 %5059, %v5461_v50   ;;  %v9521_v47 = vrot.slane %v6508_v24, 1  ;;  %v1635_v32 = vmul.f32 %v5305_v40, %v6647_v46  ;;  %v1634_v4 = vmul.f32 %v5304_v35, %v6647_v46  ;;  %v9366_v27 = vunpack.i.l.bf16 %v6625_v34 }
  0xf4   : > { %v1269_v26 = vsel %vm1256_vm1, %v9518_v6, %v9517_v54  ;;  %v9520_v20 = vmov %v9517_v54  ;;  %5457 = vperm.xlu0 %5048, %v5456_v10   ;;  %v9522_v16 = vrot.slane %v6512_v11, 1  ;;  %v844_v24 = vmul.f32 %v5235_v15, %v5964_v51 }
  0xf5   : > { %v1271_v25 = vsel %vm1256_vm1, %v9520_v20, %v9519_v43  ;;  %v1373_v0 = vadd.f32 %v1269_v26, %v1016_v37  ;;  %v6662_v60 = vsel %vm899_vm0, %v960_v38, %v9521_v47  ;;  %v1786_v58 = vunpack.c.l.bf16 %v4597_v31  ;;  %v4595_v38 = vld [vmem:[%s5821_s17 + $0xb4] sm:$0xff]  }
  0xf6   : > { %v1374_v54 = vadd.f32 %v1271_v25, %v1017_v57  ;;  %v6670_v2 = vsel %vm899_vm0, %v9522_v16, %v958_v12  ;;  %v6680_v40 = vmul.f32 %v5235_v15, %v5974_v55  ;;  %v6689_v11 = vmul.f32 %v9366_v27, %v5964_v51  ;;  %v4594_v12 = vld [vmem:[%s5821_s17 + $0xb0] sm:$0x1]  ;;  %v4600_v15 = vld [vmem:[%s5821_s17 + $0xc8] sm:$0x1] }
  0xf7   : > { %v6682_v35 = vadd.f32 %v1634_v4, %v1373_v0  ;;  %v970_v43 = vrot.slane %v845_v48, 1  ;;  %v9524_v25 = vunpack.c.l.bf16 %v6054_v56  ;;  %v1784_v0 = vunpack.c.l.bf16 %v4595_v38 }
  0xf8   : > { %v6675_v39 = vpop.permute.xlu2 %5317  ;;  %v6677_v50 = vpop.permute.xlu1 %5267  ;;  %v6684_v57 = vadd.f32 %v1635_v32, %v1374_v54  ;;  %v9367_v20 = vrot.slane %v6689_v11, 1  ;;  %v1785_v54 = vunpack.c.h.bf16 %v4595_v38  ;;  %v968_v47 = vrot.slane %v844_v24, 1  ;;  %v4604_v24 = vld [vmem:[%s5821_s17 + $0x24] sm:$0xe] }
  0xf9   : > { %v6692_v6 = vpop.permute.xlu0 %5262  ;;  %v5481_v31 = vpack.i.bf16 %v9524_v25, %v1786_v58  ;;  %v9368_v32 = vunpack.c.h.bf16 %v6588_v14  ;;  %v1783_v4 = vunpack.c.l.bf16 %v4594_v12  ;;  %v5320_v16 = vunpack.i.h.bf16 %v6675_v39  ;;  %v4605_v25 = vld [vmem:[%s5821_s17 + $0x30] sm:$0xe] }
  0xfa   : > { %9523 = vst [vmem:[#allocation67_spill] sm:$0xff] %v6684_v57  ;;  %v5255_v18 = vunpack.i.h.bf16 %v6614_v63  ;;  %v9525_v48 = vrot.slane %v6410_v62, 1  ;;  %v5476_v38 = vpack.i.bf16 %v1785_v54, %v1784_v0  ;;  %v5254_v12 = vunpack.i.l.bf16 %v6614_v63  ;;  %v4602_v62 = vld [vmem:[%s5821_s17 + $0xc] sm:$0xe] }
  0xfb   : > { %5482 = vperm.xlu2 %5070, %v5481_v31   ;;  %v5471_v26 = vpack.i.bf16 %v1783_v4, %v9368_v32  ;;  %v1641_v27 = vmul.f32 %v5320_v16, %v6647_v46  ;;  %v1023_v10 = vadd.f32 %v6421_v3, %v5969_v53  ;;  %v5250_v31 = vunpack.i.h.bf16 %v6625_v34  ;;  %v4603_v16 = vld [vmem:[%s5821_s17 + $0x18] sm:$0xe] }
  0xfc   : > { %v6709_v58 = vsel %vm899_vm0, %v9525_v48, %v9367_v20  ;;  %v9526_v48 = vunpack.i.l.bf16 %v6550_v44  ;;  %5477 = vperm.xlu1 %5059, %v5476_v38   ;;  %v9527_v63 = vrot.slane %v6380_v7, 2  ;;  %v9528_v0 = vrot.slane %v6396_v28, 2 }
  0xfd   : > { %v5265_v4 = vunpack.i.h.bf16 %v6692_v6  ;;  %v9529_v53 = vrot.slane %v6576_v22, 1  ;;  %5472 = vperm.xlu0 %5048, %v5471_v26   ;;  %v2293_v32 = vunpack.c.l.bf16 %v4605_v25  ;;  %v9530_v7 = vrot.slane %v6584_v42, 1 }
  0xfe   : > { %v6723_v20 = vmul.f32 %v9526_v48, %v5974_v55  ;;  %v1286_v54 = vsel %vm1256_vm1, %v9528_v0, %v9527_v63  ;;  %v2292_v48 = vunpack.c.l.bf16 %v4604_v24  ;;  %v6747_v0 = vmul.f32 %v5255_v18, %v5974_v55 }
  0xff   : > { %v6736_v3 = vsel %vm899_vm0, %v970_v43, %v9529_v53  ;;  %v1380_v44 = vadd.f32 %v1286_v54, %v1023_v10  ;;  %v6744_v63 = vsel %vm899_vm0, %v9530_v7, %v968_v47  ;;  %v1175_v22 = vmul.f32 %v5265_v4, %v5974_v55 }
 0x100   : > { %v5333_v38 = vpop.permute.xlu2 %5332  ;;  %v6739_v37 = vpop.permute.xlu1 %5282  ;;  %v2290_v43 = vunpack.c.l.bf16 %v4602_v62  ;;  %v6753_v26 = vmul.f32 %v5254_v12, %v5974_v55  ;;  %v5496_v24 = vpack.i.bf16 %v2293_v32, %v2292_v48  ;;  %v2291_v25 = vunpack.c.l.bf16 %v4603_v16 }
 0x101   : > { %v6750_v53 = vpop.permute.xlu0 %5277  ;;  %v6755_v10 = vadd.f32 %v1641_v27, %v1380_v44  ;;  %v6758_v42 = vmul.f32 %v5250_v31, %v5964_v51  ;;  %v5270_v47 = vunpack.i.h.bf16 %v6677_v50  ;;  %v1282_v18 = vrot.slane %v1175_v22, 2  ;;  %v4610_v44 = vld [vmem:[%s5821_s17 + $0x6c] sm:$0xe] }
 0x102   : > { %v1789_v54 = vunpack.c.l.bf16 %v4600_v15  ;;  %v5264_v62 = vunpack.i.l.bf16 %v6692_v6  ;;  %v5491_v4 = vpack.i.bf16 %v2291_v25, %v2290_v43  ;;  %v5335_v7 = vunpack.i.h.bf16 %v5333_v38  ;;  %v4608_v25 = vld [vmem:[%s5821_s17 + $0x54] sm:$0xe] }
 0x103   : > { %v5334_v57 = vunpack.i.l.bf16 %v5333_v38  ;;  %v9531_v12 = vrot.slane %v6396_v28, 2  ;;  %5497 = vperm.xlu2 %5070, %v5496_v24   ;;  %v9532_v32 = vunpack.c.h.bf16 %v6054_v56  ;;  %v1028_v16 = vadd.f32 %v6489_v23, %v5981_v61 }
 0x104   : > { %v1029_v15 = vadd.f32 %v6415_v5, %v5978_v59  ;;  %v1647_v28 = vmul.f32 %v5335_v7, %v6647_v46  ;;  %v9533_v48 = vrot.slane %v6437_v21, 2  ;;  %v9534_v38 = vrot.slane %v6541_v17, 2  ;;  %v4611_v5 = vld [vmem:[%s5821_s17 + $0x78] sm:$0xe]  ;;  %5492 = vperm.xlu1 %5059, %v5491_v4   ;;  %v4606_v7 = vld [vmem:[%s5821_s17 + $0x3c] sm:$0xe] }
 0x105   : > { %v1284_v27 = vsel %vm1256_vm1, %v1282_v18, %v9531_v12  ;;  %v5486_v51 = vpack.i.bf16 %v1789_v54, %v9532_v32  ;;  %v9535_v22 = vrot.slane %v6255_v13, 2  ;;  %v1646_v24 = vmul.f32 %v5334_v57, %v6647_v46  ;;  %v4609_v54 = vld [vmem:[%s5821_s17 + $0x60] sm:$0xe] }
 0x106   : > { %v6773_v6 = vadd.f32 %v1284_v27, %v6389_v52  ;;  %v1299_v56 = vsel %vm1256_vm1, %v9534_v38, %v9533_v48  ;;  %v9536_v61 = vmov %v9533_v48  ;;  %v5269_v52 = vunpack.i.l.bf16 %v6677_v50 }
 0x107   : > { %v1301_v59 = vsel %vm1256_vm1, %v9536_v61, %v9535_v22  ;;  %v1385_v23 = vadd.f32 %v1299_v56, %v1028_v16  ;;  %v6791_v17 = vmul.f32 %v5250_v31, %v5974_v55  ;;  %v6794_v18 = vmul.f32 %v5264_v62, %v5974_v55  ;;  %5487 = vperm.xlu0 %5048, %v5486_v51   ;;  %v4607_v31 = vld [vmem:[%s5821_s17 + $0x48] sm:$0xe] }
 0x108   : > { %v1386_v43 = vadd.f32 %v1301_v59, %v1029_v15  ;;  %v5280_v13 = vunpack.i.h.bf16 %v6750_v53  ;;  %v2298_v21 = vunpack.c.l.bf16 %v4610_v44  ;;  %v5348_v50 = vpop.permute.xlu2 %5347  ;;  %v5298_v4 = vpop.permute.xlu1 %5297  ;;  %v1262_v12 = vrot.slane %v6747_v0, 2 }
 0x109   : > { %v6800_v27 = vadd.f32 %v1646_v24, %v1385_v23  ;;  %v2299_v32 = vunpack.c.l.bf16 %v4611_v5  ;;  %v5293_v16 = vpop.permute.xlu0 %5292  ;;  %v1257_v62 = vrot.slane %v6753_v26, 2  ;;  %v6807_v51 = vmul.f32 %v5270_v47, %v5974_v55 }
 0x10a   : > { %v6802_v57 = vadd.f32 %v1647_v28, %v1386_v43  ;;  %v1193_v15 = vmul.f32 %v5280_v13, %v5974_v55  ;;  %v2296_v44 = vunpack.c.l.bf16 %v4608_v25  ;;  %v6811_v48 = vmul.f32 %v5269_v52, %v5974_v55 }
 0x10b   : > { %v5511_v38 = vpack.i.bf16 %v2299_v32, %v2298_v21  ;;  %v2297_v0 = vunpack.c.l.bf16 %v4609_v54  ;;  %v2294_v56 = vunpack.c.l.bf16 %v4606_v7  ;;  %v2295_v59 = vunpack.c.l.bf16 %v4607_v31  ;;  %v9541_v31 = vld [vmem:[#allocation41_spill] sm:$0xff] }
 0x10c   : > { %v1312_v22 = vrot.slane %v1193_v15, 2  ;;  %v5350_v5 = vunpack.i.h.bf16 %v5348_v50  ;;  %v5349_v47 = vunpack.i.l.bf16 %v5348_v50  ;;  %v1034_v23 = vadd.f32 %v6548_v30, %v5992_v9 }
 0x10d   : > { %5512 = vperm.xlu2 %5070, %v5511_v38   ;;  %v5506_v26 = vpack.i.bf16 %v2297_v0, %v2296_v44  ;;  %v5501_v43 = vpack.i.bf16 %v2295_v59, %v2294_v56  ;;  %v1035_v52 = vadd.f32 %v6670_v2, %v5989_v8  ;;  %v9537_v24 = vrot.slane %v6598_v19, 2  ;;  %v9542_v56 = vld [vmem:[#allocation35_spill] sm:$0xff] }
 0x10e   : > { %v9538_v13 = vrot.slane %v6563_v45, 2  ;;  %v1653_v7 = vmul.f32 %v5350_v5, %v6647_v46  ;;  %v1652_v9 = vmul.f32 %v5349_v47, %v6647_v46  ;;  %v5300_v30 = vunpack.i.h.bf16 %v5298_v4  ;;  %v9540_v45 = vld [vmem:[#allocation10_spill] sm:$0xff] }
 0x10f   : > { %v1314_v25 = vsel %vm1256_vm1, %v1312_v22, %v9537_v24  ;;  %v9539_v21 = vmov %v9537_v24  ;;  %5507 = vperm.xlu1 %5059, %v5506_v26   ;;  %5502 = vperm.xlu0 %5048, %v5501_v43   ;;  %v5299_v2 = vunpack.i.l.bf16 %v5298_v4  ;;  %v1014_v32 = vadd.f32 %v6274_v33, %v6039_v41  ;;  %v9544_v4 = vld [vmem:[#allocation33_spill] sm:$0xff]  ;;  %v4616_v24 = vld [vmem:[%s5821_s17 + $0xb4] sm:$0xe] }
 0x110   : > { %v1316_v54 = vsel %vm1256_vm1, %v9539_v21, %v9538_v13  ;;  %v1391_v50 = vadd.f32 %v1314_v25, %v1034_v23  ;;  %v1015_v19 = vadd.f32 %v9541_v31, %v9540_v45  ;;  %v5363_v15 = vpop.permute.xlu2 %5362  ;;  %v6833_v44 = vpop.permute.xlu1 %5312  ;;  %v1633_v0 = vmul.f32 %v5300_v30, %v6647_v46  ;;  %v4617_v25 = vld [vmem:[%s5821_s17 + $0xc0] sm:$0xe]  ;;  %v4614_v45 = vld [vmem:[%s5821_s17 + $0x9c] sm:$0xe] }
 0x111   : > { %v1392_v8 = vadd.f32 %v1316_v54, %v1035_v52  ;;  %v9543_v22 = vrot.slane %v9542_v56, 2  ;;  %v9545_v26 = vrot.slane %v9544_v4, 2  ;;  %v6846_v5 = vpop.permute.xlu0 %5307  ;;  %v1632_v52 = vmul.f32 %v5299_v2, %v6647_v46  ;;  %v9547_v13 = vld [vmem:[#allocation30_spill] sm:$0xff]  ;;  %v9549_v54 = vld [vmem:[#allocation11_spill] sm:$0xff]  ;;  %v9553_v2 = vld [vmem:[#allocation5_spill] sm:$0xff] }
 0x112   : > { %v6835_v38 = vadd.f32 %v1652_v9, %v1391_v50  ;;  %v9550_v50 = vrot.slane %v9549_v54, 2  ;;  %v9554_v56 = vld [vmem:[#allocation28_spill] sm:$0xff]  ;;  %v9556_v4 = vld [vmem:[#allocation27_spill] sm:$0xff]  ;;  %v5365_v61 = vunpack.i.h.bf16 %v5363_v15 }
 0x113   : > { %v1264_v59 = vsel %vm1256_vm1, %v1262_v12, %v9543_v22  ;;  %v9546_v33 = vmov %v9543_v22  ;;  %v6848_v47 = vadd.f32 %v1653_v7, %v1392_v8  ;;  %v9548_v12 = vrot.slane %v9547_v13, 2 }
 0x114   : > { %v1266_v41 = vsel %vm1256_vm1, %v9546_v33, %v9545_v26  ;;  %v1371_v23 = vadd.f32 %v1264_v59, %v1014_v32  ;;  %v5295_v7 = vunpack.i.h.bf16 %v5293_v16  ;;  %v5294_v8 = vunpack.i.l.bf16 %v5293_v16  ;;  %v4615_v32 = vld [vmem:[%s5821_s17 + $0xa8] sm:$0xe]  ;;  %v9555_v59 = vld [vmem:[#allocation4_spill] sm:$0xff]  ;;  %v4612_v26 = vld [vmem:[%s5821_s17 + $0x84] sm:$0xe] }
 0x115   : > { %v1372_v43 = vadd.f32 %v1266_v41, %v1015_v19  ;;  %v1259_v21 = vsel %vm1256_vm1, %v1257_v62, %v9548_v12  ;;  %v9551_v9 = vmov %v9548_v12  ;;  %v1012_v22 = vadd.f32 %v9554_v56, %v9553_v2  ;;  %v4613_v33 = vld [vmem:[%s5821_s17 + $0x90] sm:$0xe] }
 0x116   : > { %v1261_v30 = vsel %vm1256_vm1, %v9551_v9, %v9550_v50  ;;  %v6863_v31 = vadd.f32 %v1632_v52, %v1371_v23  ;;  %v1013_v62 = vadd.f32 %v9556_v4, %v9555_v59  ;;  %v1631_v41 = vmul.f32 %v5295_v7, %v6647_v46 }
 0x117   : > { %v6865_v19 = vadd.f32 %v1633_v0, %v1372_v43  ;;  %v1630_v13 = vmul.f32 %v5294_v8, %v6647_v46  ;;  %v2304_v12 = vunpack.c.l.bf16 %v4616_v24  ;;  %v2305_v16 = vunpack.c.l.bf16 %v4617_v25  ;;  %v9560_v8 = vld [vmem:[#allocation6_spill] sm:$0xff] }
 0x118   : > { %v1369_v54 = vadd.f32 %v1259_v21, %v1012_v22  ;;  %v1370_v50 = vadd.f32 %v1261_v30, %v1013_v62  ;;  %v2302_v23 = vunpack.c.l.bf16 %v4614_v45  ;;  %v2303_v52 = vunpack.c.l.bf16 %v4615_v32  ;;  %v6879_v28 = vpop.permute.xlu2 %5377  ;;  %v6881_v7 = vpop.permute.xlu1 %5327  ;;  %v9559_v21 = vld [vmem:[#allocation7_spill] sm:$0xff]  ;;  %v9561_v45 = vld [vmem:[#allocation65_spill] sm:$0xff] }
 0x119   : > { %9552 = vst [vmem:[#allocation10_spill] sm:$0xff] %v6865_v19  ;;  %v5526_v0 = vpack.i.bf16 %v2305_v16, %v2304_v12  ;;  %v2300_v43 = vunpack.c.l.bf16 %v4612_v26  ;;  %v2301_v9 = vunpack.c.l.bf16 %v4613_v33  ;;  %v5364_v4 = vunpack.i.l.bf16 %v5363_v15  ;;  %v6888_v22 = vpop.permute.xlu0 %5322  ;;  %v9564_v33 = vld [vmem:[#allocation49_spill] sm:$0xff] }
 0x11a   : > { %v6875_v2 = vadd.f32 %v1630_v13, %v1369_v54  ;;  %v6877_v56 = vadd.f32 %v1631_v41, %v1370_v50  ;;  %v5521_v59 = vpack.i.bf16 %v2303_v52, %v2302_v23  ;;  %v1659_v25 = vmul.f32 %v5365_v61, %v6647_v46  ;;  %v9567_v23 = vld [vmem:[#allocation3_spill] sm:$0xff] }
 0x11b   : > { %5527 = vperm.xlu2 %5070, %v5526_v0   ;;  %v5516_v24 = vpack.i.bf16 %v2301_v9, %v2300_v43  ;;  %v1040_v30 = vadd.f32 %v6736_v3, %v9559_v21  ;;  %v1041_v32 = vadd.f32 %v9561_v45, %v9560_v8  ;;  %v9562_v62 = vrot.slane %v6656_v36, 2  ;;  %v9569_v43 = vld [vmem:[#allocation2_spill] sm:$0xff]  ;;  %v9570_v9 = vld [vmem:[#allocation36_spill] sm:$0xff] }
 0x11c   : > { %9557 = vst [vmem:[#allocation41_spill] sm:$0xff] %v6875_v2  ;;  %5522 = vperm.xlu1 %5059, %v5521_v59   ;;  %v9563_v15 = vrot.slane %v6643_v29, 2  ;;  %v9565_v41 = vrot.slane %v9564_v33, 2  ;;  %v1658_v3 = vmul.f32 %v5364_v4, %v6647_v46  ;;  %v5315_v12 = vunpack.i.h.bf16 %v6833_v44  ;;  %v9568_v29 = vld [vmem:[#allocation37_spill] sm:$0xff]  ;;  %v9571_v59 = vld [vmem:[#allocation39_spill] sm:$0xff] }
 0x11d   : > { %9558 = vst [vmem:[#allocation35_spill] sm:$0xff] %v6877_v56  ;;  %v9566_v13 = vmov %v9562_v62  ;;  %5517 = vperm.xlu0 %5048, %v5516_v24   ;;  %v5314_v50 = vunpack.i.l.bf16 %v6833_v44  ;;  %v1020_v52 = vadd.f32 %v9568_v29, %v9567_v23  ;;  %v1021_v36 = vadd.f32 %v9570_v9, %v9569_v43  ;;  %v4621_v23 = vld [vmem:[%s5821_s17 + $0x24] sm:$0xff]   ;;  %v9582_v43 = vld [vmem:[#allocation8_spill] sm:$0xff] }
 0x11e   : > { %v1329_v26 = vsel %vm1256_vm1, %v9563_v15, %v9562_v62  ;;  %v1331_v61 = vsel %vm1256_vm1, %v9566_v13, %v9565_v41  ;;  %v1639_v0 = vmul.f32 %v5315_v12, %v6647_v46  ;;  %v9572_v21 = vrot.slane %v9571_v59, 2  ;;  %v9579_v13 = vld [vmem:[#allocation9_spill] sm:$0xff]  ;;  %v9583_v9 = vld [vmem:[#allocation48_spill] sm:$0xff] }
 0x11f   : > { %v1397_v16 = vadd.f32 %v1329_v26, %v1040_v30  ;;  %v1398_v54 = vadd.f32 %v1331_v61, %v1041_v32  ;;  %v9573_v4 = vrot.slane %v6794_v18, 2  ;;  %v9574_v30 = vld [vmem:[#allocation22_spill] sm:$0xff]  ;;  %v1638_v26 = vmul.f32 %v5314_v50, %v6647_v46  ;;  %v9580_v61 = vld [vmem:[#allocation40_spill] sm:$0xff] }
 0x120   : > { %v9575_v8 = vrot.slane %v9574_v30, 2  ;;  %v9576_v45 = vmov %v9572_v21  ;;  %v5310_v41 = vunpack.i.h.bf16 %v6846_v5  ;;  %v5309_v18 = vunpack.i.l.bf16 %v6846_v5 }
 0x121   : > { %v1279_v24 = vsel %vm1256_vm1, %v9573_v4, %v9572_v21  ;;  %v6918_v32 = vadd.f32 %v1658_v3, %v1397_v16  ;;  %v6920_v62 = vadd.f32 %v1659_v25, %v1398_v54  ;;  %v1018_v12 = vadd.f32 %v9580_v61, %v9579_v13  ;;  %v9584_v16 = vld [vmem:[#allocation43_spill] sm:$0xff]  ;;  %v5022_v4 = vld [vmem:[%s5821_s17 + $0x18] sm:$0xff]   ;;  %v9592_v13 = vld [vmem:[#allocation16_spill] sm:$0xff] }
 0x122   : > { %v1281_v44 = vsel %vm1256_vm1, %v9576_v45, %v9575_v8  ;;  %v1377_v15 = vadd.f32 %v1279_v24, %v1020_v52  ;;  %v1019_v3 = vadd.f32 %v9583_v9, %v9582_v43  ;;  %v9585_v25 = vrot.slane %v9584_v16, 2  ;;  %v9586_v54 = vld [vmem:[#allocation55_spill] sm:$0xff] }
 0x123   : > { %9577 = vst [vmem:[#allocation33_spill] sm:$0xff] %v6918_v32  ;;  %v1378_v33 = vadd.f32 %v1281_v44, %v1021_v36  ;;  %v9587_v52 = vrot.slane %v9586_v54, 2  ;;  %v9588_v36 = vld [vmem:[#allocation42_spill] sm:$0xff]  ;;  %v1637_v30 = vmul.f32 %v5310_v41, %v6647_v46  ;;  %v1636_v45 = vmul.f32 %v5309_v18, %v6647_v46  ;;  %v6947_v44 = vpop.permute.xlu2 %5392  ;;  %v6955_v54 = vpop.permute.xlu0 %5337 }
 0x124   : > { %9578 = vst [vmem:[#allocation30_spill] sm:$0xff] %v6920_v62  ;;  %v6928_v29 = vadd.f32 %v1638_v26, %v1377_v15  ;;  %v9589_v59 = vrot.slane %v9588_v36, 2  ;;  %v9590_v21 = vmov %v9585_v25  ;;  %v6949_v15 = vpop.permute.xlu1 %5342  ;;  %v9593_v61 = vunpack.c.l.bf16 %v9592_v13 }
 0x125   : > { %v1274_v50 = vsel %vm1256_vm1, %v9587_v52, %v9585_v25  ;;  %v6943_v24 = vadd.f32 %v1639_v0, %v1378_v33  ;;  %v9594_v43 = vunpack.c.h.bf16 %v9592_v13  ;;  %v2665_v16 = vunpack.c.l.bf16 %v4621_v23  ;;  %v9602_v13 = vld [vmem:[#allocation57_spill] sm:$0xff] }
 0x126   : > { %9581 = vst [vmem:[#allocation11_spill] sm:$0xff] %v6928_v29  ;;  %v1276_v5 = vsel %vm1256_vm1, %v9590_v21, %v9589_v59  ;;  %v1375_v8 = vadd.f32 %v1274_v50, %v1018_v12  ;;  %v2666_v25 = vunpack.c.h.bf16 %v4621_v23  ;;  %v1292_v0 = vrot.slane %v6807_v51, 2 }
 0x127   : > { %9591 = vst [vmem:[#allocation5_spill] sm:$0xff] %v6943_v24  ;;  %v1376_v26 = vadd.f32 %v1276_v5, %v1019_v3  ;;  %v5541_v9 = vpack.i.bf16 %v9594_v43, %v9593_v61  ;;  %v4930_v41 = vunpack.c.l.bf16 %v5022_v4  ;;  %v4931_v18 = vunpack.c.h.bf16 %v5022_v4 }
 0x128   : > { %v6958_v33 = vadd.f32 %v1636_v45, %v1375_v8  ;;  %v9596_v3 = vunpack.i.l.bf16 %v6625_v34  ;;  %v5536_v36 = vpack.i.bf16 %v2666_v25, %v2665_v16  ;;  %v1287_v23 = vrot.slane %v6811_v48, 2  ;;  %v9599_v8 = vld [vmem:[#allocation13_spill] sm:$0xff] }
 0x129   : > { %v6966_v50 = vadd.f32 %v1637_v30, %v1376_v26  ;;  %5542 = vperm.xlu2 %5070, %v5541_v9   ;;  %v5285_v59 = vunpack.i.h.bf16 %v6739_v37  ;;  %v6970_v51 = vpack.i.bf16 %v4931_v18, %v4930_v41  ;;  %v5330_v21 = vunpack.i.h.bf16 %v6881_v7  ;;  %v9600_v30 = vld [vmem:[#allocation50_spill] sm:$0xff]  ;;  %v9601_v26 = vld [vmem:[#allocation12_spill] sm:$0xff]  ;;  %v9605_v41 = vld [vmem:[#allocation51_spill] sm:$0xff] }
 0x12a   : > { %9595 = vst [vmem:[#allocation28_spill] sm:$0xff] %v6958_v33  ;;  %v6964_v52 = vmul.f32 %v9596_v3, %v5974_v55  ;;  %v9598_v5 = vunpack.i.l.bf16 %v6750_v53  ;;  %5537 = vperm.xlu1 %5059, %v5536_v36   ;;  %v5329_v34 = vunpack.i.l.bf16 %v6881_v7  ;;  %v1026_v45 = vadd.f32 %v9600_v30, %v9599_v8  ;;  %v9603_v53 = vld [vmem:[#allocation52_spill] sm:$0xff] }
 0x12b   : > { %9597 = vst [vmem:[#allocation4_spill] sm:$0xff] %v6966_v50  ;;  %v1027_v48 = vadd.f32 %v9602_v13, %v9601_v26  ;;  %v978_v61 = vrot.slane %v6758_v42, 1  ;;  %5532 = vperm.xlu0 %5048, %v6970_v51   ;;  %v1645_v9 = vmul.f32 %v5330_v21, %v6647_v46  ;;  %v9604_v16 = vrot.slane %v9603_v53, 2  ;;  %v9608_v26 = vld [vmem:[#allocation47_spill] sm:$0xff] }
 0x12c   : > { %v1190_v4 = vmul.f32 %v9598_v5, %v5974_v55  ;;  %v9606_v18 = vrot.slane %v9605_v41, 2  ;;  %v1644_v5 = vmul.f32 %v5329_v34, %v6647_v46  ;;  %v6996_v8 = vmul.f32 %v5285_v59, %v5974_v55  ;;  %v7003_v43 = vpop.permute.xlu1 %5357 }
 0x12d   : > { %v1294_v7 = vsel %vm1256_vm1, %v1292_v0, %v9604_v16  ;;  %v9607_v3 = vmov %v9604_v16  ;;  %v5284_v21 = vunpack.i.l.bf16 %v6739_v37  ;;  %v9609_v13 = vrot.slane %v9608_v26, 2  ;;  %v4629_v16 = vld [vmem:[%s5821_s17 + $0x54] sm:$0xff]   ;;  %v4625_v37 = vld [vmem:[%s5821_s17 + $0x3c] sm:$0xff]  }
 0x12e   : > { %v1296_v36 = vsel %vm1256_vm1, %v9607_v3, %v9606_v18  ;;  %v1383_v42 = vadd.f32 %v1294_v7, %v1026_v45  ;;  %v1307_v41 = vrot.slane %v1190_v4, 2  ;;  %v9611_v18 = vld [vmem:[#allocation29_spill] sm:$0xff]  ;;  %v5325_v7 = vunpack.i.h.bf16 %v6888_v22  ;;  %v9618_v26 = vld [vmem:[#allocation44_spill] sm:$0xff] }
 0x12f   : > { %v1384_v30 = vadd.f32 %v1296_v36, %v1027_v48  ;;  %v1289_v0 = vsel %vm1256_vm1, %v1287_v23, %v9609_v13  ;;  %v9612_v45 = vrot.slane %v9611_v18, 2  ;;  %v9613_v34 = vmov %v9609_v13  ;;  %v7014_v48 = vpop.permute.xlu0 %5352  ;;  %v4601_v23 = vld [vmem:[%s9313_s1 + $0x4] sm:$0x1]  ;;  %v9615_v36 = vld [vmem:[#allocation15_spill] sm:$0xff] }
 0x130   : > { %v7005_v53 = vadd.f32 %v1644_v5, %v1383_v42  ;;  %v5324_v4 = vunpack.i.l.bf16 %v6888_v22  ;;  %v9616_v42 = vld [vmem:[#allocation45_spill] sm:$0xff]  ;;  %v9617_v13 = vld [vmem:[#allocation14_spill] sm:$0xff]  ;;  %v2673_v25 = vunpack.c.l.bf16 %v4629_v16  ;;  %v2674_v12 = vunpack.c.h.bf16 %v4629_v16 }
 0x131   : > { %v1291_v59 = vsel %vm1256_vm1, %v9613_v34, %v9612_v45  ;;  %v7019_v3 = vadd.f32 %v1645_v9, %v1384_v30  ;;  %v1024_v5 = vadd.f32 %v9616_v42, %v9615_v36  ;;  %v1025_v18 = vadd.f32 %v9618_v26, %v9617_v13  ;;  %v7026_v45 = vpop.permute.xlu2 %5407  ;;  %v4618_v16 = vld [vmem:[%s9313_s1 + $0x5] sm:$0x1] }
 0x132   : > { %9610 = vst [vmem:[#allocation27_spill] sm:$0xff] %v7005_v53  ;;  %v1643_v34 = vmul.f32 %v5325_v7, %v6647_v46  ;;  %v9619_v53 = vld [vmem:[#allocation21_spill] sm:$0xff]  ;;  %v1642_v22 = vmul.f32 %v5324_v4, %v6647_v46  ;;  %v2669_v24 = vunpack.c.l.bf16 %v4625_v37  ;;  %v9622_v36 = vrot.slane %v6689_v11, 1 }
 0x133   : > { %9614 = vst [vmem:[#allocation7_spill] sm:$0xff] %v7019_v3  ;;  %v9620_v50 = vunpack.c.l.bf16 %v9619_v53  ;;  %v9621_v33 = vunpack.c.h.bf16 %v9619_v53  ;;  %v1381_v30 = vadd.f32 %v1289_v0, %v1024_v5  ;;  %v1382_v3 = vadd.f32 %v1291_v59, %v1025_v18  ;;  %v9628_v5 = vld [vmem:[#allocation53_spill] sm:$0xff] }
 0x134   : > { %v7037_v42 = vsel %vm899_vm0, %v9622_v36, %v978_v61  ;;  %v1792_v13 = vunpack.c.l.bf16 %v4601_v23  ;;  %v5556_v26 = vpack.i.bf16 %v2674_v12, %v2673_v25  ;;  %v2670_v7 = vunpack.c.h.bf16 %v4625_v37  ;;  %v9625_v37 = vld [vmem:[#allocation18_spill] sm:$0xff] }
 0x135   : > { %v5551_v9 = vpack.i.bf16 %v9621_v33, %v9620_v50  ;;  %v7042_v53 = vadd.f32 %v1642_v22, %v1381_v30  ;;  %v7044_v33 = vadd.f32 %v1643_v34, %v1382_v3  ;;  %v5345_v50 = vunpack.i.h.bf16 %v6949_v15  ;;  %v9626_v23 = vld [vmem:[#allocation54_spill] sm:$0xff]  ;;  %v9627_v3 = vld [vmem:[#allocation17_spill] sm:$0xff] }
 0x136   : > { %v5344_v0 = vunpack.i.l.bf16 %v6949_v15  ;;  %v5319_v11 = vunpack.i.l.bf16 %v6675_v39  ;;  %v1322_v61 = vrot.slane %v6996_v8, 2  ;;  %v7051_v12 = vmul.f32 %v5284_v21, %v5974_v55  ;;  %5557 = vperm.xlu2 %5070, %v5556_v26   ;;  %v9629_v34 = vld [vmem:[#allocation58_spill] sm:$0xff]  ;;  %v7061_v39 = vpop.permute.xlu1 %5372 }
 0x137   : > { %5552 = vperm.xlu1 %5059, %v5551_v9   ;;  %9623 = vst [vmem:[#allocation6_spill] sm:$0xff] %v7042_v53  ;;  %v5546_v25 = vpack.i.bf16 %v2670_v7, %v2669_v24  ;;  %v1651_v59 = vmul.f32 %v5345_v50, %v6647_v46  ;;  %v1032_v4 = vadd.f32 %v9626_v23, %v9625_v37  ;;  %v9630_v9 = vrot.slane %v9629_v34, 2  ;;  %v9631_v21 = vld [vmem:[#allocation38_spill] sm:$0xff]  ;;  %v7071_v26 = vpop.permute.xlu0 %5367  ;;  %v9635_v23 = vld [vmem:[#allocation56_spill] sm:$0xff] }
 0x138   : > { %9624 = vst [vmem:[#allocation65_spill] sm:$0xff] %v7044_v33  ;;  %v1033_v18 = vadd.f32 %v9628_v5, %v9627_v3  ;;  %v7063_v55 = vperm.slane %v1792_v13, 0  ;;  %v2308_v8 = vunpack.c.l.bf16 %v4618_v16  ;;  %v5380_v24 = vunpack.i.h.bf16 %v6879_v28  ;;  %v9634_v16 = vld [vmem:[#allocation20_spill] sm:$0xff]  ;;  %v9640_v33 = vld [vmem:[#allocation62_spill] sm:$0xff] }
 0x139   : > { %v1309_v15 = vsel %vm1256_vm1, %v1307_v41, %v9630_v9  ;;  %5547 = vperm.xlu0 %5048, %v5546_v25   ;;  %v9632_v30 = vrot.slane %v9631_v21, 2  ;;  %v9633_v22 = vmov %v9630_v9  ;;  %v1650_v50 = vmul.f32 %v5344_v0, %v6647_v46  ;;  %v9636_v25 = vld [vmem:[#allocation19_spill] sm:$0xff]  ;;  %v9637_v5 = vld [vmem:[#allocation64_spill] sm:$0xff] }
 0x13a   : > { %v1389_v7 = vadd.f32 %v1309_v15, %v1032_v4  ;;  %v5340_v37 = vunpack.i.h.bf16 %v6955_v54  ;;  %v5339_v13 = vunpack.i.l.bf16 %v6955_v54  ;;  %v1030_v3 = vadd.f32 %v9635_v23, %v9634_v16  ;;  %v9638_v21 = vld [vmem:[#allocation60_spill] sm:$0xff] }
 0x13b   : > { %v1311_v36 = vsel %vm1256_vm1, %v9633_v22, %v9632_v30  ;;  %v1031_v9 = vadd.f32 %v9637_v5, %v9636_v25  ;;  %v9639_v34 = vrot.slane %v9638_v21, 2  ;;  %v9641_v30 = vrot.slane %v9640_v33, 2  ;;  %v4633_v4 = vld [vmem:[%s5821_s17 + $0x6c] sm:$0xff]   ;;  %v7097_v25 = vpop.permute.xlu2 %5422 }
 0x13c   : > { %v1390_v41 = vadd.f32 %v1311_v36, %v1033_v18  ;;  %v5025_v18 = vld [vmem:[%s5821_s17 + $0x60] sm:$0xff]   ;;  %v7087_v15 = vadd.f32 %v1650_v50, %v1389_v7  ;;  %v1649_v54 = vmul.f32 %v5340_v37, %v6647_v46  ;;  %v9644_v36 = vld [vmem:[#allocation59_spill] sm:$0xff]  ;;  %v2678_v50 = vunpack.c.h.bf16 %v4633_v4 }
 0x13d   : > { %v1304_v22 = vsel %vm1256_vm1, %v9641_v30, %v9639_v34  ;;  %v9645_v53 = vrot.slane %v9644_v36, 2  ;;  %v9646_v16 = vmov %v9639_v34  ;;  %v1648_v34 = vmul.f32 %v5339_v13, %v6647_v46  ;;  %v9647_v30 = vld [vmem:[#allocation34_spill] sm:$0xff] }
 0x13e   : > { %9642 = vst [vmem:[#allocation49_spill] sm:$0xff] %v7087_v15  ;;  %v7089_v0 = vadd.f32 %v1651_v59, %v1390_v41  ;;  %v1387_v5 = vadd.f32 %v1304_v22, %v1030_v3  ;;  %v9648_v29 = vunpack.c.l.bf16 %v9647_v30  ;;  %v9649_v7 = vunpack.c.h.bf16 %v9647_v30 }
 0x13f   : > { %v1306_v23 = vsel %vm1256_vm1, %v9646_v16, %v9645_v53  ;;  %v2677_v41 = vunpack.c.l.bf16 %v4633_v4  ;;  %v4942_v37 = vunpack.c.l.bf16 %v5025_v18  ;;  %v1317_v36 = vrot.slane %v7051_v12, 2  ;;  %v9652_v12 = vld [vmem:[#allocation24_spill] sm:$0xff] }
 0x140   : > { %9643 = vst [vmem:[#allocation3_spill] sm:$0xff] %v7089_v0  ;;  %v1388_v33 = vadd.f32 %v1306_v23, %v1031_v9  ;;  %v5571_v59 = vpack.i.bf16 %v9649_v7, %v9648_v29  ;;  %v4943_v0 = vunpack.c.h.bf16 %v5025_v18  ;;  %v5379_v21 = vunpack.i.l.bf16 %v6879_v28  ;;  %v9653_v18 = vld [vmem:[#allocation66_spill] sm:$0xff]  ;;  %v7124_v23 = vpop.permute.xlu1 %5387 }
 0x141   : > { %v7106_v53 = vadd.f32 %v1648_v34, %v1387_v5  ;;  %v5566_v3 = vpack.i.bf16 %v2678_v50, %v2677_v41  ;;  %v5360_v9 = vunpack.i.h.bf16 %v7003_v43  ;;  %v5359_v29 = vunpack.i.l.bf16 %v7003_v43  ;;  %v9654_v43 = vld [vmem:[#allocation23_spill] sm:$0xff]  ;;  %v7143_v50 = vpop.permute.xlu0 %5382 }
 0x142   : > { %v7108_v16 = vadd.f32 %v1649_v54, %v1388_v33  ;;  %5572 = vperm.xlu2 %5070, %v5571_v59   ;;  %v7110_v13 = vpack.i.bf16 %v4943_v0, %v4942_v37  ;;  %v7115_v22 = vmul.f32 %v5319_v11, %v6647_v46  ;;  %v7117_v4 = vperm.slane %v2308_v8, 0 }
 0x143   : > { %9650 = vst [vmem:[#allocation37_spill] sm:$0xff] %v7106_v53  ;;  %v7120_v28 = vmul.f32 %v5380_v24, %v7063_v55  ;;  %v1038_v54 = vadd.f32 %v9653_v18, %v9652_v12  ;;  %5567 = vperm.xlu1 %5059, %v5566_v3   ;;  %v1657_v0 = vmul.f32 %v5360_v9, %v6647_v46  ;;  %v9655_v11 = vrot.slane %v6723_v20, 2  ;;  %v9658_v9 = vld [vmem:[#allocation63_spill] sm:$0xff] }
 0x144   : > { %9651 = vst [vmem:[#allocation2_spill] sm:$0xff] %v7108_v16  ;;  %5562 = vperm.xlu0 %5048, %v7110_v13   ;;  %v1039_v5 = vadd.f32 %v6744_v63, %v9654_v43  ;;  %v5355_v24 = vunpack.i.h.bf16 %v7014_v48  ;;  %v2036_v33 = vmul.f32 %v5379_v21, %v7063_v55  ;;  %v5395_v34 = vunpack.i.h.bf16 %v6947_v44  ;;  %v4641_v63 = vld [vmem:[%s5821_s17 + $0x9c] sm:$0xff]   ;;  %v7165_v16 = vpop.permute.xlu2 %5437 }
 0x145   : > { %v1324_v8 = vsel %vm1256_vm1, %v1322_v61, %v9655_v11  ;;  %v5394_v30 = vunpack.i.l.bf16 %v6947_v44  ;;  %v9656_v7 = vrot.slane %v6680_v40, 2  ;;  %v9657_v59 = vmov %v9655_v11  ;;  %v9660_v43 = vld [vmem:[#allocation46_spill] sm:$0xff] }
 0x146   : > { %v1395_v37 = vadd.f32 %v1324_v8, %v1038_v54  ;;  %v1656_v3 = vmul.f32 %v5359_v29, %v6647_v46  ;;  %v9659_v12 = vrot.slane %v9658_v9, 2  ;;  %v9661_v11 = vrot.slane %v9660_v43, 2 }
 0x147   : > { %v1326_v41 = vsel %vm1256_vm1, %v9657_v59, %v9656_v7  ;;  %v1655_v20 = vmul.f32 %v5355_v24, %v6647_v46  ;;  %v5354_v7 = vunpack.i.l.bf16 %v7014_v48  ;;  %v9663_v59 = vld [vmem:[#allocation26_spill] sm:$0xff]  ;;  %v2685_v43 = vunpack.c.l.bf16 %v4641_v63 }
 0x148   : > { %v1396_v61 = vadd.f32 %v1326_v41, %v1039_v5  ;;  %v1319_v18 = vsel %vm1256_vm1, %v1317_v36, %v9659_v12  ;;  %v9662_v44 = vmov %v9659_v12  ;;  %v1036_v54 = vadd.f32 %v6662_v60, %v9663_v59  ;;  %v4637_v5 = vld [vmem:[%s5821_s17 + $0x84] sm:$0xff]   ;;  %v9666_v41 = vld [vmem:[#allocation25_spill] sm:$0xff] }
 0x149   : > { %v1321_v40 = vsel %vm1256_vm1, %v9662_v44, %v9661_v11  ;;  %v7159_v8 = vadd.f32 %v1656_v3, %v1395_v37  ;;  %v9667_v36 = vld [vmem:[#allocation61_spill] sm:$0xff]  ;;  %v1654_v11 = vmul.f32 %v5354_v7, %v6647_v46  ;;  %v2686_v24 = vunpack.c.h.bf16 %v4641_v63 }
 0x14a   : > { %v7161_v29 = vadd.f32 %v1657_v0, %v1396_v61  ;;  %v1037_v12 = vadd.f32 %v9667_v36, %v9666_v41  ;;  %v1393_v9 = vadd.f32 %v1319_v18, %v1036_v54  ;;  %v9668_v48 = vunpack.c.l.bf16 %v6449_v1 }
 0x14b   : > { %9664 = vst [vmem:[#allocation36_spill] sm:$0xff] %v7159_v8  ;;  %v9669_v44 = vunpack.c.h.bf16 %v6449_v1  ;;  %v5410_v37 = vunpack.i.h.bf16 %v7026_v45  ;;  %v2681_v0 = vunpack.c.l.bf16 %v4637_v5  ;;  %v2682_v61 = vunpack.c.h.bf16 %v4637_v5 }
 0x14c   : > { %9665 = vst [vmem:[#allocation39_spill] sm:$0xff] %v7161_v29  ;;  %v1394_v3 = vadd.f32 %v1321_v40, %v1037_v12  ;;  %v5409_v59 = vunpack.i.l.bf16 %v7026_v45  ;;  %v7174_v41 = vadd.f32 %v1654_v11, %v1393_v9  ;;  %v5586_v36 = vpack.i.bf16 %v2686_v24, %v2685_v43 }
 0x14d   : > { %v5581_v60 = vpack.i.bf16 %v9669_v44, %v9668_v48  ;;  %v9369_v18 = vunpack.i.h.bf16 %v7061_v39  ;;  %v7178_v7 = vmul.f32 %v5379_v21, %v7117_v4  ;;  %v5576_v1 = vpack.i.bf16 %v2682_v61, %v2681_v0  ;;  %v7190_v21 = vpop.permute.xlu1 %5402  ;;  %v5029_v44 = vld [vmem:[%s5821_s17 + $0xc0] sm:$0xff]   ;;  %v9673_v61 = vld [vmem:[#allocation32_spill] sm:$0xff] }
 0x14e   : > { %9670 = vst [vmem:[#allocation22_spill] sm:$0xff] %v7174_v41  ;;  %v7180_v63 = vadd.f32 %v1655_v20, %v1394_v3  ;;  %v5374_v54 = vunpack.i.l.bf16 %v7061_v39  ;;  %v2133_v5 = vrot.slane %v2036_v33, 1  ;;  %v7185_v45 = vmul.f32 %v5395_v34, %v7063_v55  ;;  %5587 = vperm.xlu2 %5070, %v5586_v36  }
 0x14f   : > { %9671 = vst [vmem:[#allocation9_spill] sm:$0xff] %v7178_v7  ;;  %5582 = vperm.xlu1 %5059, %v5581_v60   ;;  %v2035_v12 = vmul.f32 %v9369_v18, %v7063_v55  ;;  %v7193_v20 = vmul.f32 %v5394_v30, %v7063_v55  ;;  %5577 = vperm.xlu0 %5048, %v5576_v1   ;;  %v5370_v9 = vunpack.i.h.bf16 %v7071_v26  ;;  %v5369_v33 = vunpack.i.l.bf16 %v7071_v26  ;;  %v7208_v60 = vpop.permute.xlu0 %5397  ;;  %v9674_v26 = vld [vmem:[#allocation31_spill] sm:$0xff]  ;;  %v4645_v1 = vld [vmem:[%s5821_s17 + $0xb4] sm:$0xff]  }
 0x150   : > { %9672 = vst [vmem:[#allocation40_spill] sm:$0xff] %v7180_v63  ;;  %v2034_v43 = vmul.f32 %v5374_v54, %v7063_v55  ;;  %v7199_v34 = vmul.f32 %v5394_v30, %v7117_v4  ;;  %v7202_v11 = vmul.f32 %v5410_v37, %v7063_v55  ;;  %v7205_v24 = vmul.f32 %v5409_v59, %v7063_v55  ;;  %v7233_v63 = vpop.permute.xlu2 %5452 }
 0x151   : > { %v2131_v48 = vrot.slane %v2035_v12, 1  ;;  %v1661_v0 = vmul.f32 %v5370_v9, %v6647_v46  ;;  %v1042_v36 = vadd.f32 %v6709_v58, %v9673_v61  ;;  %v1043_v30 = vadd.f32 %v7037_v42, %v9674_v26 }
 0x152   : > { %v2130_v3 = vrot.slane %v2034_v43, 1  ;;  %v9676_v54 = vrot.slane %v6964_v52, 2  ;;  %v9677_v12 = vrot.slane %v6628_v49, 2  ;;  %v9678_v43 = vrot.slane %v6791_v17, 2 }
 0x153   : > { %v7217_v37 = vsel %vm899_vm0, %v2131_v48, %v2133_v5  ;;  %v1660_v58 = vmul.f32 %v5369_v33, %v6647_v46  ;;  %v4958_v26 = vunpack.c.l.bf16 %v5029_v44  ;;  %v4959_v41 = vunpack.c.h.bf16 %v5029_v44 }
 0x154   : > { %9675 = vst [vmem:[#allocation8_spill] sm:$0xff] %v7217_v37  ;;  %v1334_v40 = vsel %vm1256_vm1, %v9677_v12, %v9676_v54  ;;  %v9679_v9 = vmov %v9676_v54  ;;  %v7231_v42 = vsel %vm899_vm0, %v2130_v3, %v2131_v48  ;;  %v2689_v49 = vunpack.c.l.bf16 %v4645_v1 }
 0x155   : > { %v1336_v18 = vsel %vm1256_vm1, %v9679_v9, %v9678_v43  ;;  %9680 = vst [vmem:[#allocation48_spill] sm:$0xff] %v7231_v42  ;;  %v1399_v61 = vadd.f32 %v1334_v40, %v1042_v36  ;;  %v2690_v29 = vunpack.c.h.bf16 %v4645_v1  ;;  %v9681_v54 = vunpack.c.l.bf16 %v6588_v14  ;;  %v4654_v1 = vld [vmem:[%s5821_s17 + $0x20] sm:$0x1]  ;;  %v7263_v43 = vpop.permute.xlu1 %5417 }
 0x156   : > { %v1400_v5 = vadd.f32 %v1336_v18, %v1043_v30  ;;  %v9682_v17 = vunpack.c.h.bf16 %v6588_v14  ;;  %v7240_v12 = vmul.f32 %v5409_v59, %v7117_v4  ;;  %v5425_v46 = vunpack.i.h.bf16 %v7097_v25 }
 0x157   : > { %v7243_v33 = vadd.f32 %v1660_v58, %v1399_v61  ;;  %v5424_v18 = vunpack.i.l.bf16 %v7097_v25  ;;  %v7248_v48 = vpack.i.bf16 %v4959_v41, %v4958_v26  ;;  %v5596_v44 = vpack.i.bf16 %v2690_v29, %v2689_v49 }
 0x158   : > { %v5591_v52 = vpack.i.bf16 %v9682_v17, %v9681_v54  ;;  %9683 = vst [vmem:[#allocation43_spill] sm:$0xff] %v7240_v12  ;;  %v7245_v40 = vadd.f32 %v1661_v0, %v1400_v5  ;;  %v5390_v3 = vunpack.i.h.bf16 %v7124_v23  ;;  %v2143_v59 = vrot.slane %v7193_v20, 1  ;;  %v7272_v5 = vld [vmem:[%s5821_s17 + $0x24] sm:$0xff]   ;;  %v4649_v17 = vld [vmem:[%s5821_s17 + $0xcc] sm:$0xff]  }
 0x159   : > { %9684 = vst [vmem:[#allocation55_spill] sm:$0xff] %v7243_v33  ;;  %v5440_v30 = vunpack.i.h.bf16 %v7165_v16  ;;  %5602 = vperm.xlu2 %5070, %v7248_v48   ;;  %5597 = vperm.xlu1 %5059, %v5596_v44   ;;  %v5439_v25 = vunpack.i.l.bf16 %v7165_v16  ;;  %v9370_v41 = vunpack.i.l.bf16 %v7143_v50  ;;  %v2153_v9 = vrot.slane %v7205_v24, 1 }
 0x15a   : > { %9685 = vst [vmem:[#allocation42_spill] sm:$0xff] %v7245_v40  ;;  %5592 = vperm.xlu0 %5048, %v5591_v52   ;;  %v7259_v29 = vmul.f32 %v5390_v3, %v7063_v55  ;;  %v7269_v61 = vmul.f32 %v5425_v46, %v7063_v55  ;;  %v7275_v16 = vmul.f32 %v5424_v18, %v7063_v55  ;;  %v5389_v54 = vunpack.i.l.bf16 %v7124_v23  ;;  %v7283_v52 = vpop.permute.xlu0 %5412 }
 0x15b   : > { %v7278_v26 = vmul.f32 %v5424_v18, %v7117_v4  ;;  %v9687_v24 = vunpack.i.h.bf16 %v7061_v39  ;;  %v7291_v44 = vmul.f32 %v5440_v30, %v7063_v55  ;;  %v7296_v18 = vmul.f32 %v9370_v41, %v7063_v55 }
 0x15c   : > { %v9371_v49 = vrot.slane %v7259_v29, 1  ;;  %v2973_v58 = vunpack.c.l.bf16 %v4654_v1  ;;  %v7299_v14 = vmul.f32 %v5439_v25, %v7063_v55  ;;  %v5385_v39 = vunpack.i.h.bf16 %v7143_v50  ;;  %v7312_v1 = vpop.permute.xlu2 %5467 }
 0x15d   : > { %9686 = vst [vmem:[#allocation16_spill] sm:$0xff] %v7278_v26  ;;  %v7288_v46 = vmul.f32 %v9687_v24, %v7117_v4  ;;  %v2974_v24 = vunpack.c.l.bf16 %v7272_v5  ;;  %v7309_v30 = vmul.f32 %v5439_v25, %v7117_v4  ;;  %v9373_v0 = vrot.slane %v7296_v18, 1  ;;  %v4657_v26 = vld [vmem:[%s5821_s17 + $0x2c] sm:$0x1] }
 0x15e   : > { %v7304_v23 = vsel %vm899_vm0, %v9371_v49, %v2143_v59  ;;  %v2693_v20 = vunpack.c.l.bf16 %v4649_v17  ;;  %v2694_v36 = vunpack.c.h.bf16 %v4649_v17  ;;  %v7315_v41 = vmul.f32 %v5390_v3, %v7117_v4 }
 0x15f   : > { %9688 = vst [vmem:[#allocation13_spill] sm:$0xff] %v7288_v46  ;;  %v2040_v40 = vmul.f32 %v5389_v54, %v7063_v55  ;;  %v5616_v59 = vpack.i.bf16 %v2974_v24, %v2973_v58  ;;  %v9372_v49 = vunpack.i.h.bf16 %v7190_v21  ;;  %v9689_v25 = vrot.slane %v7120_v28, 1  ;;  %v4660_v58 = vld [vmem:[%s5821_s17 + $0x38] sm:$0x1]  ;;  %v7344_v28 = vld [vmem:[%s5821_s17 + $0x3c] sm:$0xff]  }
 0x160   : > { %v5606_v17 = vpack.i.bf16 %v2694_v36, %v2693_v20  ;;  %v5404_v53 = vunpack.i.l.bf16 %v7190_v21  ;;  %v2039_v24 = vmul.f32 %v5385_v39, %v7063_v55  ;;  %v7349_v3 = vmul.f32 %v5385_v39, %v7117_v4 }
 0x161   : > { %v7325_v8 = vsel %vm899_vm0, %v9689_v25, %v9373_v0  ;;  %5617 = vperm.xlu2 %5070, %v5616_v59   ;;  %5612 = vperm.xlu1 %5059, %v6970_v51   ;;  %v2047_v36 = vmul.f32 %v9372_v49, %v7063_v55  ;;  %v2140_v33 = vrot.slane %v2040_v40, 1  ;;  %v5031_v25 = vld [vmem:[%s5821_s17 + $0x30] sm:$0xff]   ;;  %v5454_v54 = vunpack.i.l.bf16 %v7233_v63 }
 0x162   : > { %9690 = vst [vmem:[#allocation50_spill] sm:$0xff] %v7325_v8  ;;  %5607 = vperm.xlu0 %5048, %v5606_v17   ;;  %v2046_v20 = vmul.f32 %v5404_v53, %v7063_v55  ;;  %v7346_v17 = vpop.permute.xlu1 %5432  ;;  %v5455_v53 = vunpack.i.h.bf16 %v7233_v63  ;;  %v2138_v15 = vrot.slane %v2039_v24, 1  ;;  %v9692_v59 = vunpack.i.l.bf16 %v7208_v60  ;;  %v7360_v12 = vpop.permute.xlu0 %5427 }
 0x163   : > { %9691 = vst [vmem:[#allocation12_spill] sm:$0xff] %v7349_v3  ;;  %v2151_v49 = vrot.slane %v2047_v36, 1  ;;  %v2979_v40 = vunpack.c.l.bf16 %v4660_v58  ;;  %v9693_v39 = vunpack.i.l.bf16 %v7143_v50  ;;  %v2980_v63 = vunpack.c.l.bf16 %v7344_v28 }
 0x164   : > { %v2150_v0 = vrot.slane %v2046_v20, 1  ;;  %v7357_v51 = vmul.f32 %v9692_v59, %v7063_v55  ;;  %v5400_v20 = vunpack.i.h.bf16 %v7208_v60  ;;  %v4966_v59 = vunpack.c.l.bf16 %v5031_v25 }
 0x165   : > { %v7365_v62 = vmul.f32 %v9693_v39, %v7117_v4  ;;  %v7368_v36 = vsel %vm899_vm0, %v2151_v49, %v2153_v9  ;;  %v4967_v32 = vunpack.c.h.bf16 %v5031_v25  ;;  %v7377_v37 = vmul.f32 %v5455_v53, %v7063_v55  ;;  %v7380_v9 = vpop.permute.xlu2 %5482 }
 0x166   : > { %9695 = vst [vmem:[#allocation52_spill] sm:$0xff] %v7368_v36  ;;  %v7371_v24 = vsel %vm899_vm0, %v2150_v0, %v2151_v49  ;;  %v9376_v58 = vrot.slane %v7357_v51, 1  ;;  %v5631_v50 = vpack.i.bf16 %v2980_v63, %v2979_v40  ;;  %v2975_v39 = vunpack.c.h.bf16 %v7272_v5 }
 0x167   : > { %9694 = vst [vmem:[#allocation57_spill] sm:$0xff] %v7365_v62  ;;  %v2976_v56 = vunpack.c.l.bf16 %v4657_v26  ;;  %v7383_v0 = vmul.f32 %v5454_v54, %v7063_v55  ;;  %v7386_v49 = vmul.f32 %v5454_v54, %v7117_v4  ;;  %v9698_v36 = vrot.slane %v7185_v45, 1  ;;  %v5032_v45 = vld [vmem:[%s5821_s17 + $0x48] sm:$0xff]  }
 0x168   : > { %9696 = vst [vmem:[#allocation51_spill] sm:$0xff] %v7371_v24  ;;  %v5626_v53 = vpack.i.bf16 %v4967_v32, %v4966_v59  ;;  %v9700_v40 = vrot.slane %v7259_v29, 1  ;;  %v5420_v63 = vunpack.i.h.bf16 %v7263_v43  ;;  %v5419_v54 = vunpack.i.l.bf16 %v7263_v43 }
 0x169   : > { %9697 = vst [vmem:[#allocation47_spill] sm:$0xff] %v7386_v49  ;;  %v7393_v25 = vsel %vm899_vm0, %v9698_v36, %v9376_v58  ;;  %5632 = vperm.xlu2 %5070, %v5631_v50   ;;  %v5621_v26 = vpack.i.bf16 %v2976_v56, %v2975_v39  ;;  %v2045_v36 = vmul.f32 %v5400_v20, %v7063_v55  ;;  %v9378_v32 = vunpack.i.l.bf16 %v7283_v52  ;;  %v4663_v49 = vld [vmem:[%s5821_s17 + $0x44] sm:$0x1] }
 0x16a   : > { %9699 = vst [vmem:[#allocation29_spill] sm:$0xff] %v7393_v25  ;;  %v7398_v5 = vsel %vm899_vm0, %v2140_v33, %v9700_v40  ;;  %5627 = vperm.xlu1 %5059, %v5626_v53   ;;  %v9701_v33 = vrot.slane %v7296_v18, 1  ;;  %v9703_v56 = vunpack.i.h.bf16 %v7190_v21  ;;  %v2053_v59 = vmul.f32 %v5420_v63, %v7063_v55  ;;  %v4666_v40 = vld [vmem:[%s5821_s17 + $0x50] sm:$0x1]  ;;  %v7426_v21 = vld [vmem:[%s5821_s17 + $0x54] sm:$0xff]  }
 0x16b   : > { %5622 = vperm.xlu0 %5048, %v5621_v26   ;;  %v2052_v50 = vmul.f32 %v5419_v54, %v7063_v55  ;;  %v5470_v26 = vunpack.i.h.bf16 %v7312_v1  ;;  %v1672_v54 = vadd.f32 %v7115_v22, %v6773_v6  ;;  %v2148_v39 = vrot.slane %v2045_v36, 1 }
 0x16c   : > { %v7409_v29 = vsel %vm899_vm0, %v9701_v33, %v2138_v15  ;;  %v7414_v43 = vmul.f32 %v9703_v56, %v7117_v4  ;;  %v7422_v15 = vmul.f32 %v5400_v20, %v7117_v4  ;;  %v7428_v33 = vpop.permute.xlu1 %5447  ;;  %v2161_v56 = vrot.slane %v2053_v59, 1  ;;  %v7446_v59 = vpop.permute.xlu0 %5442 }
 0x16d   : > { %9702 = vst [vmem:[#allocation15_spill] sm:$0xff] %v7409_v29  ;;  %v2160_v24 = vrot.slane %v2052_v50, 1  ;;  %v9706_v18 = vunpack.i.l.bf16 %v7208_v60  ;;  %v5469_v20 = vunpack.i.l.bf16 %v7312_v1  ;;  %v7443_v58 = vmul.f32 %v9378_v32, %v7063_v55 }
 0x16e   : > { %9704 = vst [vmem:[#allocation45_spill] sm:$0xff] %v7414_v43  ;;  %v9708_v50 = vrot.slane %v7275_v16, 1  ;;  %v2985_v60 = vunpack.c.l.bf16 %v4666_v40  ;;  %v2986_v36 = vunpack.c.l.bf16 %v7426_v21  ;;  %v5415_v1 = vunpack.i.h.bf16 %v7283_v52 }
 0x16f   : > { %9705 = vst [vmem:[#allocation14_spill] sm:$0xff] %v7422_v15  ;;  %v7437_v53 = vmul.f32 %v9706_v18, %v7117_v4  ;;  %v7454_v22 = vsel %vm899_vm0, %v2160_v24, %v2161_v56  ;;  %v9379_v18 = vrot.slane %v7443_v58, 1  ;;  %v4970_v32 = vunpack.c.l.bf16 %v5032_v45 }
 0x170   : > { %v7451_v6 = vsel %vm899_vm0, %v2161_v56, %v9708_v50  ;;  %9710 = vst [vmem:[#allocation18_spill] sm:$0xff] %v7454_v22  ;;  %v4971_v25 = vunpack.c.h.bf16 %v5032_v45  ;;  %v7460_v42 = vmul.f32 %v5470_v26, %v7063_v55  ;;  %v5646_v2 = vpack.i.bf16 %v2986_v36, %v2985_v60 }
 0x171   : > { %9707 = vst [vmem:[#allocation44_spill] sm:$0xff] %v7437_v53  ;;  %v2981_v16 = vunpack.c.h.bf16 %v7344_v28  ;;  %v2982_v50 = vunpack.c.l.bf16 %v4663_v49  ;;  %v7466_v24 = vmul.f32 %v5469_v20, %v7063_v55  ;;  %v7469_v40 = vmul.f32 %v5469_v20, %v7117_v4 }
 0x172   : > { %9709 = vst [vmem:[#allocation21_spill] sm:$0xff] %v7451_v6  ;;  %v7463_v6 = vpop.permute.xlu2 %5497  ;;  %v9712_v56 = vrot.slane %v7202_v11, 1  ;;  %v5641_v26 = vpack.i.bf16 %v4971_v25, %v4970_v32  ;;  %v7477_v60 = vmul.f32 %v5420_v63, %v7117_v4  ;;  %5647 = vperm.xlu2 %5070, %v5646_v2   ;;  %v5435_v36 = vunpack.i.h.bf16 %v7346_v17 }
 0x173   : > { %9711 = vst [vmem:[#allocation54_spill] sm:$0xff] %v7469_v40  ;;  %v5636_v49 = vpack.i.bf16 %v2982_v50, %v2981_v16  ;;  %v2051_v11 = vmul.f32 %v5415_v1, %v7063_v55  ;;  %v5485_v25 = vunpack.i.h.bf16 %v7380_v9  ;;  %v9714_v32 = vrot.slane %v7357_v51, 1  ;;  %v4672_v50 = vld [vmem:[%s5821_s17 + $0x68] sm:$0x1] }
 0x174   : > { %v2157_v45 = vsel %vm899_vm0, %v9712_v56, %v9379_v18  ;;  %9713 = vst [vmem:[#allocation17_spill] sm:$0xff] %v7477_v60  ;;  %5642 = vperm.xlu1 %5059, %v5641_v26   ;;  %v9381_v16 = vunpack.i.l.bf16 %v7360_v12  ;;  %v5484_v51 = vunpack.i.l.bf16 %v7380_v9  ;;  %v7508_v22 = vmul.f32 %v5415_v1, %v7117_v4  ;;  %v4669_v56 = vld [vmem:[%s5821_s17 + $0x5c] sm:$0x1]  ;;  %v7525_v1 = vpop.permute.xlu0 %5457 }
 0x175   : > { %v7479_v28 = vadd.f32 %v2157_v45, %v1672_v54  ;;  %v7489_v63 = vsel %vm899_vm0, %v9714_v32, %v2148_v39  ;;  %5637 = vperm.xlu0 %5048, %v5636_v49   ;;  %v7493_v54 = vmul.f32 %v5435_v36, %v7063_v55  ;;  %v7502_v39 = vld [vmem:[%s5821_s17 + $0x6c] sm:$0xff]   ;;  %v7504_v32 = vpop.permute.xlu1 %5462  ;;  %v2158_v26 = vrot.slane %v2051_v11, 1 }
 0x176   : > { %9715 = vst [vmem:[#allocation53_spill] sm:$0xff] %v7489_v63  ;;  %v7514_v20 = vmul.f32 %v9381_v16, %v7063_v55  ;;  %v9716_v9 = vunpack.i.l.bf16 %v7283_v52  ;;  %v7523_v18 = vmul.f32 %v5485_v25, %v7063_v55  ;;  %v2991_v49 = vunpack.c.l.bf16 %v4672_v50 }
 0x177   : > { %v9717_v2 = vrot.slane %v7299_v14, 1  ;;  %v9718_v40 = vrot.slane %v7493_v54, 1  ;;  %v5434_v11 = vunpack.i.l.bf16 %v7346_v17  ;;  %v2992_v52 = vunpack.c.l.bf16 %v7502_v39 }
 0x178   : > { %v7520_v45 = vmul.f32 %v9716_v9, %v7117_v4  ;;  %v9389_v60 = vrot.slane %v7514_v20, 1  ;;  %v7538_v9 = vmul.f32 %v5484_v51, %v7063_v55  ;;  %v7541_v25 = vmul.f32 %v5484_v51, %v7117_v4  ;;  %v5034_v51 = vld [vmem:[%s5821_s17 + $0x78] sm:$0xff]  }
 0x179   : > { %v7532_v16 = vsel %vm899_vm0, %v9718_v40, %v9717_v2  ;;  %v2987_v50 = vunpack.c.h.bf16 %v7426_v21  ;;  %v2988_v14 = vunpack.c.l.bf16 %v4669_v56  ;;  %v7545_v15 = vmul.f32 %v5435_v36, %v7117_v4 }
 0x17a   : > { %9719 = vst [vmem:[#allocation58_spill] sm:$0xff] %v7541_v25  ;;  %v5430_v40 = vunpack.i.h.bf16 %v7360_v12  ;;  %v9720_v17 = vrot.slane %v7269_v61, 1  ;;  %v5661_v53 = vpack.i.bf16 %v2992_v52, %v2991_v49  ;;  %v7555_v63 = vpop.permute.xlu2 %5512  ;;  %v5450_v36 = vunpack.i.h.bf16 %v7428_v33  ;;  %v7583_v49 = vld [vmem:[%s5821_s17 + $0x84] sm:$0xff]  }
 0x17b   : > { %v5651_v21 = vpack.i.bf16 %v2988_v14, %v2987_v50  ;;  %v5449_v56 = vunpack.i.l.bf16 %v7428_v33  ;;  %v9722_v43 = vrot.slane %v7443_v58, 1  ;;  %v2058_v52 = vmul.f32 %v5434_v11, %v7063_v55 }
 0x17c   : > { %v7553_v2 = vsel %vm899_vm0, %v9720_v17, %v9389_v60  ;;  %5657 = vperm.xlu1 %5059, %v7110_v13   ;;  %5662 = vperm.xlu2 %5070, %v5661_v53   ;;  %v9391_v17 = vunpack.i.l.bf16 %v7446_v59  ;;  %v4678_v13 = vld [vmem:[%s5821_s17 + $0x80] sm:$0x1]  ;;  %v2065_v58 = vmul.f32 %v5450_v36, %v7063_v55  ;;  %v2057_v11 = vmul.f32 %v5430_v40, %v7063_v55 }
 0x17d   : > { %9721 = vst [vmem:[#allocation38_spill] sm:$0xff] %v7553_v2  ;;  %v7564_v61 = vsel %vm899_vm0, %v9722_v43, %v2158_v26  ;;  %5652 = vperm.xlu0 %5048, %v5651_v21   ;;  %v2064_v33 = vmul.f32 %v5449_v56, %v7063_v55  ;;  %v7587_v21 = vmul.f32 %v5430_v40, %v7117_v4  ;;  %v2997_v14 = vunpack.c.l.bf16 %v4678_v13  ;;  %v7589_v60 = vpop.permute.xlu1 %5477 }
 0x17e   : > { %v7580_v53 = vmul.f32 %v9391_v17, %v7063_v55  ;;  %v2181_v50 = vrot.slane %v2065_v58, 1  ;;  %v2170_v43 = vrot.slane %v2058_v52, 1  ;;  %v5500_v26 = vunpack.i.h.bf16 %v7463_v6  ;;  %v4675_v17 = vld [vmem:[%s5821_s17 + $0x74] sm:$0x1] }
 0x17f   : > { %9723 = vst [vmem:[#allocation20_spill] sm:$0xff] %v7587_v21  ;;  %v2180_v56 = vrot.slane %v2064_v33, 1  ;;  %v5445_v2 = vunpack.i.h.bf16 %v7446_v59  ;;  %v9724_v7 = vrot.slane %v7383_v0, 1  ;;  %v2998_v13 = vunpack.c.l.bf16 %v7583_v49  ;;  %v7604_v33 = vpop.permute.xlu0 %5472 }
 0x180   : > { %v9399_v25 = vrot.slane %v7580_v53, 1  ;;  %v4978_v58 = vunpack.c.l.bf16 %v5034_v51  ;;  %v2168_v52 = vrot.slane %v2057_v11, 1  ;;  %v9727_v3 = vunpack.i.l.bf16 %v7360_v12 }
 0x181   : > { %v7598_v46 = vsel %vm899_vm0, %v2181_v50, %v9724_v7  ;;  %v7601_v40 = vsel %vm899_vm0, %v2180_v56, %v2181_v50  ;;  %v9729_v0 = vrot.slane %v7291_v44, 1  ;;  %v4979_v50 = vunpack.c.h.bf16 %v5034_v51 }
 0x182   : > { %9725 = vst [vmem:[#allocation56_spill] sm:$0xff] %v7598_v46  ;;  %v7609_v62 = vmul.f32 %v9727_v3, %v7117_v4  ;;  %v5499_v56 = vunpack.i.l.bf16 %v7463_v6  ;;  %v5676_v46 = vpack.i.bf16 %v2998_v13, %v2997_v14  ;;  %v2994_v29 = vunpack.c.l.bf16 %v4675_v17  ;;  %v7625_v8 = vpop.permute.xlu2 %5527  ;;  %v4681_v13 = vld [vmem:[%s5821_s17 + $0x8c] sm:$0x1] }
 0x183   : > { %9726 = vst [vmem:[#allocation19_spill] sm:$0xff] %v7601_v40  ;;  %v7616_v7 = vsel %vm899_vm0, %v9729_v0, %v9399_v25  ;;  %v2993_v40 = vunpack.c.h.bf16 %v7502_v39  ;;  %v7621_v11 = vmul.f32 %v5500_v26, %v7117_v4  ;;  %v2063_v12 = vmul.f32 %v5445_v2, %v7063_v55 }
 0x184   : > { %9728 = vst [vmem:[#allocation64_spill] sm:$0xff] %v7609_v62  ;;  %v5671_v3 = vpack.i.bf16 %v4979_v50, %v4978_v58  ;;  %v5465_v19 = vunpack.i.h.bf16 %v7504_v32  ;;  %v9732_v44 = vrot.slane %v7493_v54, 1  ;;  %5677 = vperm.xlu2 %5070, %v5676_v46   ;;  %v9398_v17 = vunpack.i.l.bf16 %v7525_v1 }
 0x185   : > { %9730 = vst [vmem:[#allocation60_spill] sm:$0xff] %v7616_v7  ;;  %v5666_v39 = vpack.i.bf16 %v2994_v29, %v2993_v40  ;;  %v9733_v14 = vrot.slane %v7514_v20, 1  ;;  %v5515_v54 = vunpack.i.h.bf16 %v7555_v63  ;;  %v7645_v58 = vmul.f32 %v5499_v56, %v7117_v4  ;;  %v4684_v40 = vld [vmem:[%s5821_s17 + $0x98] sm:$0x1]  ;;  %v7675_v0 = vpop.permute.xlu1 %5492 }
 0x186   : > { %9731 = vst [vmem:[#allocation62_spill] sm:$0xff] %v7621_v11  ;;  %v7630_v51 = vsel %vm899_vm0, %v2170_v43, %v9732_v44  ;;  %5672 = vperm.xlu1 %5059, %v5671_v3   ;;  %v7642_v43 = vmul.f32 %v5465_v19, %v7063_v55  ;;  %v7648_v46 = vmul.f32 %v5450_v36, %v7117_v4  ;;  %v5514_v29 = vunpack.i.l.bf16 %v7555_v63  ;;  %v5035_v3 = vld [vmem:[%s5821_s17 + $0x90] sm:$0xff]  }
 0x187   : > { %v7637_v26 = vsel %vm899_vm0, %v9733_v14, %v2168_v52  ;;  %5667 = vperm.xlu0 %5048, %v5666_v39   ;;  %v7654_v20 = vmul.f32 %v9398_v17, %v7063_v55  ;;  %v7658_v52 = vld [vmem:[%s5821_s17 + $0x9c] sm:$0xff]   ;;  %v2178_v50 = vrot.slane %v2063_v12, 1  ;;  %v7662_v56 = vmul.f32 %v5445_v2, %v7117_v4 }
 0x188   : > { %9734 = vst [vmem:[#allocation59_spill] sm:$0xff] %v7637_v26  ;;  %v9400_v36 = vrot.slane %v7642_v43, 1  ;;  %v9737_v63 = vunpack.i.l.bf16 %v7446_v59  ;;  %v5464_v39 = vunpack.i.l.bf16 %v7504_v32  ;;  %v5460_v14 = vunpack.i.h.bf16 %v7525_v1 }
 0x189   : > { %9735 = vst [vmem:[#allocation34_spill] sm:$0xff] %v7648_v46  ;;  %v9404_v6 = vrot.slane %v7654_v20, 1  ;;  %v7678_v2 = vmul.f32 %v5515_v54, %v7117_v4  ;;  %v9740_v12 = vrot.slane %v7466_v24, 1  ;;  %v3004_v32 = vunpack.c.l.bf16 %v7658_v52 }
 0x18a   : > { %9736 = vst [vmem:[#allocation24_spill] sm:$0xff] %v7662_v56  ;;  %v7669_v44 = vmul.f32 %v9737_v63, %v7117_v4  ;;  %v3003_v63 = vunpack.c.l.bf16 %v4684_v40  ;;  %v7689_v17 = vmul.f32 %v5514_v29, %v7117_v4  ;;  %v7692_v25 = vmul.f32 %v5465_v19, %v7117_v4 }
 0x18b   : > { %9739 = vst [vmem:[#allocation23_spill] sm:$0xff] %v7678_v2  ;;  %v7685_v59 = vsel %vm899_vm0, %v9400_v36, %v9740_v12  ;;  %v9743_v54 = vrot.slane %v7377_v37, 1  ;;  %v4982_v7 = vunpack.c.l.bf16 %v5035_v3  ;;  %v7701_v12 = vpop.permute.xlu0 %5487  ;;  %v4983_v36 = vunpack.c.h.bf16 %v5035_v3 }
 0x18c   : > { %9738 = vst [vmem:[#allocation66_spill] sm:$0xff] %v7669_v44  ;;  %v5691_v40 = vpack.i.bf16 %v3004_v32, %v3003_v63  ;;  %v3000_v29 = vunpack.c.l.bf16 %v4681_v13  ;;  %v2496_v21 = vrot.slane %v7645_v58, 2  ;;  %v7706_v19 = vmul.f32 %v5464_v39, %v7063_v55  ;;  %v4690_v13 = vld [vmem:[%s5821_s17 + $0xb0] sm:$0x1]  ;;  %v7717_v58 = vpop.permute.xlu2 %5542 }
 0x18d   : > { %9741 = vst [vmem:[#allocation63_spill] sm:$0xff] %v7685_v59  ;;  %v7699_v24 = vsel %vm899_vm0, %v9743_v54, %v9404_v6  ;;  %v2999_v59 = vunpack.c.h.bf16 %v7583_v49  ;;  %v7709_v62 = vmul.f32 %v5460_v14, %v7063_v55  ;;  %v5480_v37 = vunpack.i.h.bf16 %v7589_v60 }
 0x18e   : > { %9742 = vst [vmem:[#allocation46_spill] sm:$0xff] %v7692_v25  ;;  %v7713_v54 = vmul.f32 %v5460_v14, %v7117_v4  ;;  %5692 = vperm.xlu2 %5070, %v5691_v40   ;;  %v5686_v63 = vpack.i.bf16 %v4983_v36, %v4982_v7  ;;  %v9405_v49 = vunpack.i.l.bf16 %v7604_v33  ;;  %v9744_v6 = vrot.slane %v7580_v53, 1  ;;  %v5036_v53 = vld [vmem:[%s5821_s17 + $0xa8] sm:$0xff]   ;;  %v7765_v25 = vpop.permute.xlu1 %5507 }
 0x18f   : > { %v5681_v3 = vpack.i.bf16 %v3000_v29, %v2999_v59  ;;  %v7727_v14 = vmul.f32 %v5480_v37, %v7063_v55  ;;  %v7734_v29 = vld [vmem:[%s5821_s17 + $0xb4] sm:$0xff]   ;;  %v3009_v39 = vunpack.c.l.bf16 %v4690_v13  ;;  %v5530_v36 = vunpack.i.h.bf16 %v7625_v8 }
 0x190   : > { %v7724_v26 = vsel %vm899_vm0, %v9744_v6, %v2178_v50  ;;  %5687 = vperm.xlu1 %5059, %v5686_v63   ;;  %v2190_v6 = vrot.slane %v7706_v19, 1  ;;  %v2188_v50 = vrot.slane %v7709_v62, 1  ;;  %v5479_v59 = vunpack.i.l.bf16 %v7589_v60  ;;  %v4651_v19 = vld [vmem:[%s9313_s1 + $0x6] sm:$0x1] }
 0x191   : > { %9745 = vst [vmem:[#allocation26_spill] sm:$0xff] %v7724_v26  ;;  %5682 = vperm.xlu0 %5048, %v5681_v3   ;;  %v9414_v32 = vrot.slane %v7727_v14, 1  ;;  %v7746_v63 = vmul.f32 %v9405_v49, %v7063_v55  ;;  %v4687_v3 = vld [vmem:[%s5821_s17 + $0xa4] sm:$0x1]  ;;  %v9746_v62 = vunpack.i.l.bf16 %v7525_v1  ;;  %v9747_v40 = vrot.slane %v7538_v9, 1 }
 0x192   : > { %v3010_v7 = vunpack.c.l.bf16 %v7734_v29  ;;  %v4986_v49 = vunpack.c.l.bf16 %v5036_v53  ;;  %v5529_v56 = vunpack.i.l.bf16 %v7625_v8  ;;  %v4987_v44 = vunpack.c.h.bf16 %v5036_v53 }
 0x193   : > { %v7755_v13 = vmul.f32 %v9746_v62, %v7117_v4  ;;  %v7762_v60 = vsel %vm899_vm0, %v9414_v32, %v9747_v40  ;;  %v2196_v2 = vrot.slane %v7746_v63, 1  ;;  %v3005_v1 = vunpack.c.h.bf16 %v7658_v52  ;;  %v7771_v40 = vpop.permute.xlu0 %5502 }
 0x194   : > { %v5475_v62 = vunpack.i.h.bf16 %v7604_v33  ;;  %v5706_v9 = vpack.i.bf16 %v3010_v7, %v3009_v39  ;;  %v3006_v26 = vunpack.c.l.bf16 %v4687_v3  ;;  %v2697_v46 = vunpack.c.l.bf16 %v4651_v19 }
 0x195   : > { %v7774_v32 = vmul.f32 %v5530_v36, %v7117_v4  ;;  %v2076_v11 = vmul.f32 %v5479_v59, %v7063_v55  ;;  %v9749_v8 = vrot.slane %v7460_v42, 1  ;;  %v5701_v53 = vpack.i.bf16 %v4987_v44, %v4986_v49  ;;  %v9750_v59 = vld [vmem:[#allocation67_spill] sm:$0xff] }
 0x196   : > { %5707 = vperm.xlu2 %5070, %v5706_v9   ;;  %v5696_v39 = vpack.i.bf16 %v3006_v26, %v3005_v1  ;;  %v7784_v7 = vperm.slane %v2697_v46, 0  ;;  %v5544_v3 = vunpack.i.l.bf16 %v7717_v58  ;;  %v2246_v36 = vadd.f32 %v7398_v5, %v6682_v35  ;;  %v4696_v1 = vld [vmem:[%s5821_s17 + $0xc8] sm:$0x1]  ;;  %v7804_v35 = vld [vmem:[%s5821_s17 + $0xcc] sm:$0xff]   ;;  %v7806_v5 = vpop.permute.xlu2 %5557 }
 0x197   : > { %9748 = vst [vmem:[#allocation25_spill] sm:$0xff] %v7774_v32  ;;  %v7782_v52 = vsel %vm899_vm0, %v9749_v8, %v2196_v2  ;;  %v7790_v19 = vmul.f32 %v5529_v56, %v7117_v4  ;;  %v2247_v42 = vadd.f32 %v7304_v23, %v9750_v59  ;;  %v9751_v8 = vrot.slane %v7315_v41, 2  ;;  %v4699_v32 = vld [vmem:[%s5821_s17 + $0xd4] sm:$0x1] }
 0x198   : > { %5702 = vperm.xlu1 %5059, %v5701_v53   ;;  %v9752_v26 = vrot.slane %v7199_v34, 2  ;;  %v7809_v56 = vmul.f32 %v5480_v37, %v7117_v4  ;;  %v2075_v23 = vmul.f32 %v5475_v62, %v7063_v55  ;;  %v9754_v34 = vrot.slane %v7642_v43, 1 }
 0x199   : > { %v2498_v44 = vsel %vm1256_vm1, %v2496_v21, %v9751_v8  ;;  %v9753_v46 = vmov %v9751_v8  ;;  %5697 = vperm.xlu0 %5048, %v5696_v39   ;;  %v2863_v21 = vmul.f32 %v5544_v3, %v7784_v7  ;;  %v7819_v53 = vmul.f32 %v5475_v62, %v7117_v4 }
 0x19a   : > { %v2500_v49 = vsel %vm1256_vm1, %v9753_v46, %v9752_v26  ;;  %v2602_v9 = vadd.f32 %v2498_v44, %v2246_v36  ;;  %v7816_v41 = vsel %vm899_vm0, %v2190_v6, %v9754_v34  ;;  %v5489_v8 = vunpack.i.l.bf16 %v7701_v12  ;;  %v4693_v36 = vld [vmem:[%s5821_s17 + $0xbc] sm:$0x1] }
 0x19b   : > { %v7821_v59 = vadd.f32 %v2500_v49, %v2247_v42  ;;  %v2200_v37 = vrot.slane %v2076_v11, 1  ;;  %v3015_v46 = vunpack.c.l.bf16 %v4696_v1  ;;  %v3016_v39 = vunpack.c.l.bf16 %v7804_v35 }
 0x19c   : > { %v7824_v26 = vadd.f32 %v2863_v21, %v2602_v9  ;;  %v9756_v3 = vrot.slane %v7654_v20, 1  ;;  %v2198_v11 = vrot.slane %v2075_v23, 1  ;;  %v7838_v49 = vmul.f32 %v5489_v8, %v7063_v55  ;;  %v7840_v9 = vpop.permute.xlu1 %5522 }
 0x19d   : > { %v5721_v1 = vpack.i.bf16 %v3016_v39, %v3015_v46  ;;  %v3011_v34 = vunpack.c.h.bf16 %v7734_v29  ;;  %v9758_v23 = vrot.slane %v7727_v14, 1  ;;  %v5545_v46 = vunpack.i.h.bf16 %v7717_v58  ;;  %v4704_v58 = vld [vmem:[%s5821_s17 + $0x3c] sm:$0xe] }
 0x19e   : > { %9755 = vst [vmem:[#allocation61_spill] sm:$0xff] %v7824_v26  ;;  %v7831_v43 = vsel %vm899_vm0, %v9756_v3, %v2188_v50  ;;  %v9757_v50 = vunpack.i.l.bf16 %v7604_v33  ;;  %v3012_v3 = vunpack.c.l.bf16 %v4693_v36  ;;  %v9416_v39 = vrot.slane %v7838_v49, 1  ;;  %v7857_v33 = vpop.permute.xlu0 %5517  ;;  %v4701_v36 = vld [vmem:[%s5821_s17 + $0x18] sm:$0xe] }
 0x19f   : > { %v7852_v62 = vsel %vm899_vm0, %v2200_v37, %v9758_v23  ;;  %5722 = vperm.xlu2 %5070, %v5721_v1   ;;  %v5560_v20 = vunpack.i.h.bf16 %v7806_v5  ;;  %v5494_v42 = vunpack.i.l.bf16 %v7675_v0  ;;  %v2253_v29 = vadd.f32 %v7564_v61, %v6755_v10  ;;  %v4703_v37 = vld [vmem:[%s5821_s17 + $0x30] sm:$0xe] }
 0x1a0   : > { %v7846_v21 = vmul.f32 %v9757_v50, %v7117_v4  ;;  %v5495_v50 = vunpack.i.h.bf16 %v7675_v0  ;;  %5717 = vperm.xlu1 %5059, %v7248_v48   ;;  %v5711_v14 = vpack.i.bf16 %v3012_v3, %v3011_v34  ;;  %v5490_v1 = vunpack.i.h.bf16 %v7701_v12 }
 0x1a1   : > { %v9759_v23 = vrot.slane %v7523_v18, 1  ;;  %v2870_v0 = vmul.f32 %v5560_v20, %v7784_v7  ;;  %v9760_v48 = vrot.slane %v7508_v22, 2  ;;  %v9761_v34 = vrot.slane %v7520_v45, 2 }
 0x1a2   : > { %v7884_v61 = vsel %vm899_vm0, %v2196_v2, %v2198_v11  ;;  %5712 = vperm.xlu0 %5048, %v5711_v14   ;;  %v5505_v3 = vunpack.i.h.bf16 %v7771_v40  ;;  %v2864_v20 = vmul.f32 %v5545_v46, %v7784_v7  ;;  %v3521_v22 = vunpack.c.l.bf16 %v4703_v37 }
 0x1a3   : > { %v7873_v44 = vsel %vm899_vm0, %v9759_v23, %v9416_v39  ;;  %v2515_v10 = vsel %vm1256_vm1, %v9761_v34, %v9760_v48  ;;  %v4702_v23 = vld [vmem:[%s5821_s17 + $0x24] sm:$0xe]  ;;  %v5573_v39 = vpop.permute.xlu2 %5572  ;;  %v3522_v6 = vunpack.c.l.bf16 %v4704_v58  ;;  %v3519_v26 = vunpack.c.l.bf16 %v4701_v36 }
 0x1a4   : > { %v2609_v18 = vadd.f32 %v2515_v10, %v2253_v29  ;;  %v7892_v48 = vmul.f32 %v5495_v50, %v7117_v4  ;;  %v7895_v2 = vmul.f32 %v5494_v42, %v7117_v4  ;;  %v2405_v11 = vmul.f32 %v5505_v3, %v7117_v4  ;;  %v4709_v3 = vld [vmem:[%s5821_s17 + $0x78] sm:$0xe] }
 0x1a5   : > { %v7901_v14 = vmul.f32 %v5490_v1, %v7063_v55  ;;  %v5736_v29 = vpack.i.bf16 %v3522_v6, %v3521_v22  ;;  %v3520_v34 = vunpack.c.l.bf16 %v4702_v23  ;;  %v3017_v46 = vunpack.c.h.bf16 %v7804_v35  ;;  %v7912_v6 = vpop.permute.xlu1 %5537  ;;  %v4710_v23 = vld [vmem:[%s5821_s17 + $0x84] sm:$0xe] }
 0x1a6   : > { %v7897_v63 = vadd.f32 %v2870_v0, %v2609_v18  ;;  %v7905_v37 = vmul.f32 %v5490_v1, %v7117_v4  ;;  %v2511_v50 = vrot.slane %v2405_v11, 2  ;;  %v3018_v58 = vunpack.c.l.bf16 %v4699_v32  ;;  %v7936_v11 = vpop.permute.xlu0 %5532 }
 0x1a7   : > { %v5575_v42 = vunpack.i.h.bf16 %v5573_v39  ;;  %v7908_v36 = vmul.f32 %v5489_v8, %v7117_v4  ;;  %5737 = vperm.xlu2 %5070, %v5736_v29   ;;  %v5731_v0 = vpack.i.bf16 %v3520_v34, %v3519_v26  ;;  %v5574_v10 = vunpack.i.l.bf16 %v5573_v39 }
 0x1a8   : > { %v2258_v55 = vadd.f32 %v7630_v51, %v6800_v27  ;;  %v9762_v35 = vrot.slane %v7520_v45, 2  ;;  %v5726_v1 = vpack.i.bf16 %v3018_v58, %v3017_v46  ;;  %v2259_v8 = vadd.f32 %v7532_v16, %v6802_v57  ;;  %v4707_v46 = vld [vmem:[%s5821_s17 + $0x60] sm:$0xe] }
 0x1a9   : > { %v2876_v32 = vmul.f32 %v5575_v42, %v7784_v7  ;;  %5732 = vperm.xlu1 %5059, %v5731_v0   ;;  %v9763_v27 = vrot.slane %v7545_v15, 2  ;;  %v9764_v45 = vrot.slane %v7689_v17, 2  ;;  %v9765_v39 = vrot.slane %v7309_v30, 2  ;;  %v4708_v42 = vld [vmem:[%s5821_s17 + $0x6c] sm:$0xe] }
 0x1aa   : > { %v2513_v18 = vsel %vm1256_vm1, %v2511_v50, %v9762_v35  ;;  %v2875_v16 = vmul.f32 %v5574_v10, %v7784_v7  ;;  %v2491_v29 = vrot.slane %v7892_v48, 2  ;;  %5727 = vperm.xlu0 %5048, %v5726_v1   ;;  %v2486_v30 = vrot.slane %v7895_v2, 2  ;;  %v4705_v0 = vld [vmem:[%s5821_s17 + $0x48] sm:$0xe]  ;;  %v4706_v48 = vld [vmem:[%s5821_s17 + $0x54] sm:$0xe] }
 0x1ab   : > { %v7923_v26 = vadd.f32 %v2513_v18, %v7479_v28  ;;  %v2528_v51 = vsel %vm1256_vm1, %v9764_v45, %v9763_v27  ;;  %v9766_v22 = vmov %v9763_v27  ;;  %v7939_v28 = vadd.f32 %v2864_v20, %v7821_v59 }
 0x1ac   : > { %v2530_v57 = vsel %vm1256_vm1, %v9766_v22, %v9765_v39  ;;  %v2614_v17 = vadd.f32 %v2528_v51, %v2258_v55  ;;  %v5520_v15 = vunpack.i.h.bf16 %v7857_v33  ;;  %v3527_v50 = vunpack.c.l.bf16 %v4709_v3  ;;  %v5588_v55 = vpop.permute.xlu2 %5587  ;;  %v9789_v3 = vld [vmem:[#allocation33_spill] sm:$0xff] }
 0x1ad   : > { %v2615_v34 = vadd.f32 %v2530_v57, %v2259_v8  ;;  %v3528_v58 = vunpack.c.l.bf16 %v4710_v23  ;;  %v2208_v10 = vrot.slane %v7901_v14, 1  ;;  %v3525_v8 = vunpack.c.l.bf16 %v4707_v46 }
 0x1ae   : > { %v7949_v20 = vadd.f32 %v2875_v16, %v2614_v17  ;;  %v2423_v2 = vmul.f32 %v5520_v15, %v7117_v4  ;;  %v5510_v23 = vunpack.i.h.bf16 %v7765_v25  ;;  %v3526_v27 = vunpack.c.l.bf16 %v4708_v42 }
 0x1af   : > { %v7951_v35 = vadd.f32 %v2876_v32, %v2615_v34  ;;  %v5751_v1 = vpack.i.bf16 %v3528_v58, %v3527_v50  ;;  %v3523_v45 = vunpack.c.l.bf16 %v4705_v0  ;;  %v5504_v51 = vunpack.i.l.bf16 %v7771_v40 }
 0x1b0   : > { %v2541_v39 = vrot.slane %v2423_v2, 2  ;;  %v3524_v32 = vunpack.c.l.bf16 %v4706_v48  ;;  %v5590_v22 = vunpack.i.h.bf16 %v5588_v55  ;;  %v5746_v57 = vpack.i.bf16 %v3526_v27, %v3525_v8  ;;  %v7972_v48 = vpop.permute.xlu1 %5552  ;;  %v9773_v27 = vld [vmem:[#allocation57_spill] sm:$0xff] }
 0x1b1   : > { %5752 = vperm.xlu2 %5070, %v5751_v1   ;;  %v5589_v16 = vunpack.i.l.bf16 %v5588_v55  ;;  %v2264_v17 = vadd.f32 %v7699_v24, %v6835_v38  ;;  %v2265_v34 = vadd.f32 %v7831_v43, %v6848_v47  ;;  %v9767_v50 = vrot.slane %v7755_v13, 2  ;;  %v9771_v13 = vld [vmem:[#allocation10_spill] sm:$0xff]  ;;  %v9772_v1 = vld [vmem:[#allocation15_spill] sm:$0xff] }
 0x1b2   : > { %v5741_v46 = vpack.i.bf16 %v3524_v32, %v3523_v45  ;;  %v2882_v15 = vmul.f32 %v5590_v22, %v7784_v7  ;;  %v9768_v40 = vrot.slane %v7713_v54, 2  ;;  %v5509_v38 = vunpack.i.l.bf16 %v7765_v25  ;;  %5747 = vperm.xlu1 %5059, %v5746_v57   ;;  %v9770_v54 = vld [vmem:[#allocation50_spill] sm:$0xff]  ;;  %v7984_v25 = vpop.permute.xlu0 %5547 }
 0x1b3   : > { %v2543_v58 = vsel %vm1256_vm1, %v2541_v39, %v9767_v50  ;;  %v9769_v42 = vmov %v9767_v50  ;;  %v2881_v43 = vmul.f32 %v5589_v16, %v7784_v7  ;;  %v5539_v55 = vunpack.i.l.bf16 %v7912_v6  ;;  %v9777_v16 = vld [vmem:[#allocation12_spill] sm:$0xff] }
 0x1b4   : > { %v2545_v0 = vsel %vm1256_vm1, %v9769_v42, %v9768_v40  ;;  %v2620_v47 = vadd.f32 %v2543_v58, %v2264_v17  ;;  %5742 = vperm.xlu0 %5048, %v5741_v46   ;;  %v2244_v2 = vadd.f32 %v9770_v54, %v6863_v31  ;;  %v2245_v8 = vadd.f32 %v9772_v1, %v9771_v13  ;;  %v4715_v46 = vld [vmem:[%s5821_s17 + $0xc0] sm:$0xe]  ;;  %v9780_v40 = vld [vmem:[#allocation13_spill] sm:$0xff]  ;;  %v9786_v1 = vld [vmem:[#allocation48_spill] sm:$0xff] }
 0x1b5   : > { %v2621_v24 = vadd.f32 %v2545_v0, %v2265_v34  ;;  %v9774_v45 = vrot.slane %v9773_v27, 2  ;;  %v2402_v32 = vmul.f32 %v5504_v51, %v7117_v4  ;;  %v9778_v31 = vrot.slane %v9777_v16, 2  ;;  %v4716_v0 = vld [vmem:[%s5821_s17 + $0xcc] sm:$0xe]  ;;  %v9785_v13 = vld [vmem:[#allocation41_spill] sm:$0xff]  ;;  %v9788_v16 = vld [vmem:[#allocation8_spill] sm:$0xff] }
 0x1b6   : > { %v7987_v22 = vadd.f32 %v2881_v43, %v2620_v47  ;;  %v2861_v58 = vmul.f32 %v5539_v55, %v7784_v7  ;;  %v9781_v51 = vrot.slane %v9780_v40, 2  ;;  %v9782_v47 = vld [vmem:[#allocation9_spill] sm:$0xff]  ;;  %v4713_v55 = vld [vmem:[%s5821_s17 + $0xa8] sm:$0xe]  ;;  %v4714_v27 = vld [vmem:[%s5821_s17 + $0xb4] sm:$0xe]  ;;  %v5603_v40 = vpop.permute.xlu2 %5602 }
 0x1b7   : > { %v2493_v39 = vsel %vm1256_vm1, %v2491_v29, %v9774_v45  ;;  %v7989_v57 = vadd.f32 %v2882_v15, %v2621_v24  ;;  %v9779_v17 = vmov %v9774_v45  ;;  %v8005_v15 = vmul.f32 %v5510_v23, %v7117_v4  ;;  %v4711_v45 = vld [vmem:[%s5821_s17 + $0x90] sm:$0xe]  ;;  %v9787_v23 = vld [vmem:[#allocation35_spill] sm:$0xff] }
 0x1b8   : > { %9775 = vst [vmem:[#allocation32_spill] sm:$0xff] %v7987_v22  ;;  %v2495_v34 = vsel %vm1256_vm1, %v9779_v17, %v9778_v31  ;;  %v2600_v50 = vadd.f32 %v2493_v39, %v2244_v2  ;;  %v2488_v42 = vsel %vm1256_vm1, %v2486_v30, %v9781_v51  ;;  %v9783_v24 = vrot.slane %v9782_v47, 2 }
 0x1b9   : > { %9776 = vst [vmem:[#allocation31_spill] sm:$0xff] %v7989_v57  ;;  %v7997_v29 = vadd.f32 %v2495_v34, %v2245_v8  ;;  %v9784_v43 = vmov %v9781_v51  ;;  %v5534_v2 = vunpack.i.l.bf16 %v7936_v11  ;;  %v2242_v8 = vadd.f32 %v9786_v1, %v9785_v13  ;;  %v4712_v34 = vld [vmem:[%s5821_s17 + $0x9c] sm:$0xe] }
 0x1ba   : > { %v2490_v54 = vsel %vm1256_vm1, %v9784_v43, %v9783_v24  ;;  %v8019_v30 = vmul.f32 %v5509_v38, %v7117_v4  ;;  %v8021_v39 = vadd.f32 %v2861_v58, %v2600_v50  ;;  %v2243_v31 = vadd.f32 %v9788_v16, %v9787_v23 }
 0x1bb   : > { %v3533_v17 = vunpack.c.l.bf16 %v4715_v46  ;;  %v2506_v51 = vrot.slane %v2402_v32, 2  ;;  %v2598_v47 = vadd.f32 %v2488_v42, %v2242_v8  ;;  %v2859_v24 = vmul.f32 %v5534_v2, %v7784_v7  ;;  %v5568_v42 = vpop.permute.xlu1 %5567  ;;  %v9790_v2 = vld [vmem:[#allocation30_spill] sm:$0xff] }
 0x1bc   : > { %v3534_v43 = vunpack.c.l.bf16 %v4716_v0  ;;  %v8027_v13 = vadd.f32 %v2490_v54, %v2243_v31  ;;  %v3531_v1 = vunpack.c.l.bf16 %v4713_v55  ;;  %v3532_v59 = vunpack.c.l.bf16 %v4714_v27  ;;  %v9793_v31 = vld [vmem:[#allocation58_spill] sm:$0xff] }
 0x1bd   : > { %v3529_v18 = vunpack.c.l.bf16 %v4711_v45  ;;  %v8029_v38 = vadd.f32 %v2859_v24, %v2598_v47  ;;  %v3530_v58 = vunpack.c.l.bf16 %v4712_v34  ;;  %v5605_v12 = vunpack.i.h.bf16 %v5603_v40  ;;  %v8049_v34 = vpop.permute.xlu0 %5562  ;;  %v9797_v47 = vld [vmem:[#allocation51_spill] sm:$0xff] }
 0x1be   : > { %v5766_v50 = vpack.i.bf16 %v3534_v43, %v3533_v17  ;;  %v5525_v23 = vunpack.i.h.bf16 %v7840_v9  ;;  %v5761_v46 = vpack.i.bf16 %v3532_v59, %v3531_v1  ;;  %v5604_v16 = vunpack.i.l.bf16 %v5603_v40  ;;  %v9796_v40 = vld [vmem:[#allocation11_spill] sm:$0xff]  ;;  %v9799_v43 = vld [vmem:[#allocation52_spill] sm:$0xff] }
 0x1bf   : > { %v2270_v32 = vadd.f32 %v7852_v62, %v9789_v3  ;;  %v5756_v0 = vpack.i.bf16 %v3530_v58, %v3529_v18  ;;  %v2888_v54 = vmul.f32 %v5605_v12, %v7784_v7  ;;  %v2271_v8 = vadd.f32 %v7762_v60, %v9790_v2  ;;  %v9801_v58 = vld [vmem:[#allocation45_spill] sm:$0xff] }
 0x1c0   : > { %5767 = vperm.xlu2 %5070, %v5766_v50   ;;  %v9791_v55 = vrot.slane %v7809_v56, 2  ;;  %v9792_v27 = vrot.slane %v7790_v19, 2  ;;  %v5524_v59 = vunpack.i.l.bf16 %v7840_v9  ;;  %5762 = vperm.xlu1 %5059, %v5761_v46   ;;  %v9794_v17 = vrot.slane %v9793_v31, 2  ;;  %v9798_v9 = vld [vmem:[#allocation5_spill] sm:$0xff] }
 0x1c1   : > { %v2887_v12 = vmul.f32 %v5604_v16, %v7784_v7  ;;  %5757 = vperm.xlu0 %5048, %v5756_v0   ;;  %v5554_v19 = vunpack.i.l.bf16 %v7972_v48  ;;  %v2250_v24 = vadd.f32 %v9797_v47, %v9796_v40  ;;  %v2251_v1 = vadd.f32 %v9799_v43, %v9798_v9  ;;  %v8078_v47 = vpop.permute.xlu2 %5617 }
 0x1c2   : > { %v2558_v45 = vsel %vm1256_vm1, %v9792_v27, %v9791_v55  ;;  %v9795_v62 = vmov %v9791_v55  ;;  %v5519_v50 = vunpack.i.l.bf16 %v7857_v33  ;;  %v9802_v46 = vrot.slane %v9801_v58, 2 }
 0x1c3   : > { %v2560_v18 = vsel %vm1256_vm1, %v9795_v62, %v9794_v17  ;;  %v2626_v3 = vadd.f32 %v2558_v45, %v2270_v32  ;;  %v9803_v32 = vld [vmem:[#allocation43_spill] sm:$0xff]  ;;  %v2867_v31 = vmul.f32 %v5554_v19, %v7784_v7  ;;  %v2521_v33 = vrot.slane %v8005_v15, 2  ;;  %v9807_v62 = vld [vmem:[#allocation28_spill] sm:$0xff]  ;;  %v9813_v19 = vld [vmem:[#allocation62_spill] sm:$0xff] }
 0x1c4   : > { %v2627_v60 = vadd.f32 %v2560_v18, %v2271_v8  ;;  %v2508_v16 = vsel %vm1256_vm1, %v2506_v51, %v9802_v46  ;;  %v9804_v2 = vrot.slane %v9803_v32, 2  ;;  %v9805_v0 = vmov %v9802_v46  ;;  %v9808_v18 = vld [vmem:[#allocation29_spill] sm:$0xff] }
 0x1c5   : > { %v8057_v56 = vadd.f32 %v2887_v12, %v2626_v3  ;;  %v2606_v27 = vadd.f32 %v2508_v16, %v2250_v24  ;;  %v5549_v17 = vunpack.i.l.bf16 %v7984_v25  ;;  %v2248_v51 = vadd.f32 %v9808_v18, %v9807_v62  ;;  %v9809_v3 = vld [vmem:[#allocation4_spill] sm:$0xff]  ;;  %v9810_v12 = vld [vmem:[#allocation53_spill] sm:$0xff] }
 0x1c6   : > { %v2510_v8 = vsel %vm1256_vm1, %v9805_v0, %v9804_v2  ;;  %v8067_v55 = vadd.f32 %v2888_v54, %v2627_v60  ;;  %v2249_v40 = vadd.f32 %v9810_v12, %v9809_v3  ;;  %v8081_v54 = vmul.f32 %v5525_v23, %v7117_v4  ;;  %v9811_v24 = vld [vmem:[#allocation44_spill] sm:$0xff] }
 0x1c7   : > { %9800 = vst [vmem:[#allocation67_spill] sm:$0xff] %v8057_v56  ;;  %v8069_v45 = vadd.f32 %v2510_v8, %v2251_v1  ;;  %v8083_v60 = vadd.f32 %v2867_v31, %v2606_v27  ;;  %v9812_v9 = vrot.slane %v9811_v24, 2  ;;  %v9814_v43 = vrot.slane %v9813_v19, 2  ;;  %v9815_v1 = vld [vmem:[#allocation14_spill] sm:$0xff] }
 0x1c8   : > { %9806 = vst [vmem:[#allocation50_spill] sm:$0xff] %v8067_v55  ;;  %v9816_v58 = vrot.slane %v9815_v1, 2  ;;  %v8096_v32 = vmul.f32 %v5524_v59, %v7117_v4  ;;  %v2865_v0 = vmul.f32 %v5549_v17, %v7784_v7  ;;  %v9818_v8 = vrot.slane %v7838_v49, 1  ;;  %v4700_v49 = vld [vmem:[%s9313_s1 + $0x7] sm:$0x1]  ;;  %v5583_v17 = vpop.permute.xlu1 %5582 }
 0x1c9   : > { %v2503_v15 = vsel %vm1256_vm1, %v9814_v43, %v9812_v9  ;;  %v9817_v46 = vmov %v9812_v9  ;;  %v9819_v31 = vunpack.i.l.bf16 %v7806_v5  ;;  %v2516_v59 = vrot.slane %v8019_v30, 2  ;;  %v9821_v24 = vld [vmem:[#allocation38_spill] sm:$0xff]  ;;  %v9822_v9 = vld [vmem:[#allocation7_spill] sm:$0xff]  ;;  %v9824_v43 = vld [vmem:[#allocation64_spill] sm:$0xff] }
 0x1ca   : > { %v2505_v16 = vsel %vm1256_vm1, %v9817_v46, %v9816_v58  ;;  %v2604_v2 = vadd.f32 %v2503_v15, %v2248_v51  ;;  %v8106_v27 = vsel %vm899_vm0, %v9818_v8, %v2208_v10  ;;  %v2420_v18 = vmul.f32 %v5519_v50, %v7117_v4  ;;  %v9823_v4 = vld [vmem:[#allocation59_spill] sm:$0xff]  ;;  %v5578_v58 = vpop.permute.xlu0 %5577  ;;  %v9849_v56 = vld [vmem:[#allocation2_spill] sm:$0xff] }
 0x1cb   : > { %v8098_v23 = vadd.f32 %v2505_v16, %v2249_v40  ;;  %v8111_v62 = vmul.f32 %v9819_v31, %v7784_v7  ;;  %v5540_v51 = vunpack.i.h.bf16 %v7912_v6  ;;  %v5570_v14 = vunpack.i.h.bf16 %v5568_v42  ;;  %v9820_v40 = vld [vmem:[#allocation27_spill] sm:$0xff] }
 0x1cc   : > { %v8116_v3 = vadd.f32 %v2865_v0, %v2604_v2  ;;  %v5569_v10 = vunpack.i.l.bf16 %v5568_v42  ;;  %v5535_v5 = vunpack.i.h.bf16 %v7936_v11  ;;  %v2256_v30 = vadd.f32 %v9821_v24, %v9820_v40  ;;  %v4717_v11 = vld [vmem:[%s9313_s1 + $0x8] sm:$0x1]  ;;  %v9826_v2 = vld [vmem:[#allocation20_spill] sm:$0xff] }
 0x1cd   : > { %v2257_v50 = vadd.f32 %v9823_v4, %v9822_v9  ;;  %v2874_v19 = vmul.f32 %v5570_v14, %v7784_v7  ;;  %v9825_v15 = vrot.slane %v9824_v43, 2  ;;  %v2536_v46 = vrot.slane %v2420_v18, 2  ;;  %v9831_v18 = vld [vmem:[#allocation16_spill] sm:$0xff] }
 0x1ce   : > { %v2873_v42 = vmul.f32 %v5569_v10, %v7784_v7  ;;  %v3021_v16 = vunpack.c.l.bf16 %v4700_v49  ;;  %v9827_v0 = vrot.slane %v9826_v2, 2  ;;  %v2862_v40 = vmul.f32 %v5540_v51, %v7784_v7 }
 0x1cf   : > { %v2523_v1 = vsel %vm1256_vm1, %v2521_v33, %v9825_v15  ;;  %v9828_v8 = vmov %v9825_v15  ;;  %v9829_v33 = vld [vmem:[#allocation17_spill] sm:$0xff]  ;;  %v9832_v49 = vrot.slane %v9831_v18, 2  ;;  %v2860_v2 = vmul.f32 %v5535_v5, %v7784_v7 }
 0x1d0   : > { %v2525_v31 = vsel %vm1256_vm1, %v9828_v8, %v9827_v0  ;;  %v2612_v14 = vadd.f32 %v2523_v1, %v2256_v30  ;;  %v9830_v9 = vrot.slane %v9829_v33, 2  ;;  %v5555_v43 = vunpack.i.h.bf16 %v7972_v48  ;;  %v9835_v8 = vld [vmem:[#allocation18_spill] sm:$0xff]  ;;  %v9836_v18 = vld [vmem:[#allocation65_spill] sm:$0xff] }
 0x1d1   : > { %v2613_v24 = vadd.f32 %v2525_v31, %v2257_v50  ;;  %v5550_v0 = vunpack.i.h.bf16 %v7984_v25  ;;  %v3537_v51 = vunpack.c.l.bf16 %v4717_v11  ;;  %v5564_v1 = vunpack.i.l.bf16 %v8049_v34  ;;  %v9837_v48 = vld [vmem:[#allocation21_spill] sm:$0xff] }
 0x1d2   : > { %v2518_v10 = vsel %vm1256_vm1, %v2516_v59, %v9830_v9  ;;  %v9833_v4 = vmov %v9830_v9  ;;  %v8153_v30 = vadd.f32 %v2873_v42, %v2612_v14  ;;  %v9834_v59 = vld [vmem:[#allocation6_spill] sm:$0xff]  ;;  %v8160_v9 = vpop.permute.xlu2 %5632  ;;  %v8162_v33 = vperm.slane %v3021_v16, 0  ;;  %v9838_v14 = vld [vmem:[#allocation49_spill] sm:$0xff] }
 0x1d3   : > { %v2520_v15 = vsel %vm1256_vm1, %v9833_v4, %v9832_v49  ;;  %v8155_v50 = vadd.f32 %v2874_v19, %v2613_v24  ;;  %v2254_v31 = vadd.f32 %v9835_v8, %v9834_v59  ;;  %v5620_v5 = vunpack.i.h.bf16 %v8078_v47  ;;  %v9839_v24 = vld [vmem:[#allocation19_spill] sm:$0xff] }
 0x1d4   : > { %v2255_v49 = vadd.f32 %v9837_v48, %v9836_v18  ;;  %v5585_v25 = vunpack.i.h.bf16 %v5583_v17  ;;  %v2871_v11 = vmul.f32 %v5564_v1, %v7784_v7  ;;  %v5584_v19 = vunpack.i.l.bf16 %v5583_v17  ;;  %v9841_v1 = vld [vmem:[#allocation56_spill] sm:$0xff] }
 0x1d5   : > { %v2610_v42 = vadd.f32 %v2518_v10, %v2254_v31  ;;  %v2262_v4 = vadd.f32 %v9839_v24, %v9838_v14  ;;  %v8171_v6 = vadd.f32 %v2862_v40, %v7997_v29  ;;  %v8174_v59 = vadd.f32 %v2860_v2, %v8027_v13  ;;  %v9840_v10 = vld [vmem:[#allocation3_spill] sm:$0xff]  ;;  %v9842_v31 = vld [vmem:[#allocation34_spill] sm:$0xff]  ;;  %v5598_v29 = vpop.permute.xlu1 %5597 }
 0x1d6   : > { %v2868_v16 = vmul.f32 %v5555_v43, %v7784_v7  ;;  %v8177_v8 = vadd.f32 %v2520_v15, %v2255_v49  ;;  %v2866_v18 = vmul.f32 %v5550_v0, %v7784_v7  ;;  %v2263_v17 = vadd.f32 %v9841_v1, %v9840_v10  ;;  %v9844_v43 = vld [vmem:[#allocation47_spill] sm:$0xff]  ;;  %v9847_v1 = vld [vmem:[#allocation37_spill] sm:$0xff] }
 0x1d7   : > { %v8180_v48 = vadd.f32 %v2871_v11, %v2610_v42  ;;  %v9843_v12 = vrot.slane %v9842_v31, 2  ;;  %v8187_v40 = vperm.slane %v3537_v51, 0  ;;  %v8190_v13 = vmul.f32 %v5620_v5, %v8162_v33  ;;  %v9848_v5 = vld [vmem:[#allocation60_spill] sm:$0xff]  ;;  %v9851_v31 = vld [vmem:[#allocation66_spill] sm:$0xff] }
 0x1d8   : > { %v5619_v15 = vunpack.i.l.bf16 %v8078_v47  ;;  %v2880_v2 = vmul.f32 %v5585_v25, %v7784_v7  ;;  %v9845_v0 = vrot.slane %v9844_v43, 2  ;;  %v2879_v24 = vmul.f32 %v5584_v19, %v7784_v7  ;;  %v9850_v47 = vld [vmem:[#allocation26_spill] sm:$0xff] }
 0x1d9   : > { %v2538_v14 = vsel %vm1256_vm1, %v2536_v46, %v9843_v12  ;;  %v9846_v49 = vmov %v9843_v12  ;;  %v5580_v12 = vunpack.i.h.bf16 %v5578_v58  ;;  %v5593_v46 = vpop.permute.xlu0 %5592  ;;  %v5579_v10 = vunpack.i.l.bf16 %v5578_v58 }
 0x1da   : > { %v2540_v42 = vsel %vm1256_vm1, %v9846_v49, %v9845_v0  ;;  %v2618_v11 = vadd.f32 %v2538_v14, %v2262_v4  ;;  %v2260_v55 = vadd.f32 %v9848_v5, %v9847_v1  ;;  %v2261_v57 = vadd.f32 %v9850_v47, %v9849_v56  ;;  %v9853_v0 = vld [vmem:[#allocation23_spill] sm:$0xff]  ;;  %v9855_v14 = vld [vmem:[#allocation24_spill] sm:$0xff]  ;;  %v8226_v5 = vpop.permute.xlu2 %5647 }
 0x1db   : > { %v2619_v51 = vadd.f32 %v2540_v42, %v2263_v17  ;;  %v2878_v43 = vmul.f32 %v5580_v12, %v7784_v7  ;;  %v9852_v22 = vrot.slane %v9851_v31, 2  ;;  %v9854_v4 = vrot.slane %v9853_v0, 2 }
 0x1dc   : > { %v8204_v25 = vadd.f32 %v2879_v24, %v2618_v11  ;;  %v9856_v49 = vrot.slane %v9855_v14, 2  ;;  %v2877_v11 = vmul.f32 %v5579_v10, %v7784_v7  ;;  %v8221_v24 = vadd.f32 %v2868_v16, %v8069_v45 }
 0x1dd   : > { %v2533_v19 = vsel %vm1256_vm1, %v9854_v4, %v9852_v22  ;;  %v9857_v58 = vmov %v9852_v22  ;;  %v8217_v42 = vadd.f32 %v2880_v2, %v2619_v51  ;;  %v8224_v12 = vadd.f32 %v2866_v18, %v8098_v23  ;;  %v9858_v2 = vld [vmem:[#allocation36_spill] sm:$0xff]  ;;  %v9862_v4 = vld [vmem:[#allocation46_spill] sm:$0xff] }
 0x1de   : > { %v2535_v17 = vsel %vm1256_vm1, %v9857_v58, %v9856_v49  ;;  %v2616_v1 = vadd.f32 %v2533_v19, %v2260_v55  ;;  %v5600_v22 = vunpack.i.h.bf16 %v5598_v29  ;;  %v5599_v47 = vunpack.i.l.bf16 %v5598_v29 }
 0x1df   : > { %v2617_v56 = vadd.f32 %v2535_v17, %v2261_v57  ;;  %v2268_v55 = vadd.f32 %v7782_v52, %v9858_v2  ;;  %v9859_v57 = vld [vmem:[#allocation39_spill] sm:$0xff]  ;;  %v8238_v16 = vmul.f32 %v5619_v15, %v8162_v33  ;;  %v8241_v23 = vmul.f32 %v5619_v15, %v8187_v40 }
 0x1e0   : > { %v8228_v0 = vadd.f32 %v2877_v11, %v2616_v1  ;;  %v2269_v51 = vadd.f32 %v7884_v61, %v9859_v57  ;;  %v5565_v18 = vunpack.i.h.bf16 %v8049_v34  ;;  %v2886_v29 = vmul.f32 %v5600_v22, %v7784_v7  ;;  %v9867_v22 = vld [vmem:[#allocation54_spill] sm:$0xff] }
 0x1e1   : > { %v8230_v31 = vadd.f32 %v2878_v43, %v2617_v56  ;;  %v9860_v10 = vrot.slane %v7846_v21, 2  ;;  %v9861_v43 = vrot.slane %v8081_v54, 2  ;;  %v2885_v61 = vmul.f32 %v5599_v47, %v7784_v7  ;;  %v5613_v56 = vpop.permute.xlu1 %5612 }
 0x1e2   : > { %v9863_v19 = vrot.slane %v9862_v4, 2  ;;  %v9864_v14 = vrot.slane %v8096_v32, 2  ;;  %v5635_v49 = vunpack.i.h.bf16 %v8160_v9  ;;  %v5634_v34 = vunpack.i.l.bf16 %v8160_v9 }
 0x1e3   : > { %v2553_v52 = vsel %vm1256_vm1, %v9861_v43, %v9860_v10  ;;  %v9865_v58 = vrot.slane %v7819_v53, 2  ;;  %v9866_v17 = vmov %v9860_v10  ;;  %v9868_v47 = vrot.slane %v9867_v22, 2  ;;  %v9870_v53 = vld [vmem:[#allocation22_spill] sm:$0xff] }
 0x1e4   : > { %v2548_v15 = vsel %vm1256_vm1, %v9864_v14, %v9863_v19  ;;  %v2624_v1 = vadd.f32 %v2553_v52, %v2268_v55  ;;  %v9869_v2 = vmov %v9863_v19  ;;  %v5595_v57 = vunpack.i.h.bf16 %v5593_v46  ;;  %v9871_v19 = vld [vmem:[#allocation40_spill] sm:$0xff]  ;;  %v9872_v14 = vld [vmem:[#allocation63_spill] sm:$0xff] }
 0x1e5   : > { %v2555_v54 = vsel %vm1256_vm1, %v9866_v17, %v9865_v58  ;;  %v2550_v32 = vsel %vm1256_vm1, %v9869_v2, %v9868_v47  ;;  %v5594_v10 = vunpack.i.l.bf16 %v5593_v46  ;;  %v2872_v43 = vmul.f32 %v5565_v18, %v7784_v7 }
 0x1e6   : > { %v2625_v11 = vadd.f32 %v2555_v54, %v2269_v51  ;;  %v8269_v9 = vadd.f32 %v2885_v61, %v2624_v1  ;;  %v2266_v21 = vadd.f32 %v7816_v41, %v9870_v53  ;;  %v2267_v55 = vadd.f32 %v9872_v14, %v9871_v19  ;;  %v5608_v51 = vpop.permute.xlu0 %5607 }
 0x1e7   : > { %v3362_v46 = vrot.slane %v8238_v16, 1  ;;  %v2884_v18 = vmul.f32 %v5595_v57, %v7784_v7  ;;  %v2883_v41 = vmul.f32 %v5594_v10, %v7784_v7  ;;  %v3718_v61 = vrot.slane %v8241_v23, 2  ;;  %v9874_v10 = vld [vmem:[#allocation55_spill] sm:$0xff] }
 0x1e8   : > { %v8283_v52 = vadd.f32 %v2886_v29, %v2625_v11  ;;  %v2622_v4 = vadd.f32 %v2548_v15, %v2266_v21  ;;  %v2623_v58 = vadd.f32 %v2550_v32, %v2267_v55  ;;  %v8289_v17 = vmul.f32 %v5635_v49, %v8162_v33  ;;  %v8307_v49 = vpop.permute.xlu2 %5662  ;;  %v9875_v21 = vld [vmem:[#allocation42_spill] sm:$0xff]  ;;  %v9877_v55 = vld [vmem:[#allocation25_spill] sm:$0xff] }
 0x1e9   : > { %v8292_v54 = vmul.f32 %v5634_v34, %v8162_v33  ;;  %v8295_v16 = vmul.f32 %v5634_v34, %v8187_v40  ;;  %v9873_v29 = vmov 0   ;;  %v5615_v1 = vunpack.i.h.bf16 %v5613_v56 }
 0x1ea   : > { %3934 = vst.msk [vmem:[%s8280_s11 + $0x14] sm:$0x1] %vm3930_vm2, %v9873_v29  ;;  %v8301_v23 = vadd.f32 %v2872_v43, %v8177_v8  ;;  %v8303_v15 = vadd.f32 %v2883_v41, %v2622_v4  ;;  %v8305_v11 = vadd.f32 %v2884_v18, %v2623_v58  ;;  %v5614_v22 = vunpack.i.l.bf16 %v5613_v56 }
 0x1eb   : > { %3931 = vst.msk [vmem:[%s8280_s11 + $0x8] sm:$0x1] %vm3930_vm2, %v9873_v29  ;;  %v5650_v34 = vunpack.i.h.bf16 %v8226_v5  ;;  %v5649_v47 = vunpack.i.l.bf16 %v8226_v5  ;;  %v3264_v2 = vmul.f32 %v5615_v1, %v8162_v33  ;;  %v8316_v8 = vmul.f32 %v5615_v1, %v8187_v40 }
 0x1ec   : > { %3937 = vst.msk [vmem:[%s8280_s11 + $0x20] sm:$0x1] %vm3930_vm2, %v9873_v29  ;;  %v3263_v32 = vmul.f32 %v5614_v22, %v8162_v33  ;;  %v5610_v56 = vunpack.i.h.bf16 %v5608_v51  ;;  %v5609_v57 = vunpack.i.l.bf16 %v5608_v51  ;;  %v2272_v43 = vadd.f32 %v7873_v44, %v9874_v10  ;;  %v8347_v22 = vpop.permute.xlu1 %5627 }
 0x1ed   : > { %3940 = vst.msk [vmem:[%s8280_s11 + $0x2c] sm:$0x1] %vm3930_vm2, %v9873_v29  ;;  %v3360_v5 = vrot.slane %v3264_v2, 1  ;;  %v9418_v53 = vrot.slane %v8316_v8, 2  ;;  %v2273_v19 = vadd.f32 %v8106_v27, %v9875_v21  ;;  %v9876_v14 = vrot.slane %v7908_v36, 2 }
 0x1ee   : > { %3943 = vst.msk [vmem:[%s8280_s11 + $0x38] sm:$0x1] %vm3930_vm2, %v9873_v29  ;;  %v9878_v18 = vrot.slane %v9877_v55, 2  ;;  %v3359_v4 = vrot.slane %v3263_v32, 1  ;;  %v2890_v44 = vmul.f32 %v5610_v56, %v7784_v7  ;;  %v9879_v51 = vrot.slane %v7905_v37, 2 }
 0x1ef   : > { %3946 = vst.msk [vmem:[%s8280_s11 + $0x44] sm:$0x1] %vm3930_vm2, %v9873_v29  ;;  %v9880_v58 = vmov %v9876_v14  ;;  %v8350_v2 = vmul.f32 %v5650_v34, %v8162_v33  ;;  %v3363_v32 = vsel %vm899_vm0, %v3360_v5, %v3362_v46  ;;  %v2889_v56 = vmul.f32 %v5609_v57, %v7784_v7  ;;  %v8363_v36 = vld [vmem:[%s9314_s2] ss:$0 sm:$0xff]  ;;  %v5623_v7 = vpop.permute.xlu0 %5622 }
 0x1f0   : > { %v2563_v41 = vsel %vm1256_vm1, %v9878_v18, %v9876_v14  ;;  %v2565_v1 = vsel %vm1256_vm1, %v9880_v58, %v9879_v51  ;;  %3949 = vst.msk [vmem:[%s8280_s11 + $0x50] sm:$0x1] %vm3930_vm2, %v9873_v29  ;;  %v8358_v37 = vmul.f32 %v5649_v47, %v8162_v33  ;;  %v3719_v34 = vsel %vm1256_vm1, %v9418_v53, %v3718_v61  ;;  %v8409_v58 = vpop.permute.xlu2 %5677 }
 0x1f1   : > { %v2628_v27 = vadd.f32 %v2563_v41, %v2272_v43  ;;  %v2629_v10 = vadd.f32 %v2565_v1, %v2273_v19  ;;  %v3361_v46 = vsel %vm899_vm0, %v3359_v4, %v3360_v5  ;;  %v3472_v43 = vadd.f32 %v3363_v32, %v8174_v59  ;;  %3952 = vst.msk [vmem:[%s8280_s11 + $0x5c] sm:$0x1] %vm3930_vm2, %v9873_v29  ;;  %v4721_v45 = vld [vmem:[%s8280_s11 + $0x14] sm:$0x1] }
 0x1f2   : > { %v8374_v57 = vadd.f32 %v3361_v46, %v8029_v38  ;;  %3955 = vst.msk [vmem:[%s8280_s11 + $0x68] sm:$0x1] %vm3930_vm2, %v9873_v29  ;;  %v5630_v61 = vunpack.i.h.bf16 %v8347_v22  ;;  %v8386_v59 = vmul.f32 %v5649_v47, %v8187_v40  ;;  %v5665_v14 = vunpack.i.h.bf16 %v8307_v49 }
 0x1f3   : > { %v8379_v21 = vadd.f32 %v2889_v56, %v2628_v27  ;;  %v8381_v19 = vadd.f32 %v2890_v44, %v2629_v10  ;;  %v3828_v38 = vadd.f32 %v3719_v34, %v3472_v43  ;;  %3958 = vst.msk [vmem:[%s8280_s11 + $0x74] sm:$0x1] %vm3930_vm2, %v9873_v29  ;;  %v5664_v55 = vunpack.i.l.bf16 %v8307_v49 }
 0x1f4   : > { %9881 = vst [vmem:[#allocation10_spill] sm:$0xff] %v8374_v57  ;;  %v8397_v18 = vmul.f32 %v5630_v61, %v8162_v33  ;;  %v8400_v41 = vmul.f32 %v5630_v61, %v8187_v40  ;;  %v5625_v47 = vunpack.i.h.bf16 %v5623_v7  ;;  %v3372_v4 = vrot.slane %v8292_v54, 1 }
 0x1f5   : > { %9882 = vst [vmem:[#allocation15_spill] sm:$0xff] %v8379_v21  ;;  %v3728_v44 = vrot.slane %v8295_v16, 2  ;;  %v3864_v49 = vadd.f32 %v8363_v36, %v3828_v38  ;;  %v8420_v10 = vmul.f32 %v5665_v14, %v8162_v33  ;;  %v5624_v34 = vunpack.i.l.bf16 %v5623_v7 }
 0x1f6   : > { %9883 = vst [vmem:[#allocation57_spill] sm:$0xff] %v8381_v19  ;;  %v9419_v54 = vrot.slane %v8397_v18, 1  ;;  %v9420_v16 = vrot.slane %v8400_v41, 2  ;;  %v3268_v27 = vmul.f32 %v5625_v47, %v8162_v33  ;;  %v8426_v46 = vmul.f32 %v5664_v55, %v8162_v33 }
 0x1f7   : > { %3961 = vst.msk [vmem:[%s8280_s11 + $0x80] sm:$0x1] %vm3930_vm2, %v9873_v29  ;;  %v3896_v56 = vmax.f32 %v3864_v49, 0.0  ;;  %v5680_v43 = vunpack.i.h.bf16 %v8409_v58  ;;  %v3624_v14 = vmul.f32 %v5625_v47, %v8187_v40  ;;  %v8437_v38 = vmul.f32 %v5664_v55, %v8187_v40 }
 0x1f8   : > { %3964 = vst.msk [vmem:[%s8280_s11 + $0x8c] sm:$0x1] %vm3930_vm2, %v9873_v29  ;;  %v3373_v61 = vsel %vm899_vm0, %v9419_v54, %v3372_v4  ;;  %v3267_v53 = vmul.f32 %v5624_v34, %v8162_v33  ;;  %v5679_v5 = vunpack.i.l.bf16 %v8409_v58  ;;  %v3729_v47 = vsel %vm1256_vm1, %v9420_v16, %v3728_v44 }
 0x1f9   : > { %3967 = vst.msk [vmem:[%s8280_s11 + $0x98] sm:$0x1] %vm3930_vm2, %v9873_v29  ;;  %v3984_v49 = vpack.c.bf16 %v3896_v56, %v3896_v56  ;;  %v3476_v7 = vadd.f32 %v3373_v61, %v7939_v28  ;;  %v3367_v4 = vrot.slane %v3268_v27, 1  ;;  %v8452_v55 = vmul.f32 %v5624_v34, %v8187_v40  ;;  %v5643_v56 = vpop.permute.xlu1 %5642 }
 0x1fa   : > { %3970 = vst.msk [vmem:[%s8280_s11 + $0xa4] sm:$0x1] %vm3930_vm2, %v9873_v29  ;;  %v8459_v58 = vmul.f32 %v5680_v43, %v8162_v33  ;;  %v3723_v54 = vrot.slane %v3624_v14, 2  ;;  %v3365_v32 = vrot.slane %v3267_v53, 1  ;;  %v5645_v1 = vunpack.i.h.bf16 %v5643_v56 }
 0x1fb   : > { %3973 = vst.msk [vmem:[%s8280_s11 + $0xb0] sm:$0x1] %vm3930_vm2, %v9873_v29  ;;  %v4027_v28 = vshrl.u32 %v3984_v49, 16  ;;  %v3832_v61 = vadd.f32 %v3729_v47, %v3476_v7  ;;  %v4030_v34 = vshll.u32 %v3984_v49, 16  ;;  %v8471_v7 = vmul.f32 %v5679_v5, %v8162_v33  ;;  %v5638_v47 = vpop.permute.xlu0 %5637 }
 0x1fc   : > { %3976 = vst.msk [vmem:[%s8280_s11 + $0xbc] sm:$0x1] %vm3930_vm2, %v9873_v29  ;;  %v5629_v43 = vunpack.i.l.bf16 %v8347_v22  ;;  %v9886_v53 = vrot.slane %v8190_v13, 1  ;;  %v3368_v49 = vsel %vm899_vm0, %v3365_v32, %v3367_v4  ;;  %v9888_v57 = vrot.slane %v8452_v55, 2 }
 0x1fd   : > { %3979 = vst.msk [vmem:[%s8280_s11 + $0xc8] sm:$0x1] %vm3930_vm2, %v9873_v29  ;;  %v4029_v27 = vrot.slane %v4027_v28, 7  ;;  %v3868_v16 = vadd.f32 %v8363_v36, %v3832_v61  ;;  %v3474_v21 = vadd.f32 %v3368_v49, %v8171_v6  ;;  %v3276_v13 = vmul.f32 %v5645_v1, %v8162_v33 }
 0x1fe   : > { %3982 = vst.msk [vmem:[%s8280_s11 + $0xd4] sm:$0x1] %vm3930_vm2, %v9873_v29  ;;  %v3366_v14 = vsel %vm899_vm0, %v9886_v53, %v3365_v32  ;;  %v3724_v22 = vsel %vm1256_vm1, %v9888_v57, %v3723_v54  ;;  %v8489_v53 = vmul.f32 %v5645_v1, %v8187_v40  ;;  %v8498_v57 = vmul.f32 %v5679_v5, %v8187_v40 }
 0x1ff   : > { %v8478_v28 = vor.u32 %v4030_v34, %v4029_v27  ;;  %v4034_v61 = vrot.slane %v4029_v27, 4  ;;  %v3900_v44 = vmax.f32 %v3868_v16, 0.0  ;;  %v8481_v19 = vadd.f32 %v3366_v14, %v8021_v39  ;;  %3938 = vst.msk [vmem:[%s8280_s11 + $0x24] sm:$0xf] %vm3927_vm5, %v9873_v29 }
 0x200   : > { %9889 = vst [vmem:[#allocation13_spill] sm:$0xff] %v8489_v53  ;;  %v5644_v16 = vunpack.i.l.bf16 %v5643_v56  ;;  %v5640_v27 = vunpack.i.h.bf16 %v5638_v47  ;;  %v3830_v39 = vadd.f32 %v3724_v22, %v3474_v21  ;;  %v3380_v6 = vrot.slane %v3276_v13, 1 }
 0x201   : > { %9887 = vst [vmem:[#allocation12_spill] sm:$0xff] %v8478_v28  ;;  %v4349_v32 = vsel %vm8465_vm4, %v4034_v61, %v4721_v45  ;;  %v8493_v4 = vpack.c.bf16 %v3900_v44, %v3900_v44  ;;  %v9421_v34 = vrot.slane %v8489_v53, 2  ;;  %v5639_v14 = vunpack.i.l.bf16 %v5638_v47 }
 0x202   : > { %4722 = vst [vmem:[%s8280_s11 + $0x14] sm:$0x1] %v4349_v32  ;;  %v3275_v54 = vmul.f32 %v5644_v16, %v8162_v33  ;;  %v3274_v45 = vmul.f32 %v5640_v27, %v8162_v33  ;;  %v3269_v44 = vmul.f32 %v5629_v43, %v8162_v33  ;;  %v3866_v56 = vadd.f32 %v8363_v36, %v3830_v39  ;;  %v4731_v43 = vld [vmem:[%s8280_s11 + $0x2c] sm:$0x1] }
 0x203   : > { %v4061_v1 = vshrl.u32 %v8493_v4, 16  ;;  %v9890_v21 = vrot.slane %v8358_v37, 1  ;;  %v3630_v61 = vmul.f32 %v5640_v27, %v8187_v40  ;;  %v9891_v5 = vrot.slane %v8386_v59, 2  ;;  %v8525_v59 = vpop.permute.xlu2 %5692  ;;  %3939 = vst.msk [vmem:[%s8280_s11 + $0x28] sm:$0xf] %vm3927_vm5, %v9873_v29 }
 0x204   : > { %v3379_v13 = vrot.slane %v3275_v54, 1  ;;  %v3898_v16 = vmax.f32 %v3866_v56, 0.0  ;;  %v3377_v39 = vrot.slane %v3274_v45, 1  ;;  %v8519_v37 = vmul.f32 %v5639_v14, %v8162_v33  ;;  %3941 = vst.msk [vmem:[%s8280_s11 + $0x30] sm:$0xf] %vm3927_vm5, %v9873_v29 }
 0x205   : > { %v3383_v49 = vsel %vm899_vm0, %v3380_v6, %v9890_v21  ;;  %v8509_v47 = vrot.slane %v4061_v1, 7  ;;  %v3739_v22 = vsel %vm1256_vm1, %v9421_v34, %v9891_v5  ;;  %v8522_v27 = vmul.f32 %v5639_v14, %v8187_v40  ;;  %v4726_v14 = vld [vmem:[%s8280_s11 + $0x20] sm:$0x1]  ;;  %3942 = vst.msk [vmem:[%s8280_s11 + $0x34] sm:$0xf] %vm3927_vm5, %v9873_v29 }
 0x206   : > { %v3480_v32 = vadd.f32 %v3383_v49, %v8221_v24  ;;  %v3381_v21 = vsel %vm899_vm0, %v3379_v13, %v3380_v6  ;;  %v3733_v54 = vrot.slane %v3630_v61, 2  ;;  %v3986_v34 = vpack.c.bf16 %v3898_v16, %v3898_v16  ;;  %3928 = vst.msk [vmem:[%s8280_s11] sm:$0xf] %vm3927_vm5, %v9873_v29 }
 0x207   : > { %v4068_v1 = vrot.slane %v8509_v47, 4  ;;  %v8529_v24 = vadd.f32 %v3381_v21, %v8083_v60  ;;  %v9423_v45 = vrot.slane %v8519_v37, 1  ;;  %v9424_v56 = vrot.slane %v8522_v27, 2  ;;  %3929 = vst.msk [vmem:[%s8280_s11 + $0x4] sm:$0xf] %vm3927_vm5, %v9873_v29 }
 0x208   : > { %v3836_v5 = vadd.f32 %v3739_v22, %v3480_v32  ;;  %v3392_v49 = vrot.slane %v8426_v46, 1  ;;  %v3369_v22 = vrot.slane %v3269_v44, 1  ;;  %v4044_v61 = vshrl.u32 %v3986_v34, 16  ;;  %v5658_v32 = vpop.permute.xlu1 %5657  ;;  %3932 = vst.msk [vmem:[%s8280_s11 + $0xc] sm:$0xf] %vm3927_vm5, %v9873_v29 }
 0x209   : > { %9892 = vst [vmem:[#allocation9_spill] sm:$0xff] %v8529_v24  ;;  %v4363_v53 = vsel %vm8465_vm4, %v4068_v1, %v4731_v43  ;;  %v5695_v60 = vunpack.i.h.bf16 %v8525_v59  ;;  %v3378_v13 = vsel %vm899_vm0, %v9423_v45, %v3377_v39  ;;  %v4047_v44 = vshll.u32 %v3986_v34, 16  ;;  %v5653_v34 = vpop.permute.xlu0 %5652 }
 0x20a   : > { %v3872_v6 = vadd.f32 %v8363_v36, %v3836_v5  ;;  %4732 = vst [vmem:[%s8280_s11 + $0x2c] sm:$0x1] %v4363_v53  ;;  %v3478_v43 = vadd.f32 %v3378_v13, %v8224_v12  ;;  %v4046_v5 = vrot.slane %v4044_v61, 7  ;;  %v3734_v53 = vsel %vm1256_vm1, %v9424_v56, %v3733_v54 }
 0x20b   : > { %v5660_v39 = vunpack.i.h.bf16 %v5658_v32  ;;  %v5659_v45 = vunpack.i.l.bf16 %v5658_v32  ;;  %v9893_v46 = vrot.slane %v8397_v18, 1  ;;  %v8557_v61 = vmul.f32 %v5695_v60, %v8162_v33  ;;  %3933 = vst.msk [vmem:[%s8280_s11 + $0x10] sm:$0xf] %vm3927_vm5, %v9873_v29 }
 0x20c   : > { %v3904_v21 = vmax.f32 %v3872_v6, 0.0  ;;  %v3834_v28 = vadd.f32 %v3734_v53, %v3478_v43  ;;  %v8554_v16 = vor.u32 %v4047_v44, %v4046_v5  ;;  %v4051_v12 = vrot.slane %v4046_v5, 4  ;;  %v8569_v44 = vpop.permute.xlu2 %5707  ;;  %3935 = vst.msk [vmem:[%s8280_s11 + $0x18] sm:$0xf] %vm3927_vm5, %v9873_v29 }
 0x20d   : > { %v3371_v6 = vsel %vm899_vm0, %v3369_v22, %v9893_v46  ;;  %v5694_v54 = vunpack.i.l.bf16 %v8525_v59  ;;  %v3282_v18 = vmul.f32 %v5660_v39, %v8162_v33  ;;  %v8565_v22 = vmul.f32 %v5660_v39, %v8187_v40  ;;  %3936 = vst.msk [vmem:[%s8280_s11 + $0x1c] sm:$0xf] %vm3927_vm5, %v9873_v29 }
 0x20e   : > { %v3992_v24 = vpack.c.bf16 %v3904_v21, %v3904_v21  ;;  %v3870_v43 = vadd.f32 %v8363_v36, %v3834_v28  ;;  %v4356_v32 = vsel %vm8465_vm4, %v4051_v12, %v4726_v14  ;;  %v3281_v46 = vmul.f32 %v5659_v45, %v8162_v33  ;;  %3944 = vst.msk [vmem:[%s8280_s11 + $0x3c] sm:$0xf] %vm3927_vm5, %v9873_v29 }
 0x20f   : > { %4727 = vst [vmem:[%s8280_s11 + $0x20] sm:$0x1] %v4356_v32  ;;  %v5655_v59 = vunpack.i.h.bf16 %v5653_v34  ;;  %v5654_v53 = vunpack.i.l.bf16 %v5653_v34  ;;  %v3390_v56 = vrot.slane %v3282_v18, 1  ;;  %v2901_v12 = vadd.f32 %v8111_v62, %v7923_v26 }
 0x210   : > { %v4095_v13 = vshrl.u32 %v3992_v24, 16  ;;  %v4098_v21 = vshll.u32 %v3992_v24, 16  ;;  %v3902_v5 = vmax.f32 %v3870_v43, 0.0  ;;  %v4741_v24 = vld [vmem:[%s8280_s11 + $0x44] sm:$0x1]  ;;  %v3389_v14 = vrot.slane %v3281_v46, 1 }
 0x211   : > { %v8581_v43 = vmul.f32 %v5694_v54, %v8162_v33  ;;  %v3393_v34 = vsel %vm899_vm0, %v3390_v56, %v3392_v49  ;;  %v3636_v18 = vmul.f32 %v5655_v59, %v8187_v40  ;;  %v9895_v46 = vld [vmem:[#allocation61_spill] sm:$0xff]  ;;  %3945 = vst.msk [vmem:[%s8280_s11 + $0x40] sm:$0xf] %vm3927_vm5, %v9873_v29 }
 0x212   : > { %v4097_v60 = vrot.slane %v4095_v13, 7  ;;  %v8577_v45 = vpack.c.bf16 %v3902_v5, %v3902_v5  ;;  %v3280_v13 = vmul.f32 %v5655_v59, %v8162_v33  ;;  %v3391_v32 = vsel %vm899_vm0, %v3389_v14, %v3390_v56  ;;  %v8599_v59 = vpop.permute.xlu1 %5672  ;;  %3947 = vst.msk [vmem:[%s8280_s11 + $0x48] sm:$0xf] %vm3927_vm5, %v9873_v29 }
 0x213   : > { %v8587_v28 = vadd.f32 %v3371_v6, %v9895_v46  ;;  %v3484_v49 = vadd.f32 %v3393_v34, %v8301_v23  ;;  %v3279_v5 = vmul.f32 %v5654_v53, %v8162_v33  ;;  %v8602_v6 = vmul.f32 %v5694_v54, %v8187_v40  ;;  %3948 = vst.msk [vmem:[%s8280_s11 + $0x4c] sm:$0xf] %vm3927_vm5, %v9873_v29 }
 0x214   : > { %v8575_v39 = vor.u32 %v4098_v21, %v4097_v60  ;;  %v4102_v1 = vrot.slane %v4097_v60, 4  ;;  %v4078_v62 = vshrl.u32 %v8577_v45, 16  ;;  %v8593_v21 = vadd.f32 %v3391_v32, %v8180_v48  ;;  %3950 = vst.msk [vmem:[%s8280_s11 + $0x54] sm:$0xf] %vm3927_vm5, %v9873_v29 }
 0x215   : > { %v3387_v56 = vrot.slane %v3280_v13, 1  ;;  %v9897_v48 = vrot.slane %v8565_v22, 2  ;;  %v8612_v32 = vmul.f32 %v5654_v53, %v8187_v40  ;;  %v4736_v13 = vld [vmem:[%s8280_s11 + $0x38] sm:$0x1]  ;;  %v3743_v46 = vrot.slane %v3636_v18, 2 }
 0x216   : > { %9894 = vst [vmem:[#allocation41_spill] sm:$0xff] %v8575_v39  ;;  %v4377_v26 = vsel %vm8465_vm4, %v4102_v1, %v4741_v24  ;;  %v8604_v14 = vrot.slane %v4078_v62, 7  ;;  %v9896_v1 = vrot.slane %v8437_v38, 2  ;;  %v4064_v54 = vshll.u32 %v8493_v4, 16 }
 0x217   : > { %4742 = vst [vmem:[%s8280_s11 + $0x44] sm:$0x1] %v4377_v26  ;;  %v3385_v26 = vrot.slane %v3279_v5, 1  ;;  %v5675_v60 = vunpack.i.h.bf16 %v8599_v59  ;;  %v9900_v4 = vrot.slane %v8289_v17, 1  ;;  %v9902_v17 = vrot.slane %v8612_v32, 2 }
 0x218   : > { %v3749_v24 = vsel %vm1256_vm1, %v9897_v48, %v9896_v1  ;;  %v4085_v62 = vrot.slane %v8604_v14, 4  ;;  %v5710_v1 = vunpack.i.h.bf16 %v8569_v44  ;;  %v9898_v48 = vrot.slane %v8350_v2, 1  ;;  %v5668_v2 = vpop.permute.xlu0 %5667  ;;  %3951 = vst.msk [vmem:[%s8280_s11 + $0x58] sm:$0xf] %vm3927_vm5, %v9873_v29 }
 0x219   : > { %v3840_v34 = vadd.f32 %v3749_v24, %v3484_v49  ;;  %v3388_v18 = vsel %vm899_vm0, %v3385_v26, %v3387_v56  ;;  %v9899_v49 = vrot.slane %v8519_v37, 1  ;;  %v5709_v56 = vunpack.i.l.bf16 %v8569_v44  ;;  %3953 = vst.msk [vmem:[%s8280_s11 + $0x60] sm:$0xf] %vm3927_vm5, %v9873_v29 }
 0x21a   : > { %v3386_v23 = vsel %vm899_vm0, %v9898_v48, %v3385_v26  ;;  %v4370_v24 = vsel %vm8465_vm4, %v4085_v62, %v4736_v13  ;;  %v3482_v39 = vadd.f32 %v3388_v18, %v7897_v63  ;;  %v3744_v26 = vsel %vm1256_vm1, %v9902_v17, %v3743_v46  ;;  %3954 = vst.msk [vmem:[%s8280_s11 + $0x64] sm:$0xf] %vm3927_vm5, %v9873_v29 }
 0x21b   : > { %v3876_v53 = vadd.f32 %v8363_v36, %v3840_v34  ;;  %v3376_v5 = vsel %vm899_vm0, %v9900_v4, %v9899_v49  ;;  %v8633_v38 = vadd.f32 %v3386_v23, %v2901_v12  ;;  %v8636_v34 = vpop.permute.xlu2 %5722  ;;  %4737 = vst [vmem:[%s8280_s11 + $0x38] sm:$0x1] %v4370_v24  ;;  %v8645_v49 = vor.u32 %v4064_v54, %v8509_v47 }
 0x21c   : > { %v3838_v12 = vadd.f32 %v3744_v26, %v3482_v39  ;;  %v8648_v23 = vmul.f32 %v5675_v60, %v8162_v33  ;;  %v8651_v63 = vmul.f32 %v5675_v60, %v8187_v40  ;;  %v8654_v13 = vadd.f32 %v3376_v5, %v8116_v3  ;;  %3956 = vst.msk [vmem:[%s8280_s11 + $0x6c] sm:$0xf] %vm3927_vm5, %v9873_v29 }
 0x21d   : > { %9901 = vst [vmem:[#allocation48_spill] sm:$0xff] %v8633_v38  ;;  %v3908_v37 = vmax.f32 %v3876_v53, 0.0  ;;  %v8657_v44 = vmul.f32 %v5710_v1, %v8162_v33  ;;  %v5670_v53 = vunpack.i.h.bf16 %v5668_v2  ;;  %v5669_v54 = vunpack.i.l.bf16 %v5668_v2 }
 0x21e   : > { %v3874_v46 = vadd.f32 %v8363_v36, %v3838_v12  ;;  %v3400_v47 = vrot.slane %v8648_v23, 1  ;;  %v9425_v39 = vrot.slane %v8651_v63, 2  ;;  %v8663_v18 = vmul.f32 %v5709_v56, %v8162_v33  ;;  %3957 = vst.msk [vmem:[%s8280_s11 + $0x70] sm:$0xf] %vm3927_vm5, %v9873_v29 }
 0x21f   : > { %v3996_v62 = vpack.c.bf16 %v3908_v37, %v3908_v37  ;;  %v8666_v60 = vmul.f32 %v5709_v56, %v8187_v40  ;;  %v3286_v1 = vmul.f32 %v5670_v53, %v8162_v33  ;;  %v9903_v5 = vrot.slane %v8471_v7, 1  ;;  %v4751_v7 = vld [vmem:[%s8280_s11 + $0x5c] sm:$0x1]  ;;  %3959 = vst.msk [vmem:[%s8280_s11 + $0x78] sm:$0xf] %vm3927_vm5, %v9873_v29 }
 0x220   : > { %v3906_v4 = vmax.f32 %v3874_v46, 0.0  ;;  %v5674_v37 = vunpack.i.l.bf16 %v8599_v59  ;;  %v3642_v2 = vmul.f32 %v5670_v53, %v8187_v40  ;;  %v9904_v12 = vrot.slane %v8498_v57, 2  ;;  %3960 = vst.msk [vmem:[%s8280_s11 + $0x7c] sm:$0xf] %vm3927_vm5, %v9873_v29 }
 0x221   : > { %v4129_v3 = vshrl.u32 %v3996_v62, 16  ;;  %v3403_v24 = vsel %vm899_vm0, %v3400_v47, %v9903_v5  ;;  %v4132_v26 = vshll.u32 %v3996_v62, 16  ;;  %v3397_v38 = vrot.slane %v3286_v1, 1  ;;  %3962 = vst.msk [vmem:[%s8280_s11 + $0x84] sm:$0xf] %vm3927_vm5, %v9873_v29 }
 0x222   : > { %v3759_v56 = vsel %vm1256_vm1, %v9425_v39, %v9904_v12  ;;  %v3488_v46 = vadd.f32 %v3403_v24, %v7951_v35  ;;  %v3994_v48 = vpack.c.bf16 %v3906_v4, %v3906_v4  ;;  %v3285_v5 = vmul.f32 %v5669_v54, %v8162_v33  ;;  %3963 = vst.msk [vmem:[%s8280_s11 + $0x88] sm:$0xf] %vm3927_vm5, %v9873_v29 }
 0x223   : > { %v4131_v17 = vrot.slane %v4129_v3, 7  ;;  %v8685_v59 = vmul.f32 %v5669_v54, %v8187_v40  ;;  %v3753_v12 = vrot.slane %v3642_v2, 2  ;;  %v5738_v1 = vpop.permute.xlu2 %5737  ;;  %v5725_v4 = vunpack.i.h.bf16 %v8636_v34  ;;  %3965 = vst.msk [vmem:[%s8280_s11 + $0x90] sm:$0xf] %vm3927_vm5, %v9873_v29 }
 0x224   : > { %v3844_v53 = vadd.f32 %v3759_v56, %v3488_v46  ;;  %v4112_v3 = vshrl.u32 %v3994_v48, 16  ;;  %v3395_v39 = vrot.slane %v3285_v5, 1  ;;  %v3287_v24 = vmul.f32 %v5674_v37, %v8162_v33  ;;  %3966 = vst.msk [vmem:[%s8280_s11 + $0x94] sm:$0xf] %vm3927_vm5, %v9873_v29 }
 0x225   : > { %v8687_v62 = vor.u32 %v4132_v26, %v4131_v17  ;;  %v4136_v57 = vrot.slane %v4131_v17, 4  ;;  %v9426_v35 = vrot.slane %v8685_v59, 2  ;;  %v4115_v26 = vshll.u32 %v3994_v48, 16  ;;  %3968 = vst.msk [vmem:[%s8280_s11 + $0x9c] sm:$0xf] %vm3927_vm5, %v9873_v29 }
 0x226   : > { %v3880_v17 = vadd.f32 %v8363_v36, %v3844_v53  ;;  %v4114_v2 = vrot.slane %v4112_v3, 7  ;;  %v9905_v56 = vrot.slane %v8420_v10, 1  ;;  %v3398_v5 = vsel %vm899_vm0, %v3395_v39, %v3397_v38  ;;  %3969 = vst.msk [vmem:[%s8280_s11 + $0xa0] sm:$0xf] %vm3927_vm5, %v9873_v29 }
 0x227   : > { %v4391_v54 = vsel %vm8465_vm4, %v4136_v57, %v4751_v7  ;;  %v4746_v7 = vld [vmem:[%s8280_s11 + $0x50] sm:$0x1]  ;;  %v3486_v53 = vadd.f32 %v3398_v5, %v8155_v50  ;;  %v5740_v3 = vunpack.i.h.bf16 %v5738_v1  ;;  %v3754_v38 = vsel %vm1256_vm1, %v9426_v35, %v3753_v12  ;;  %3971 = vst.msk [vmem:[%s8280_s11 + $0xa8] sm:$0xf] %vm3927_vm5, %v9873_v29 }
 0x228   : > { %4752 = vst [vmem:[%s8280_s11 + $0x5c] sm:$0x1] %v4391_v54  ;;  %v3396_v46 = vsel %vm899_vm0, %v9905_v56, %v3395_v39  ;;  %v3912_v57 = vmax.f32 %v3880_v17, 0.0  ;;  %v8714_v48 = vor.u32 %v4115_v26, %v4114_v2  ;;  %v4119_v10 = vrot.slane %v4114_v2, 4 }
 0x229   : > { %v8708_v37 = vadd.f32 %v3396_v46, %v8153_v30  ;;  %v5739_v30 = vunpack.i.l.bf16 %v5738_v1  ;;  %v9428_v39 = vunpack.i.l.bf16 %v8636_v34  ;;  %v3842_v54 = vadd.f32 %v3754_v38, %v3486_v53  ;;  %3972 = vst.msk [vmem:[%s8280_s11 + $0xac] sm:$0xf] %vm3927_vm5, %v9873_v29 }
 0x22a   : > { %v8723_v50 = vpack.c.bf16 %v3912_v57, %v3912_v57  ;;  %v3628_v17 = vmul.f32 %v5740_v3, %v8187_v40  ;;  %v4384_v2 = vsel %vm8465_vm4, %v4119_v10, %v4746_v7  ;;  %v8732_v12 = vmul.f32 %v5725_v4, %v8162_v33  ;;  %3974 = vst.msk [vmem:[%s8280_s11 + $0xb4] sm:$0xf] %vm3927_vm5, %v9873_v29 }
 0x22b   : > { %v3399_v26 = vrot.slane %v3287_v24, 1  ;;  %v3625_v1 = vmul.f32 %v5739_v30, %v8187_v40  ;;  %v4081_v56 = vshll.u32 %v8577_v45, 16  ;;  %4747 = vst [vmem:[%s8280_s11 + $0x50] sm:$0x1] %v4384_v2  ;;  %v3878_v7 = vadd.f32 %v8363_v36, %v3842_v54  ;;  %v4761_v54 = vld [vmem:[%s8280_s11 + $0x74] sm:$0x1] }
 0x22c   : > { %v4163_v5 = vshrl.u32 %v8723_v50, 16  ;;  %v3730_v57 = vrot.slane %v3628_v17, 2  ;;  %v8754_v3 = vmul.f32 %v9428_v39, %v8162_v33  ;;  %v9906_v17 = vrot.slane %v8400_v41, 2  ;;  %v5688_v41 = vpop.permute.xlu1 %5687  ;;  %3975 = vst.msk [vmem:[%s8280_s11 + $0xb8] sm:$0xf] %vm3927_vm5, %v9873_v29 }
 0x22d   : > { %v3725_v53 = vrot.slane %v3625_v1, 2  ;;  %v8749_v45 = vor.u32 %v4081_v56, %v8604_v14  ;;  %v3910_v38 = vmax.f32 %v3878_v7, 0.0  ;;  %v8766_v14 = vsel %vm899_vm0, %v3399_v26, %v3400_v47  ;;  %3977 = vst.msk [vmem:[%s8280_s11 + $0xc0] sm:$0xf] %vm3927_vm5, %v9873_v29 }
 0x22e   : > { %v8756_v10 = vrot.slane %v4163_v5, 7  ;;  %v9907_v1 = vrot.slane %v8522_v27, 2  ;;  %v5690_v47 = vunpack.i.h.bf16 %v5688_v41  ;;  %v5689_v26 = vunpack.i.l.bf16 %v5688_v41  ;;  %3978 = vst.msk [vmem:[%s8280_s11 + $0xc4] sm:$0xf] %vm3927_vm5, %v9873_v29 }
 0x22f   : > { %v3727_v2 = vsel %vm1256_vm1, %v3725_v53, %v9906_v17  ;;  %v3998_v7 = vpack.c.bf16 %v3910_v38, %v3910_v38  ;;  %3980 = vst.msk [vmem:[%s8280_s11 + $0xcc] sm:$0xf] %vm3927_vm5, %v9873_v29 }
 0x230   : > { %v3732_v56 = vsel %vm1256_vm1, %v3730_v57, %v9907_v1  ;;  %v4170_v5 = vrot.slane %v8756_v10, 4  ;;  %v3831_v23 = vadd.f32 %v3727_v2, %v8587_v28  ;;  %v5683_v57 = vpop.permute.xlu0 %5682  ;;  %v3294_v2 = vmul.f32 %v5690_v47, %v8162_v33  ;;  %3981 = vst.msk [vmem:[%s8280_s11 + $0xd0] sm:$0xf] %vm3927_vm5, %v9873_v29 }
 0x231   : > { %v3833_v27 = vadd.f32 %v3732_v56, %v8654_v13  ;;  %v4146_v38 = vshrl.u32 %v3998_v7, 16  ;;  %v4149_v28 = vshll.u32 %v3998_v7, 16  ;;  %v8796_v1 = vmul.f32 %v5690_v47, %v8187_v40 }
 0x232   : > { %v4405_v53 = vsel %vm8465_vm4, %v4170_v5, %v4761_v54  ;;  %v3867_v17 = vadd.f32 %v8363_v36, %v3831_v23  ;;  %v3293_v56 = vmul.f32 %v5689_v26, %v8162_v33  ;;  %v4756_v54 = vld [vmem:[%s8280_s11 + $0x68] sm:$0x1]  ;;  %v5685_v23 = vunpack.i.h.bf16 %v5683_v57 }
 0x233   : > { %4762 = vst [vmem:[%s8280_s11 + $0x74] sm:$0x1] %v4405_v53  ;;  %v3869_v13 = vadd.f32 %v8363_v36, %v3833_v27  ;;  %v4148_v5 = vrot.slane %v4146_v38, 7  ;;  %v5684_v41 = vunpack.i.l.bf16 %v5683_v57  ;;  %v3410_v27 = vrot.slane %v3294_v2, 1 }
 0x234   : > { %9908 = vst [vmem:[#allocation35_spill] sm:$0xff] %v8796_v1  ;;  %v3899_v7 = vmax.f32 %v3867_v17, 0.0  ;;  %v9427_v47 = vrot.slane %v8796_v1, 2  ;;  %v3409_v35 = vrot.slane %v3293_v56, 1  ;;  %v3292_v17 = vmul.f32 %v5685_v23, %v8162_v33 }
 0x235   : > { %v3901_v53 = vmax.f32 %v3869_v13, 0.0  ;;  %v8807_v30 = vor.u32 %v4149_v28, %v4148_v5  ;;  %v4153_v26 = vrot.slane %v4148_v5, 4  ;;  %v9909_v13 = vrot.slane %v8581_v43, 1 }
 0x236   : > { %v3987_v38 = vpack.c.bf16 %v3899_v7, %v3899_v7  ;;  %v9910_v28 = vrot.slane %v8602_v6, 2  ;;  %v3411_v5 = vsel %vm899_vm0, %v3409_v35, %v3410_v27  ;;  %v5753_v6 = vpop.permute.xlu2 %5752  ;;  %v3407_v35 = vrot.slane %v3292_v17, 1 }
 0x237   : > { %v3989_v57 = vpack.c.bf16 %v3901_v53, %v3901_v53  ;;  %v3413_v2 = vsel %vm899_vm0, %v3410_v27, %v9909_v13  ;;  %v4398_v7 = vsel %vm8465_vm4, %v4153_v26, %v4756_v54  ;;  %v8831_v43 = vadd.f32 %v3411_v5, %v8204_v25  ;;  %v4728_v27 = vld [vmem:[%s8280_s11 + $0x24] sm:$0xf] }
 0x238   : > { %v3769_v56 = vsel %vm1256_vm1, %v9427_v47, %v9910_v28  ;;  %v4053_v53 = vshrl.u32 %v3987_v38, 16  ;;  %v4056_v46 = vshll.u32 %v3987_v38, 16  ;;  %4757 = vst [vmem:[%s8280_s11 + $0x68] sm:$0x1] %v4398_v7  ;;  %v3492_v47 = vadd.f32 %v3413_v2, %v8217_v42 }
 0x239   : > { %9911 = vst [vmem:[#allocation8_spill] sm:$0xff] %v8831_v43  ;;  %v4070_v13 = vshrl.u32 %v3989_v57, 16  ;;  %v4073_v28 = vshll.u32 %v3989_v57, 16  ;;  %v3648_v25 = vmul.f32 %v5685_v23, %v8187_v40  ;;  %v3291_v38 = vmul.f32 %v5684_v41, %v8162_v33  ;;  %v4733_v57 = vld [vmem:[%s8280_s11 + $0x30] sm:$0xf] }
 0x23a   : > { %v4055_v26 = vrot.slane %v4053_v53, 7  ;;  %v3647_v42 = vmul.f32 %v5684_v41, %v8187_v40  ;;  %v3848_v5 = vadd.f32 %v3769_v56, %v3492_v47  ;;  %v5755_v7 = vunpack.i.h.bf16 %v5753_v6 }
 0x23b   : > { %v4072_v2 = vrot.slane %v4070_v13, 7  ;;  %v5754_v23 = vunpack.i.l.bf16 %v5753_v6  ;;  %v3763_v41 = vrot.slane %v3648_v25, 2  ;;  %v3405_v4 = vrot.slane %v3291_v38, 1 }
 0x23c   : > { %v4058_v53 = vor.u32 %v4056_v46, %v4055_v26  ;;  %v4059_v24 = vrot.slane %v4055_v26, 4  ;;  %v3884_v13 = vadd.f32 %v8363_v36, %v3848_v5  ;;  %v3761_v1 = vrot.slane %v3647_v42, 2  ;;  %v5703_v26 = vpop.permute.xlu1 %5702  ;;  %v8891_v42 = vpop.permute.xlu0 %5697 }
 0x23d   : > { %v4075_v39 = vor.u32 %v4073_v28, %v4072_v2  ;;  %v4076_v43 = vrot.slane %v4072_v2, 4  ;;  %v9916_v56 = vrot.slane %v8459_v58, 1  ;;  %v3408_v28 = vsel %vm899_vm0, %v3405_v4, %v3407_v35 }
 0x23e   : > { %v4067_v46 = vsel %vm8837_vm8, %v4059_v24, %v8645_v49  ;;  %v4359_v47 = vsel %vm8850_vm9, %v4058_v53, %v4728_v27  ;;  %v3432_v25 = vrot.slane %v8754_v3, 1  ;;  %v3916_v27 = vmax.f32 %v3884_v13, 0.0 }
 0x23f   : > { %v3406_v6 = vsel %vm899_vm0, %v9916_v56, %v3405_v4  ;;  %v4084_v49 = vsel %vm8837_vm8, %v4076_v43, %v8749_v45  ;;  %4729 = vst [vmem:[%s8280_s11 + $0x24] sm:$0xf] %v4359_v47  ;;  %v4366_v24 = vsel %vm8850_vm9, %v4075_v39, %v4733_v57  ;;  %v3487_v58 = vadd.f32 %v8766_v14, %v7949_v20 }
 0x240   : > { %4730 = vst.msk [vmem:[%s8280_s11 + $0x28] sm:$0xf] %vm3927_vm5, %v4067_v46  ;;  %v3490_v4 = vadd.f32 %v3408_v28, %v8230_v31  ;;  %v3646_v35 = vmul.f32 %v5755_v7, %v8187_v40  ;;  %v3643_v38 = vmul.f32 %v5754_v23, %v8187_v40  ;;  %v4004_v45 = vpack.c.bf16 %v3916_v27, %v3916_v27  ;;  %v4771_v27 = vld [vmem:[%s8280_s11 + $0x8c] sm:$0x1] }
 0x241   : > { %4734 = vst [vmem:[%s8280_s11 + $0x30] sm:$0xf] %v4366_v24  ;;  %v3489_v39 = vadd.f32 %v3406_v6, %v8228_v0  ;;  %v3764_v43 = vsel %vm1256_vm1, %v3761_v1, %v3763_v41  ;;  %v5705_v57 = vunpack.i.h.bf16 %v5703_v26  ;;  %v5704_v2 = vunpack.i.l.bf16 %v5703_v26 }
 0x242   : > { %4735 = vst.msk [vmem:[%s8280_s11 + $0x34] sm:$0xf] %vm3927_vm5, %v4084_v49  ;;  %v3846_v20 = vadd.f32 %v3764_v43, %v3490_v4  ;;  %v3760_v14 = vrot.slane %v3646_v35, 2  ;;  %v3755_v31 = vrot.slane %v3643_v38, 2  ;;  %v4197_v5 = vshrl.u32 %v4004_v45, 16 }
 0x243   : > { %v8902_v7 = vmul.f32 %v5705_v57, %v8162_v33  ;;  %v8905_v0 = vmul.f32 %v5705_v57, %v8187_v40  ;;  %v5700_v23 = vunpack.i.h.bf16 %v8891_v42  ;;  %v4200_v53 = vshll.u32 %v4004_v45, 16 }
 0x244   : > { %v3882_v41 = vadd.f32 %v8363_v36, %v3846_v20  ;;  %v9917_v13 = vrot.slane %v8651_v63, 2  ;;  %v3762_v47 = vsel %vm1256_vm1, %v3760_v14, %v3761_v1  ;;  %v4199_v56 = vrot.slane %v4197_v5, 7 }
 0x245   : > { %v3845_v28 = vadd.f32 %v3762_v47, %v3489_v39  ;;  %v3420_v26 = vrot.slane %v8902_v7, 1  ;;  %v4166_v49 = vshll.u32 %v8723_v50, 16  ;;  %v3776_v24 = vrot.slane %v8905_v0, 2 }
 0x246   : > { %v3757_v46 = vsel %vm1256_vm1, %v3755_v31, %v9917_v13  ;;  %v3914_v63 = vmax.f32 %v3882_v41, 0.0  ;;  %v5699_v1 = vunpack.i.l.bf16 %v8891_v42  ;;  %v4204_v4 = vrot.slane %v4199_v56, 4 }
 0x247   : > { %v3843_v6 = vadd.f32 %v3757_v46, %v3487_v58  ;;  %v8930_v58 = vor.u32 %v4200_v53, %v4199_v56  ;;  %v3881_v50 = vadd.f32 %v8363_v36, %v3845_v28  ;;  %v9918_v38 = vunpack.i.l.bf16 %v8636_v34 }
 0x248   : > { %v4168_v42 = vor.u32 %v4166_v49, %v8756_v10  ;;  %v4002_v39 = vpack.c.bf16 %v3914_v63, %v3914_v63  ;;  %v9919_v43 = vrot.slane %v8663_v18, 1  ;;  %v8952_v14 = vmul.f32 %v5704_v2, %v8162_v33 }
 0x249   : > { %v3879_v35 = vadd.f32 %v8363_v36, %v3843_v6  ;;  %v8937_v45 = vmul.f32 %v9918_v38, %v8187_v40  ;;  %v3913_v20 = vmax.f32 %v3881_v50, 0.0  ;;  %v3298_v10 = vmul.f32 %v5700_v23, %v8162_v33  ;;  %v4758_v38 = vld [vmem:[%s8280_s11 + $0x6c] sm:$0xf] }
 0x24a   : > { %v3423_v57 = vsel %vm899_vm0, %v3420_v26, %v9919_v43  ;;  %v4419_v18 = vsel %vm8465_vm4, %v4204_v4, %v4771_v27  ;;  %v4180_v31 = vshrl.u32 %v4002_v39, 16  ;;  %v9920_v5 = vrot.slane %v8666_v60, 2  ;;  %v4766_v60 = vld [vmem:[%s8280_s11 + $0x80] sm:$0x1]  ;;  %v8981_v4 = vpop.permute.xlu2 %5767 }
 0x24b   : > { %v3911_v34 = vmax.f32 %v3879_v35, 0.0  ;;  %v3496_v41 = vadd.f32 %v3423_v57, %v8305_v11  ;;  %v4001_v13 = vpack.c.bf16 %v3913_v20, %v3913_v20  ;;  %v3654_v46 = vmul.f32 %v5700_v23, %v8187_v40  ;;  %4772 = vst [vmem:[%s8280_s11 + $0x8c] sm:$0x1] %v4419_v18 }
 0x24c   : > { %v3779_v53 = vsel %vm1256_vm1, %v3776_v24, %v9920_v5  ;;  %v3297_v47 = vmul.f32 %v5699_v1, %v8162_v33  ;;  %v4182_v56 = vrot.slane %v4180_v31, 7  ;;  %v4183_v6 = vshll.u32 %v4002_v39, 16  ;;  %v4763_v31 = vld [vmem:[%s8280_s11 + $0x78] sm:$0xf] }
 0x24d   : > { %v3999_v2 = vpack.c.bf16 %v3911_v34, %v3911_v34  ;;  %v3852_v28 = vadd.f32 %v3779_v53, %v3496_v41  ;;  %v8976_v11 = vmul.f32 %v5699_v1, %v8187_v40  ;;  %v4172_v63 = vshrl.u32 %v4001_v13, 16  ;;  %v5718_v41 = vpop.permute.xlu1 %5717 }
 0x24e   : > { %v3417_v27 = vrot.slane %v3298_v10, 1  ;;  %v4185_v35 = vor.u32 %v4183_v6, %v4182_v56  ;;  %v4187_v50 = vrot.slane %v4182_v56, 4  ;;  %v4175_v1 = vshll.u32 %v4001_v13, 16 }
 0x24f   : > { %v4155_v49 = vshrl.u32 %v3999_v2, 16  ;;  %v4158_v23 = vshll.u32 %v3999_v2, 16  ;;  %v3888_v39 = vadd.f32 %v8363_v36, %v3852_v28  ;;  %v4174_v57 = vrot.slane %v4172_v63, 7  ;;  %v5713_v63 = vpop.permute.xlu0 %5712 }
 0x250   : > { %v3773_v34 = vrot.slane %v3654_v46, 2  ;;  %v3415_v20 = vrot.slane %v3297_v47, 1  ;;  %v4412_v10 = vsel %vm8465_vm4, %v4187_v50, %v4766_v60  ;;  %v3771_v53 = vrot.slane %v8976_v11, 2  ;;  %v9922_v50 = vld [vmem:[#allocation32_spill] sm:$0xff] }
 0x251   : > { %v4157_v43 = vrot.slane %v4155_v49, 7  ;;  %v3920_v5 = vmax.f32 %v3888_v39, 0.0  ;;  %v5769_v36 = vunpack.i.l.bf16 %v8981_v4  ;;  %v4177_v56 = vor.u32 %v4175_v1, %v4174_v57  ;;  %4767 = vst [vmem:[%s8280_s11 + $0x80] sm:$0x1] %v4412_v10 }
 0x252   : > { %v4178_v46 = vrot.slane %v4174_v57, 4  ;;  %v3788_v47 = vrot.slane %v8937_v45, 2  ;;  %v9921_v60 = vrot.slane %v8557_v61, 1  ;;  %v3418_v28 = vsel %vm899_vm0, %v3415_v20, %v3417_v27 }
 0x253   : > { %v4160_v2 = vor.u32 %v4158_v23, %v4157_v43  ;;  %v4161_v13 = vrot.slane %v4157_v43, 4  ;;  %v9002_v29 = vpack.c.bf16 %v3920_v5, %v3920_v5  ;;  %v4408_v45 = vsel %vm8850_vm9, %v4177_v56, %v4763_v31  ;;  %v4781_v5 = vld [vmem:[%s8280_s11 + $0xa4] sm:$0x1] }
 0x254   : > { %v3416_v6 = vsel %vm899_vm0, %v9921_v60, %v3415_v20  ;;  %v4186_v49 = vsel %vm8837_vm8, %v4178_v46, %v4185_v35  ;;  %v3419_v61 = vrot.slane %v8952_v14, 1  ;;  %v3774_v35 = vsel %vm1256_vm1, %v3771_v53, %v3773_v34  ;;  %4764 = vst [vmem:[%s8280_s11 + $0x78] sm:$0xf] %v4408_v45  ;;  %v9045_v46 = vld [vmem:[%s9314_s2] ss:$0 sm:$0xff] }
 0x255   : > { %v4169_v18 = vsel %vm8837_vm8, %v4161_v13, %v4168_v42  ;;  %v4401_v23 = vsel %vm8850_vm9, %v4160_v2, %v4758_v38  ;;  %v4231_v27 = vshrl.u32 %v9002_v29, 16  ;;  %v9020_v1 = vadd.f32 %v3416_v6, %v9922_v50  ;;  %v9923_v42 = vld [vmem:[#allocation31_spill] sm:$0xff]  ;;  %4765 = vst.msk [vmem:[%s8280_s11 + $0x7c] sm:$0xf] %vm3927_vm5, %v4186_v49 }
 0x256   : > { %4759 = vst [vmem:[%s8280_s11 + $0x6c] sm:$0xf] %v4401_v23  ;;  %v3494_v39 = vadd.f32 %v3418_v28, %v9923_v42  ;;  %v3661_v38 = vmul.f32 %v5769_v36, %v8187_v40  ;;  %v5720_v43 = vunpack.i.h.bf16 %v5718_v41  ;;  %v5719_v57 = vunpack.i.l.bf16 %v5718_v41 }
 0x257   : > { %4760 = vst.msk [vmem:[%s8280_s11 + $0x70] sm:$0xf] %vm3927_vm5, %v4169_v18  ;;  %v9030_v20 = vrot.slane %v4231_v27, 7  ;;  %v5715_v10 = vunpack.i.h.bf16 %v5713_v63  ;;  %v5714_v31 = vunpack.i.l.bf16 %v5713_v63  ;;  %v3421_v36 = vsel %vm899_vm0, %v3419_v61, %v3420_v26  ;;  %v5733_v61 = vpop.permute.xlu1 %5732 }
 0x258   : > { %v3850_v14 = vadd.f32 %v3774_v35, %v3494_v39  ;;  %v3785_v2 = vrot.slane %v3661_v38, 2  ;;  %v3306_v13 = vmul.f32 %v5720_v43, %v8162_v33  ;;  %v3662_v56 = vmul.f32 %v5720_v43, %v8187_v40  ;;  %v9924_v38 = vld [vmem:[#allocation67_spill] sm:$0xff] }
 0x259   : > { %v3305_v34 = vmul.f32 %v5719_v57, %v8162_v33  ;;  %v4238_v41 = vrot.slane %v9030_v20, 4  ;;  %v3304_v6 = vmul.f32 %v5715_v10, %v8162_v33  ;;  %v5770_v28 = vunpack.i.h.bf16 %v8981_v4  ;;  %v9925_v57 = vld [vmem:[#allocation50_spill] sm:$0xff] }
 0x25a   : > { %v3886_v60 = vadd.f32 %v9045_v46, %v3850_v14  ;;  %v3430_v18 = vrot.slane %v3306_v13, 1  ;;  %v3786_v49 = vrot.slane %v3662_v56, 2  ;;  %v3660_v45 = vmul.f32 %v5715_v10, %v8187_v40 }
 0x25b   : > { %v3429_v23 = vrot.slane %v3305_v34, 1  ;;  %v4433_v7 = vsel %vm8465_vm4, %v4238_v41, %v4781_v5  ;;  %v3303_v63 = vmul.f32 %v5714_v31, %v8162_v33  ;;  %v3427_v42 = vrot.slane %v3304_v6, 1 }
 0x25c   : > { %v3918_v26 = vmax.f32 %v3886_v60, 0.0  ;;  %4782 = vst [vmem:[%s8280_s11 + $0xa4] sm:$0x1] %v4433_v7  ;;  %v3433_v27 = vsel %vm899_vm0, %v3430_v18, %v3432_v25  ;;  %v3787_v50 = vsel %vm1256_vm1, %v3785_v2, %v3786_v49  ;;  %v3789_v35 = vsel %vm1256_vm1, %v3786_v49, %v3788_v47 }
 0x25d   : > { %v3431_v4 = vsel %vm899_vm0, %v3429_v23, %v3430_v18  ;;  %v3500_v14 = vadd.f32 %v3433_v27, %v9925_v57  ;;  %v3425_v10 = vrot.slane %v3303_v63, 1  ;;  %v9066_v5 = vmul.f32 %v5714_v31, %v8187_v40 }
 0x25e   : > { %v9060_v39 = vpack.c.bf16 %v3918_v26, %v3918_v26  ;;  %v3499_v43 = vadd.f32 %v3431_v4, %v9924_v38  ;;  %v5735_v3 = vunpack.i.h.bf16 %v5733_v61  ;;  %v5734_v25 = vunpack.i.l.bf16 %v5733_v61  ;;  %v9082_v26 = vpop.permute.xlu0 %5727 }
 0x25f   : > { %v3856_v56 = vadd.f32 %v3789_v35, %v3500_v14  ;;  %v3783_v34 = vrot.slane %v3660_v45, 2  ;;  %v9926_v41 = vrot.slane %v8657_v44, 1  ;;  %v3428_v60 = vsel %vm899_vm0, %v3425_v10, %v3427_v42  ;;  %v4776_v44 = vld [vmem:[%s8280_s11 + $0x98] sm:$0x1] }
 0x260   : > { %v4214_v2 = vshrl.u32 %v9060_v39, 16  ;;  %v3855_v13 = vadd.f32 %v3787_v50, %v3499_v43  ;;  %v3781_v6 = vrot.slane %v9066_v5, 2  ;;  %v3622_v18 = vmul.f32 %v5735_v3, %v8187_v40 }
 0x261   : > { %v3426_v47 = vsel %vm899_vm0, %v9926_v41, %v3425_v10  ;;  %v3892_v23 = vadd.f32 %v9045_v46, %v3856_v56  ;;  %v9086_v45 = vmul.f32 %v5770_v28, %v8187_v40  ;;  %v3498_v63 = vadd.f32 %v3428_v60, %v8283_v52  ;;  %v9112_v60 = vpop.permute.xlu1 %5747 }
 0x262   : > { %v9075_v31 = vrot.slane %v4214_v2, 7  ;;  %v3891_v49 = vadd.f32 %v9045_v46, %v3855_v13  ;;  %v9080_v7 = vadd.f32 %v3426_v47, %v8269_v9  ;;  %v3720_v61 = vrot.slane %v3622_v18, 2  ;;  %v9929_v18 = vld [vmem:[#allocation10_spill] sm:$0xff] }
 0x263   : > { %v3619_v27 = vmul.f32 %v5734_v25, %v8187_v40  ;;  %v3924_v42 = vmax.f32 %v3892_v23, 0.0  ;;  %v3784_v9 = vsel %vm1256_vm1, %v3781_v6, %v3783_v34  ;;  %v9927_v43 = vrot.slane %v8452_v55, 2 }
 0x264   : > { %v4221_v50 = vrot.slane %v9075_v31, 4  ;;  %v3923_v4 = vmax.f32 %v3891_v49, 0.0  ;;  %v3854_v35 = vadd.f32 %v3784_v9, %v3498_v63  ;;  %v5730_v52 = vunpack.i.h.bf16 %v9082_v26 }
 0x265   : > { %v3715_v38 = vrot.slane %v3619_v27, 2  ;;  %v3722_v28 = vsel %vm1256_vm1, %v3720_v61, %v9927_v43  ;;  %v4012_v10 = vpack.c.bf16 %v3924_v42, %v3924_v42  ;;  %v9102_v25 = vadd.f32 %v3421_v36, %v8303_v15  ;;  %v4788_v27 = vld [vmem:[%s8280_s11 + $0xb4] sm:$0xf] }
 0x266   : > { %v4426_v57 = vsel %vm8465_vm4, %v4221_v50, %v4776_v44  ;;  %v4011_v14 = vpack.c.bf16 %v3923_v4, %v3923_v4  ;;  %v3829_v3 = vadd.f32 %v3722_v28, %v8481_v19  ;;  %v3790_v2 = vrot.slane %v9086_v45, 2  ;;  %v4791_v50 = vld [vmem:[%s8280_s11 + $0xbc] sm:$0x1] }
 0x267   : > { %4777 = vst [vmem:[%s8280_s11 + $0x98] sm:$0x1] %v4426_v57  ;;  %v3890_v55 = vadd.f32 %v9045_v46, %v3854_v35  ;;  %v9928_v13 = vrot.slane %v8316_v8, 2  ;;  %v4265_v41 = vshrl.u32 %v4012_v10, 16  ;;  %v3310_v47 = vmul.f32 %v5730_v52, %v8162_v33 }
 0x268   : > { %v4257_v34 = vshrl.u32 %v4011_v14, 16  ;;  %v3666_v19 = vmul.f32 %v5730_v52, %v8187_v40  ;;  %v4260_v15 = vshll.u32 %v4011_v14, 16  ;;  %v3865_v23 = vadd.f32 %v9045_v46, %v3829_v3 }
 0x269   : > { %v3717_v56 = vsel %vm1256_vm1, %v3715_v38, %v9928_v13  ;;  %v3922_v36 = vmax.f32 %v3890_v55, 0.0  ;;  %v4267_v63 = vrot.slane %v4265_v41, 7  ;;  %v4268_v8 = vshll.u32 %v4012_v10, 16 }
 0x26a   : > { %v3827_v49 = vadd.f32 %v3717_v56, %v9929_v18  ;;  %v4259_v44 = vrot.slane %v4257_v34, 7  ;;  %v5729_v61 = vunpack.i.l.bf16 %v9082_v26  ;;  %v3897_v9 = vmax.f32 %v3865_v23, 0.0 }
 0x26b   : > { %v9119_v4 = vpack.c.bf16 %v3922_v36, %v3922_v36  ;;  %v5750_v35 = vunpack.i.h.bf16 %v9112_v60  ;;  %v4270_v28 = vor.u32 %v4268_v8, %v4267_v63  ;;  %v4272_v52 = vrot.slane %v4267_v63, 4 }
 0x26c   : > { %v3863_v42 = vadd.f32 %v9045_v46, %v3827_v49  ;;  %v4262_v38 = vor.u32 %v4260_v15, %v4259_v44  ;;  %v4263_v43 = vrot.slane %v4259_v44, 4  ;;  %v3985_v26 = vpack.c.bf16 %v3897_v9, %v3897_v9 }
 0x26d   : > { %v4248_v57 = vshrl.u32 %v9119_v4, 16  ;;  %v3437_v10 = vrot.slane %v3310_v47, 1  ;;  %v4447_v13 = vsel %vm8465_vm4, %v4272_v52, %v4791_v50  ;;  %v3309_v56 = vmul.f32 %v5729_v61, %v8162_v33  ;;  %v4786_v47 = vld [vmem:[%s8280_s11 + $0xb0] sm:$0x1] }
 0x26e   : > { %v3895_v14 = vmax.f32 %v3863_v42, 0.0  ;;  %v4271_v3 = vsel %vm8837_vm8, %v4263_v43, %v4270_v28  ;;  %v4443_v55 = vsel %vm8850_vm9, %v4262_v38, %v4788_v27  ;;  %v4036_v15 = vshrl.u32 %v3985_v26, 16  ;;  %4792 = vst [vmem:[%s8280_s11 + $0xbc] sm:$0x1] %v4447_v13  ;;  %v9931_v28 = vld [vmem:[#allocation15_spill] sm:$0xff] }
 0x26f   : > { %4789 = vst [vmem:[%s8280_s11 + $0xb4] sm:$0xf] %v4443_v55  ;;  %v9132_v34 = vrot.slane %v4248_v57, 7  ;;  %v3793_v36 = vrot.slane %v3666_v19, 2  ;;  %v4039_v18 = vshll.u32 %v3985_v26, 16  ;;  %v3435_v49 = vrot.slane %v3309_v56, 1 }
 0x270   : > { %v3983_v41 = vpack.c.bf16 %v3895_v14, %v3895_v14  ;;  %4790 = vst.msk [vmem:[%s8280_s11 + $0xb8] sm:$0xf] %vm3927_vm5, %v4271_v3  ;;  %v3665_v23 = vmul.f32 %v5729_v61, %v8187_v40  ;;  %v3640_v44 = vmul.f32 %v5750_v35, %v8187_v40  ;;  %v5749_v27 = vunpack.i.l.bf16 %v9112_v60  ;;  %v4723_v35 = vld [vmem:[%s8280_s11 + $0x18] sm:$0xf]  ;;  %v4718_v26 = vld [vmem:[%s8280_s11 + $0xc] sm:$0xf] }
 0x271   : > { %v4255_v33 = vrot.slane %v9132_v34, 4  ;;  %v4038_v19 = vrot.slane %v4036_v15, 7  ;;  %v9930_v50 = vrot.slane %v8732_v12, 1  ;;  %v3438_v9 = vsel %vm899_vm0, %v3435_v49, %v3437_v10  ;;  %v9932_v57 = vld [vmem:[#allocation57_spill] sm:$0xff]  ;;  %v5743_v15 = vpop.permute.xlu0 %5742 }
 0x272   : > { %v4019_v63 = vshrl.u32 %v3983_v41, 16  ;;  %v4022_v8 = vshll.u32 %v3983_v41, 16  ;;  %v3791_v38 = vrot.slane %v3665_v23, 2  ;;  %v3502_v14 = vadd.f32 %v3438_v9, %v9932_v57  ;;  %v9933_v23 = vld [vmem:[#allocation12_spill] sm:$0xff] }
 0x273   : > { %v3436_v42 = vsel %vm899_vm0, %v9930_v50, %v3435_v49  ;;  %v4440_v61 = vsel %vm8465_vm4, %v4255_v33, %v4786_v47  ;;  %v4041_v60 = vor.u32 %v4039_v18, %v4038_v19  ;;  %v4042_v3 = vrot.slane %v4038_v19, 4 }
 0x274   : > { %v4021_v43 = vrot.slane %v4019_v63, 7  ;;  %v3501_v52 = vadd.f32 %v3436_v42, %v9931_v28  ;;  %4787 = vst [vmem:[%s8280_s11 + $0xb0] sm:$0x1] %v4440_v61  ;;  %v3792_v12 = vsel %vm1256_vm1, %v3790_v2, %v3791_v38  ;;  %v3794_v10 = vsel %vm1256_vm1, %v3791_v38, %v3793_v36  ;;  %v5763_v2 = vpop.permute.xlu1 %5762 }
 0x275   : > { %v3858_v41 = vadd.f32 %v3794_v10, %v3502_v14  ;;  %v4050_v47 = vsel %vm8837_vm8, %v4042_v3, %v8554_v16  ;;  %v4352_v18 = vsel %vm8850_vm9, %v4041_v60, %v4723_v35  ;;  %v3750_v49 = vrot.slane %v3640_v44, 2 }
 0x276   : > { %v4024_v55 = vor.u32 %v4022_v8, %v4021_v43  ;;  %v4025_v13 = vrot.slane %v4021_v43, 4  ;;  %v3857_v56 = vadd.f32 %v3792_v12, %v3501_v52  ;;  %v3637_v45 = vmul.f32 %v5749_v27, %v8187_v40  ;;  %4724 = vst [vmem:[%s8280_s11 + $0x18] sm:$0xf] %v4352_v18 }
 0x277   : > { %v3894_v16 = vadd.f32 %v9045_v46, %v3858_v41  ;;  %v9934_v44 = vrot.slane %v8685_v59, 2  ;;  %v5745_v19 = vunpack.i.h.bf16 %v5743_v15  ;;  %v5744_v50 = vunpack.i.l.bf16 %v5743_v15  ;;  %4725 = vst.msk [vmem:[%s8280_s11 + $0x1c] sm:$0xf] %vm3927_vm5, %v4050_v47  ;;  %v9936_v47 = vld [vmem:[#allocation13_spill] sm:$0xff] }
 0x278   : > { %v4033_v36 = vsel %vm8837_vm8, %v4025_v13, %v9933_v23  ;;  %v4343_v33 = vsel %vm8850_vm9, %v4024_v55, %v4718_v26  ;;  %v3893_v63 = vadd.f32 %v9045_v46, %v3857_v56  ;;  %v3745_v8 = vrot.slane %v3637_v45, 2 }
 0x279   : > { %4719 = vst [vmem:[%s8280_s11 + $0xc] sm:$0xf] %v4343_v33  ;;  %v3752_v27 = vsel %vm1256_vm1, %v3750_v49, %v9934_v44  ;;  %v3926_v9 = vmax.f32 %v3894_v16, 0.0  ;;  %v5765_v61 = vunpack.i.h.bf16 %v5763_v2  ;;  %v9935_v35 = vrot.slane %v8565_v22, 2  ;;  %v9939_v33 = vld [vmem:[#allocation9_spill] sm:$0xff]  ;;  %v9940_v16 = vld [vmem:[#allocation48_spill] sm:$0xff] }
 0x27a   : > { %4720 = vst.msk [vmem:[%s8280_s11 + $0x10] sm:$0xf] %vm3927_vm5, %v4033_v36  ;;  %v3925_v42 = vmax.f32 %v3893_v63, 0.0  ;;  %v3841_v38 = vadd.f32 %v3752_v27, %v8708_v37  ;;  %v3634_v28 = vmul.f32 %v5745_v19, %v8187_v40  ;;  %v3631_v59 = vmul.f32 %v5744_v50, %v8187_v40  ;;  %v4796_v44 = vld [vmem:[%s8280_s11 + $0xc8] sm:$0x1] }
 0x27b   : > { %v3747_v43 = vsel %vm1256_vm1, %v3745_v8, %v9935_v35  ;;  %v5764_v52 = vunpack.i.l.bf16 %v5763_v2  ;;  %v4014_v14 = vpack.c.bf16 %v3926_v9, %v3926_v9  ;;  %v3658_v12 = vmul.f32 %v5765_v61, %v8187_v40  ;;  %v4793_v2 = vld [vmem:[%s8280_s11 + $0xc0] sm:$0xf] }
 0x27c   : > { %v4013_v57 = vpack.c.bf16 %v3925_v42, %v3925_v42  ;;  %v3839_v26 = vadd.f32 %v3747_v43, %v8593_v21  ;;  %v3877_v60 = vadd.f32 %v9045_v46, %v3841_v38  ;;  %v3740_v37 = vrot.slane %v3634_v28, 2 }
 0x27d   : > { %v3735_v3 = vrot.slane %v3631_v59, 2  ;;  %v3655_v22 = vmul.f32 %v5764_v52, %v8187_v40  ;;  %v4282_v13 = vshrl.u32 %v4014_v14, 16  ;;  %v4285_v56 = vshll.u32 %v4014_v14, 16  ;;  %v5758_v52 = vpop.permute.xlu0 %5757 }
 0x27e   : > { %v4274_v10 = vshrl.u32 %v4013_v57, 16  ;;  %v4277_v55 = vshll.u32 %v4013_v57, 16  ;;  %v3875_v41 = vadd.f32 %v9045_v46, %v3839_v26  ;;  %v3909_v15 = vmax.f32 %v3877_v60, 0.0 }
 0x27f   : > { %v9937_v18 = vrot.slane %v9936_v47, 2  ;;  %v9938_v49 = vrot.slane %v8612_v32, 2  ;;  %v4284_v36 = vrot.slane %v4282_v13, 7  ;;  %v3780_v50 = vrot.slane %v3658_v12, 2 }
 0x280   : > { %v4276_v23 = vrot.slane %v4274_v10, 7  ;;  %v3907_v27 = vmax.f32 %v3875_v41, 0.0  ;;  %v3997_v19 = vpack.c.bf16 %v3909_v15, %v3909_v15  ;;  %v3775_v42 = vrot.slane %v3655_v22, 2  ;;  %v4753_v10 = vld [vmem:[%s8280_s11 + $0x60] sm:$0xf] }
 0x281   : > { %v3737_v21 = vsel %vm1256_vm1, %v3735_v3, %v9937_v18  ;;  %v3742_v45 = vsel %vm1256_vm1, %v3740_v37, %v9938_v49  ;;  %v4287_v61 = vor.u32 %v4285_v56, %v4284_v36  ;;  %v4289_v32 = vrot.slane %v4284_v36, 4 }
 0x282   : > { %v3835_v63 = vadd.f32 %v3737_v21, %v9939_v33  ;;  %v3837_v8 = vadd.f32 %v3742_v45, %v9940_v16  ;;  %v4279_v9 = vor.u32 %v4277_v55, %v4276_v23  ;;  %v4280_v38 = vrot.slane %v4276_v23, 4  ;;  %v4748_v21 = vld [vmem:[%s8280_s11 + $0x54] sm:$0xf] }
 0x283   : > { %v3995_v35 = vpack.c.bf16 %v3907_v27, %v3907_v27  ;;  %v4138_v43 = vshrl.u32 %v3997_v19, 16  ;;  %v4141_v28 = vshll.u32 %v3997_v19, 16  ;;  %v4454_v26 = vsel %vm8465_vm4, %v4289_v32, %v4796_v44 }
 0x284   : > { %v3871_v59 = vadd.f32 %v9045_v46, %v3835_v63  ;;  %v4288_v57 = vsel %vm8837_vm8, %v4280_v38, %v4287_v61  ;;  %v4450_v14 = vsel %vm8850_vm9, %v4279_v9, %v4793_v2  ;;  %v3873_v60 = vadd.f32 %v9045_v46, %v3837_v8  ;;  %4797 = vst [vmem:[%s8280_s11 + $0xc8] sm:$0x1] %v4454_v26  ;;  %v4743_v9 = vld [vmem:[%s8280_s11 + $0x48] sm:$0xf] }
 0x285   : > { %4794 = vst [vmem:[%s8280_s11 + $0xc0] sm:$0xf] %v4450_v14  ;;  %v4121_v37 = vshrl.u32 %v3995_v35, 16  ;;  %v4124_v3 = vshll.u32 %v3995_v35, 16  ;;  %v4140_v12 = vrot.slane %v4138_v43, 7  ;;  %v3777_v13 = vsel %vm1256_vm1, %v3775_v42, %v3776_v24  ;;  %v9941_v14 = vld [vmem:[#allocation41_spill] sm:$0xff] }
 0x286   : > { %v3903_v22 = vmax.f32 %v3871_v59, 0.0  ;;  %4795 = vst.msk [vmem:[%s8280_s11 + $0xc4] sm:$0xf] %vm3927_vm5, %v4288_v57  ;;  %v3905_v55 = vmax.f32 %v3873_v60, 0.0  ;;  %v3782_v51 = vsel %vm1256_vm1, %v3780_v50, %v3781_v6  ;;  %v5760_v56 = vunpack.i.h.bf16 %v5758_v52 }
 0x287   : > { %v4123_v41 = vrot.slane %v4121_v37, 7  ;;  %v4143_v15 = vor.u32 %v4141_v28, %v4140_v12  ;;  %v4144_v47 = vrot.slane %v4140_v12, 4  ;;  %v3851_v45 = vadd.f32 %v3777_v13, %v9102_v25 }
 0x288   : > { %v3991_v18 = vpack.c.bf16 %v3903_v22, %v3903_v22  ;;  %v3993_v49 = vpack.c.bf16 %v3905_v55, %v3905_v55  ;;  %v3853_v0 = vadd.f32 %v3782_v51, %v9080_v7  ;;  %v3652_v24 = vmul.f32 %v5760_v56, %v8187_v40 }
 0x289   : > { %v4126_v5 = vor.u32 %v4124_v3, %v4123_v41  ;;  %v4127_v6 = vrot.slane %v4123_v41, 4  ;;  %v4152_v2 = vsel %vm8837_vm8, %v4144_v47, %v8807_v30  ;;  %v4394_v23 = vsel %vm8850_vm9, %v4143_v15, %v4753_v10  ;;  %v4738_v30 = vld [vmem:[%s8280_s11 + $0x3c] sm:$0xf]  ;;  %v4783_v15 = vld [vmem:[%s8280_s11 + $0xa8] sm:$0xf] }
 0x28a   : > { %4754 = vst [vmem:[%s8280_s11 + $0x60] sm:$0xf] %v4394_v23  ;;  %v4087_v36 = vshrl.u32 %v3991_v18, 16  ;;  %v4090_v33 = vshll.u32 %v3991_v18, 16  ;;  %v4104_v25 = vshrl.u32 %v3993_v49, 16  ;;  %v4107_v63 = vshll.u32 %v3993_v49, 16 }
 0x28b   : > { %v4135_v7 = vsel %vm8837_vm8, %v4127_v6, %v8687_v62  ;;  %v4387_v16 = vsel %vm8850_vm9, %v4126_v5, %v4748_v21  ;;  %4755 = vst.msk [vmem:[%s8280_s11 + $0x64] sm:$0xf] %vm3927_vm5, %v4152_v2  ;;  %v3887_v8 = vadd.f32 %v9045_v46, %v3851_v45  ;;  %v3889_v44 = vadd.f32 %v9045_v46, %v3853_v0  ;;  %v9944_v0 = vld [vmem:[#allocation8_spill] sm:$0xff] }
 0x28c   : > { %4749 = vst [vmem:[%s8280_s11 + $0x54] sm:$0xf] %v4387_v16  ;;  %v4089_v27 = vrot.slane %v4087_v36, 7  ;;  %v4106_v19 = vrot.slane %v4104_v25, 7  ;;  %v3770_v50 = vrot.slane %v3652_v24, 2  ;;  %v5759_v42 = vunpack.i.l.bf16 %v5758_v52 }
 0x28d   : > { %4750 = vst.msk [vmem:[%s8280_s11 + $0x58] sm:$0xf] %vm3927_vm5, %v4135_v7  ;;  %v3919_v62 = vmax.f32 %v3887_v8, 0.0  ;;  %v3921_v38 = vmax.f32 %v3889_v44, 0.0  ;;  %v4251_v12 = vshll.u32 %v9119_v4, 16  ;;  %v9942_v4 = vld [vmem:[#allocation35_spill] sm:$0xff] }
 0x28e   : > { %v4092_v61 = vor.u32 %v4090_v33, %v4089_v27  ;;  %v4093_v32 = vrot.slane %v4089_v27, 4  ;;  %v4109_v35 = vor.u32 %v4107_v63, %v4106_v19  ;;  %v4110_v43 = vrot.slane %v4106_v19, 4  ;;  %v4773_v44 = vld [vmem:[%s8280_s11 + $0x90] sm:$0xf] }
 0x28f   : > { %v4007_v28 = vpack.c.bf16 %v3919_v62, %v3919_v62  ;;  %v4009_v59 = vpack.c.bf16 %v3921_v38, %v3921_v38  ;;  %v3649_v57 = vmul.f32 %v5759_v42, %v8187_v40  ;;  %v3772_v52 = vsel %vm1256_vm1, %v3770_v50, %v3771_v53  ;;  %v4768_v38 = vld [vmem:[%s8280_s11 + $0x84] sm:$0xf] }
 0x290   : > { %v4101_v26 = vsel %vm8837_vm8, %v4093_v32, %v9941_v14  ;;  %v4118_v60 = vsel %vm8837_vm8, %v4110_v43, %v8714_v48  ;;  %v4373_v37 = vsel %vm8850_vm9, %v4092_v61, %v4738_v30  ;;  %v4380_v3 = vsel %vm8850_vm9, %v4109_v35, %v4743_v9 }
 0x291   : > { %4739 = vst [vmem:[%s8280_s11 + $0x3c] sm:$0xf] %v4373_v37  ;;  %v4223_v40 = vshrl.u32 %v4007_v28, 16  ;;  %v4240_v11 = vshrl.u32 %v4009_v59, 16  ;;  %v4234_v53 = vshll.u32 %v9002_v29, 16  ;;  %v3765_v22 = vrot.slane %v3649_v57, 2 }
 0x292   : > { %4740 = vst.msk [vmem:[%s8280_s11 + $0x40] sm:$0xf] %vm3927_vm5, %v4101_v26  ;;  %v3849_v48 = vadd.f32 %v3772_v52, %v9020_v1  ;;  %v4226_v55 = vshll.u32 %v4007_v28, 16  ;;  %v4243_v51 = vshll.u32 %v4009_v59, 16  ;;  %v4253_v41 = vor.u32 %v4251_v12, %v9132_v34  ;;  %v4778_v29 = vld [vmem:[%s8280_s11 + $0x9c] sm:$0xf] }
 0x293   : > { %4744 = vst [vmem:[%s8280_s11 + $0x48] sm:$0xf] %v4380_v3  ;;  %v4225_v10 = vrot.slane %v4223_v40, 7  ;;  %v4242_v13 = vrot.slane %v4240_v11, 7  ;;  %v4236_v56 = vor.u32 %v4234_v53, %v9030_v20  ;;  %v9943_v47 = vrot.slane %v9942_v4, 2 }
 0x294   : > { %4745 = vst.msk [vmem:[%s8280_s11 + $0x4c] sm:$0xf] %vm3927_vm5, %v4118_v60  ;;  %v3885_v1 = vadd.f32 %v9045_v46, %v3849_v48  ;;  %v4217_v7 = vshll.u32 %v9060_v39, 16 }
 0x295   : > { %v3767_v18 = vsel %vm1256_vm1, %v3765_v22, %v9943_v47  ;;  %v4228_v21 = vor.u32 %v4226_v55, %v4225_v10  ;;  %v4229_v49 = vrot.slane %v4225_v10, 4  ;;  %v4245_v45 = vor.u32 %v4243_v51, %v4242_v13 }
 0x296   : > { %v4246_v20 = vrot.slane %v4242_v13, 4  ;;  %v3847_v34 = vadd.f32 %v3767_v18, %v9944_v0  ;;  %v3917_v24 = vmax.f32 %v3885_v1, 0.0 }
 0x297   : > { %v4237_v5 = vsel %vm8837_vm8, %v4229_v49, %v4236_v56  ;;  %v4429_v2 = vsel %vm8850_vm9, %v4228_v21, %v4778_v29  ;;  %v4436_v23 = vsel %vm8850_vm9, %v4245_v45, %v4783_v15 }
 0x298   : > { %v4254_v6 = vsel %vm8837_vm8, %v4246_v20, %v4253_v41  ;;  %4779 = vst [vmem:[%s8280_s11 + $0x9c] sm:$0xf] %v4429_v2  ;;  %v3883_v36 = vadd.f32 %v9045_v46, %v3847_v34  ;;  %v4005_v33 = vpack.c.bf16 %v3917_v24, %v3917_v24  ;;  %v4219_v46 = vor.u32 %v4217_v7, %v9075_v31 }
 0x299   : > { %4780 = vst.msk [vmem:[%s8280_s11 + $0xa0] sm:$0xf] %vm3927_vm5, %v4237_v5 }
 0x29a   : > { %4784 = vst [vmem:[%s8280_s11 + $0xa8] sm:$0xf] %v4436_v23  ;;  %v3915_v25 = vmax.f32 %v3883_v36, 0.0  ;;  %v4206_v63 = vshrl.u32 %v4005_v33, 16  ;;  %v4209_v8 = vshll.u32 %v4005_v33, 16 }
 0x29b   : > { %4785 = vst.msk [vmem:[%s8280_s11 + $0xac] sm:$0xf] %vm3927_vm5, %v4254_v6 }
 0x29c   : > { %v4003_v16 = vpack.c.bf16 %v3915_v25, %v3915_v25  ;;  %v4208_v30 = vrot.slane %v4206_v63, 7 }
 0x29e   : > { %v4189_v27 = vshrl.u32 %v4003_v16, 16  ;;  %v4211_v19 = vor.u32 %v4209_v8, %v4208_v30  ;;  %v4212_v50 = vrot.slane %v4208_v30, 4  ;;  %v4192_v9 = vshll.u32 %v4003_v16, 16 }
 0x2a0   : > { %v4191_v42 = vrot.slane %v4189_v27, 7  ;;  %v4220_v62 = vsel %vm8837_vm8, %v4212_v50, %v4219_v46  ;;  %v4422_v39 = vsel %vm8850_vm9, %v4211_v19, %v4773_v44 }
 0x2a1   : > { %4774 = vst [vmem:[%s8280_s11 + $0x90] sm:$0xf] %v4422_v39 }
 0x2a2   : > { %v4194_v61 = vor.u32 %v4192_v9, %v4191_v42  ;;  %v4195_v32 = vrot.slane %v4191_v42, 4  ;;  %4775 = vst.msk [vmem:[%s8280_s11 + $0x94] sm:$0xf] %vm3927_vm5, %v4220_v62 }
 0x2a4   : > { %v4203_v31 = vsel %vm8837_vm8, %v4195_v32, %v8930_v58  ;;  %v4415_v35 = vsel %vm8850_vm9, %v4194_v61, %v4768_v38 }
 0x2a5   : > { %4769 = vst [vmem:[%s8280_s11 + $0x84] sm:$0xf] %v4415_v35 }
 0x2a6   : > { %4770 = vst.msk [vmem:[%s8280_s11 + $0x88] sm:$0xf] %vm3927_vm5, %v4203_v31 }
 0x2a7 PF: > { %s13_s12 = sadd.s32 1, %s5779_s12  }
 0x2a8   : > { %p10_p4 = scmp.ge.s32.totalorder %s13_s12, 4  }
 0x2aa   :  { %12 = sbr.rel (!%p10_p4) target bundleno = 1 (0x1), region = 73 }

</bundles_post_ra>
